<compile_context>
chip_gen: v6e
topology: v6e:2x2x1
jax: 0.10.0
libtpu: 0.0.40
codegen_flags: <defaults>
</compile_context>

<pallas_src>
import functools

import jax
import jax.numpy as jnp
from jax.experimental import pallas as pl
from jax.experimental.pallas import tpu as pltpu

# bf16 operands for dense weight matmuls (f32 accumulation).  Set jnp.float32 for bit parity.
MATMUL_DTYPE = jnp.bfloat16
_EPS = 1e-8

_CP = getattr(pltpu, "CompilerParams", None) or getattr(pltpu, "TPUCompilerParams", None)


def _compiler_params():
    if _CP is None:
        return None
    return _CP(dimension_semantics=("arbitrary",), vmem_limit_bytes=32 * 1024 * 1024)


def _mmw(a, b):
    """Dense weight matmul on the MXU: bf16 operands, f32 accumulation."""
    return jnp.dot(a.astype(MATMUL_DTYPE), b.astype(MATMUL_DTYPE),
                   preferred_element_type=jnp.float32)


def _mmx(a, b):
    """Exact f32 matmul: one-hot gather / scatter-add / pooling (accumulation parity)."""
    return jnp.dot(a, b, preferred_element_type=jnp.float32)


# ----------------------------------------------------------------------------
# The single fused kernel.  grid = (num_rounds,), state carried in VMEM scratch.
#   s_scr : (N, F)    node scalar state
#   v_scr : (3N, F)   node vector state, rows = [v_x; v_y; v_z]
# ----------------------------------------------------------------------------
def _painn_fused_kernel(
        # graph-constant inputs (VMEM-resident across the round grid)
        h_ref, ew_ref, eb_ref, rbf_ref, dir_ref, g_ref, sc_ref, bsum_ref, cnt_ref,
        # per-round weights (leading dim selected by the grid index via BlockSpec)
        mw1_ref, mb1_ref, mw2_ref, mb2_ref, mwf_ref,
        uvw_ref, uw1_ref, ub1_ref, uw2_ref, ub2_ref,
        # gated-equivariant-block + readout weights (round-invariant stacks)
        gwv_ref, gwm1_ref, gbm1_ref, gwm2_ref, gbm2_ref,
        row1_ref, rob1_ref, row2_ref, rob2_ref,
        # output
        mol_ref,
        # VMEM scratch (persists across grid iterations)
        s_scr, v_scr,
        *, F, N, L):
    r = pl.program_id(0)

    # ---- round 0: node embedding + zero equivariant state (no separate launch) ----
    @pl.when(r == 0)
    def _():
        s_scr[...] = _mmw(h_ref[...], ew_ref[...]) + eb_ref[...]
        v_scr[...] = jnp.zeros_like(v_scr)

    s = s_scr[...]                                        # (N, F)
    v = v_scr[...]                                        # (3N, F)
    dirs = dir_ref[...]                                   # (E, 3) packed unit directions

    # ---------------- message block ----------------
    phi = _mmw(jax.nn.silu(_mmw(s, mw1_ref[0]) + mb1_ref[0]), mw2_ref[0]) + mb2_ref[0]  # (N, 3F)
    wf = _mmw(rbf_ref[...], mwf_ref[0])                   # (E, 3F)  cutoff + bias pre-folded

    # fused edge gather: one MXU pass over the one-hot G for [phi | v_x | v_y | v_z]
    gat_in = jnp.concatenate([phi, v[0:N], v[N:2 * N], v[2 * N:3 * N]], axis=1)   # (N, 6F)
    ge = _mmx(g_ref[...], gat_in)                         # (E, 6F)

    gated = ge[:, :3 * F] * wf
    dsm, dvm1, dvm2 = gated[:, :F], gated[:, F:2 * F], gated[:, 2 * F:3 * F]

    # fused scatter-add: one MXU pass over S for [ds | dv_x | dv_y | dv_z] (4F = 128 lanes @ F=32)
    scat_in = jnp.concatenate(
        [dsm] + [dvm1 * ge[:, (3 + d) * F:(4 + d) * F] + dvm2 * dirs[:, d:d + 1]
                 for d in range(3)], axis=1)              # (E, 4F)
    agg = _mmx(sc_ref[...], scat_in)                      # (N, 4F), f32 accumulation

    s_new = s + agg[:, :F]
    v_new = v + jnp.concatenate([agg[:, (1 + d) * F:(2 + d) * F] for d in range(3)], axis=0)

    # ---------------- update block ----------------
    uvv = _mmw(v_new, uvw_ref[0])                         # (3N, 2F) = [U v | V v], one wide matmul
    uv = [uvv[d * N:(d + 1) * N, :F] for d in range(3)]
    vv = [uvv[d * N:(d + 1) * N, F:] for d in range(3)]
    vv_norm = jnp.sqrt(vv[0] ** 2 + vv[1] ** 2 + vv[2] ** 2 + _EPS)
    dot_uv = uv[0] * vv[0] + uv[1] * vv[1] + uv[2] * vv[2]

    uw1 = uw1_ref[0]                                      # (2F, F)
    hid = jax.nn.silu(_mmw(s_new, uw1[:F]) + _mmw(vv_norm, uw1[F:]) + ub1_ref[0])
    a = _mmw(hid, uw2_ref[0]) + ub2_ref[0]                # (N, 3F)
    a_vv, a_sv, a_ss = a[:, :F], a[:, F:2 * F], a[:, 2 * F:]

    s_scr[...] = s_new + a_ss + a_sv * dot_uv
    v_scr[...] = v_new + jnp.concatenate([a_vv * uv[d] for d in range(3)], axis=0)

    # ---- last round: gated equivariant blocks + invariant readout + per-molecule sum ----
    @pl.when(r == pl.num_programs(0) - 1)
    def _():
        s_f = s_scr[...]
        v_f = v_scr[...]
        for g in range(L):
            vvg = _mmw(v_f, gwv_ref[g])                   # (3N, 2F) = [wv1 v | wv2 v]
            vec1 = [vvg[d * N:(d + 1) * N, :F] for d in range(3)]
            vec2 = [vvg[d * N:(d + 1) * N, F:] for d in range(3)]
            v1n = jnp.sqrt(vec1[0] ** 2 + vec1[1] ** 2 + vec1[2] ** 2 + _EPS)
            wm1 = gwm1_ref[g]                             # (2F, F)
            hg = jax.nn.silu(_mmw(s_f, wm1[:F]) + _mmw(v1n, wm1[F:]) + gbm1_ref[g])
            out = _mmw(hg, gwm2_ref[g]) + gbm2_ref[g]     # (N, 2F)
            s_f = out[:, :F]
            gate = out[:, F:]
            v_f = jnp.concatenate([gate * vec2[d] for d in range(3)], axis=0)
        # InvariantReadout fused with the per-molecule index_add:
        #   sum_n(silu(s W1 + b1) W2 + b2) = (B @ hidden) W2 + counts * b2
        hidden = jax.nn.silu(_mmw(s_f, row1_ref[...]) + rob1_ref[...])
        mol_hidden = _mmx(bsum_ref[...], hidden)          # (M, F)
        mol_ref[...] = _mmw(mol_hidden, row2_ref[...]) + cnt_ref[...] * rob2_ref[...]


# ----------------------------------------------------------------------------
# Forward pass
# ----------------------------------------------------------------------------
def painn_forward(params, h, pos, edge_index, batch, *, num_mols, num_rounds,
                  state_dim, edge_dim, cutoff, geb_layers):
    n = h.shape[0]
    F = state_dim
    row, col = edge_index[0], edge_index[1]
    e = row.shape[0]

    # ---- one-time edge featurisation (plain JAX, outside the kernel) ----
    r_ij = pos[col] - pos[row]
    norm_r = jnp.maximum(jnp.sqrt(jnp.sum(r_ij * r_ij, axis=1, keepdims=True)), 1e-6)
    dirs = r_ij / norm_r                                                    # (E, 3) packed
    fcut = 0.5 * (jnp.cos(jnp.pi * norm_r / cutoff) + 1.0) * (norm_r < cutoff).astype(jnp.float32)
    freqs = jnp.arange(1, edge_dim + 1, dtype=jnp.float32)
    rbf = jnp.sin(freqs[None, :] * jnp.pi * norm_r / cutoff) / norm_r       # (E, edge_dim)
    # Fold the cosine cutoff AND the filter bias into an augmented RBF operand / weight:
    #   [rbf*fcut | fcut | 0] @ [[wf],[bf],[0]]  ==  (rbf @ wf + bf) * fcut
    kp = (edge_dim + 1) + ((-(edge_dim + 1)) % 8)
    rbf_aug = jnp.concatenate(
        [rbf * fcut, fcut, jnp.zeros((e, kp - edge_dim - 1), jnp.float32)], axis=1)

    # One-hot gather / scatter-add / pooling operators (exact, MXU-friendly at demo scale).
    # TODO(synk): replace with sorted-edge scalar-prefetch gather/scatter + node/edge tiling at
    # production sizes; the dense (E,N) operand alone would exhaust v7x's 64 MiB VMEM.
    G = jax.nn.one_hot(row, n, dtype=jnp.float32)                           # (E, N)
    S = jax.nn.one_hot(col, n, dtype=jnp.float32).T                         # (N, E)
    Bsum = jax.nn.one_hot(batch, num_mols, dtype=jnp.float32).T             # (M, N)
    counts = jnp.sum(Bsum, axis=1, keepdims=True)                           # (M, 1), precomputed

    # node features + embedding weights (K = 5 padded to 8); embedding runs in-kernel at round 0
    h_p = jnp.pad(h, ((0, 0), (0, (-h.shape[1]) % 8)))
    emb_w = jnp.pad(params["emb_w"], ((0, (-params["emb_w"].shape[0]) % 8), (0, 0)))
    emb_b = params["emb_b"].reshape(1, F)

    # ---- one-time stacked per-round weights (selected in-kernel via BlockSpec index_map) ----
    msg, upd = params["message"], params["update"]

    def fold_filter(m):
        w = jnp.zeros((kp, 3 * F), jnp.float32)
        w = w.at[:edge_dim].set(m["wf"])
        return w.at[edge_dim].set(m["bf"])

    mw1 = jnp.stack([m["w1"] for m in msg])
    mb1 = jnp.stack([m["b1"].reshape(1, F) for m in msg])
    mw2 = jnp.stack([m["w2"] for m in msg])
    mb2 = jnp.stack([m["b2"].reshape(1, 3 * F) for m in msg])
    mwf = jnp.stack([fold_filter(m) for m in msg])                          # (R, kp, 3F)
    uvw = jnp.stack([jnp.concatenate([u["U"], u["V"]], axis=1) for u in upd])  # (R, F, 2F)
    uw1 = jnp.stack([u["w1"] for u in upd])
    ub1 = jnp.stack([u["b1"].reshape(1, F) for u in upd])
    uw2 = jnp.stack([u["w2"] for u in upd])
    ub2 = jnp.stack([u["b2"].reshape(1, 3 * F) for u in upd])

    geb = params["geb"]
    gwv = jnp.stack([jnp.concatenate([g["wv1"], g["wv2"]], axis=1) for g in geb])  # (L, F, 2F)
    gwm1 = jnp.stack([g["wm1"] for g in geb])
    gbm1 = jnp.stack([g["bm1"].reshape(1, F) for g in geb])
    gwm2 = jnp.stack([g["wm2"] for g in geb])
    gbm2 = jnp.stack([g["bm2"].reshape(1, 2 * F) for g in geb])

    ro_w1 = params["ro_w1"]
    ro_b1 = params["ro_b1"].reshape(1, F)
    ro_w2 = params["ro_w2"]
    ro_b2 = params["ro_b2"].reshape(1, 1)

    def const2(a):      # round-invariant 2-D input, VMEM-resident across the grid
        return pl.BlockSpec(a.shape, lambda r: (0, 0))

    def const3(a):      # round-invariant 3-D stack
        return pl.BlockSpec(a.shape, lambda r: (0, 0, 0))

    def per_round(a):   # per-round stacked weight, indexed by the grid position
        return pl.BlockSpec((1,) + a.shape[1:], lambda r: (r, 0, 0))

    inputs = [
        (h_p, const2), (emb_w, const2), (emb_b, const2), (rbf_aug, const2), (dirs, const2),
        (G, const2), (S, const2), (Bsum, const2), (counts, const2),
        (mw1, per_round), (mb1, per_round), (mw2, per_round), (mb2, per_round), (mwf, per_round),
        (uvw, per_round), (uw1, per_round), (ub1, per_round), (uw2, per_round), (ub2, per_round),
        (gwv, const3), (gwm1, const3), (gbm1, const3), (gwm2, const3), (gbm2, const3),
        (ro_w1, const2), (ro_b1, const2), (ro_w2, const2), (ro_b2, const2),
    ]
    args = [a for a, _ in inputs]
    in_specs = [mk(a) for a, mk in inputs]

    molwise = pl.pallas_call(
        functools.partial(_painn_fused_kernel, F=F, N=n, L=geb_layers),
        out_shape=jax.ShapeDtypeStruct((num_mols, 1), jnp.float32),
        grid=(num_rounds,),
        in_specs=in_specs,
        out_specs=pl.BlockSpec((num_mols, 1), lambda r: (0, 0)),
        scratch_shapes=[pltpu.VMEM((n, F), jnp.float32),
                        pltpu.VMEM((3 * n, F), jnp.float32)],
        compiler_params=_compiler_params(),
    )(*args)
    return molwise[:, 0]


# ----------------------------------------------------------------------------
# Deterministic parameter initialization (PyTorch-style uniform(-1/sqrt(fan_in), ...))
# ----------------------------------------------------------------------------
def _init_linear(key, fan_in, fan_out):
    kw, kb = jax.random.split(key)
    bound = 1.0 / float(fan_in) ** 0.5
    w = jax.random.uniform(kw, (fan_in, fan_out), jnp.float32, -bound, bound)
    b = jax.random.uniform(kb, (fan_out,), jnp.float32, -bound, bound)
    return w, b


def init_params(key, state_dim, edge_dim, num_rounds, geb_layers):
    F = state_dim
    keys = iter(jax.random.split(key, 64))
    params = {}
    params["emb_w"], params["emb_b"] = _init_linear(next(keys), 5, F)
    params["message"] = []
    for _ in range(num_rounds):
        w1, b1 = _init_linear(next(keys), F, F)
        w2, b2 = _init_linear(next(keys), F, 3 * F)
        wf, bf = _init_linear(next(keys), edge_dim, 3 * F)
        params["message"].append(dict(w1=w1, b1=b1, w2=w2, b2=b2, wf=wf, bf=bf))
    params["update"] = []
    for _ in range(num_rounds):
        U, _ = _init_linear(next(keys), F, F)
        V, _ = _init_linear(next(keys), F, F)
        w1, b1 = _init_linear(next(keys), 2 * F, F)
        w2, b2 = _init_linear(next(keys), F, 3 * F)
        params["update"].append(dict(U=U, V=V, w1=w1, b1=b1, w2=w2, b2=b2))
    params["geb"] = []
    for _ in range(geb_layers):
        wv1, _ = _init_linear(next(keys), F, F)
        wv2, _ = _init_linear(next(keys), F, F)
        wm1, bm1 = _init_linear(next(keys), 2 * F, F)
        wm2, bm2 = _init_linear(next(keys), F, 2 * F)
        params["geb"].append(dict(wv1=wv1, wv2=wv2, wm1=wm1, bm1=bm1, wm2=wm2, bm2=bm2))
    params["ro_w1"], params["ro_b1"] = _init_linear(next(keys), F, F)
    params["ro_w2"], params["ro_b2"] = _init_linear(next(keys), F, 1)
    return params


# ----------------------------------------------------------------------------
# Demo
# ----------------------------------------------------------------------------
if __name__ == "__main__":
    key = jax.random.PRNGKey(0)
    k_h, k_pos, k_p = jax.random.split(key, 3)

    state_dim, edge_dim, cutoff = 32, 20, 5.0
    num_rounds, geb_layers = 3, 3
    atoms_per_mol, num_mols = 8, 2
    n = atoms_per_mol * num_mols

    h = jax.random.normal(k_h, (n, 5), jnp.float32)            # data.h
    pos = jax.random.normal(k_pos, (n, 3), jnp.float32)        # data.pos

    # fully-connected intra-molecule edges (no self loops)
    edges = []
    for m in range(num_mols):
        base = m * atoms_per_mol
        for i in range(atoms_per_mol):
            for j in range(atoms_per_mol):
                if i != j:
                    edges.append((base + i, base + j))
    edge_index = jnp.asarray(edges, dtype=jnp.int32).T          # (2, E), E = 112
    batch = jnp.repeat(jnp.arange(num_mols, dtype=jnp.int32), atoms_per_mol)

    params = init_params(k_p, state_dim, edge_dim, num_rounds, geb_layers)

    fwd = jax.jit(functools.partial(
        painn_forward, num_mols=num_mols, num_rounds=num_rounds,
        state_dim=state_dim, edge_dim=edge_dim, cutoff=cutoff, geb_layers=geb_layers))

    out = fwd(params, h, pos, edge_index, batch)
    jax.block_until_ready(out)
    assert out.shape == (num_mols,) and out.dtype == jnp.float32
    print("KERNEL_OK")
</pallas_src>

<mosaic_0001>
module attributes {stable_mosaic.version = 11 : i64} {
  func.func @_painn_fused_kernel(%arg0: i32, %arg1: memref<16x8xf32, #tpu.memory_space<vmem>>, %arg2: memref<8x32xf32, #tpu.memory_space<vmem>>, %arg3: memref<1x32xf32, #tpu.memory_space<vmem>>, %arg4: memref<112x24xf32, #tpu.memory_space<vmem>>, %arg5: memref<112x3xf32, #tpu.memory_space<vmem>>, %arg6: memref<112x16xf32, #tpu.memory_space<vmem>>, %arg7: memref<16x112xf32, #tpu.memory_space<vmem>>, %arg8: memref<2x16xf32, #tpu.memory_space<vmem>>, %arg9: memref<2x1xf32, #tpu.memory_space<vmem>>, %arg10: memref<1x32x32xf32, #tpu.memory_space<vmem>>, %arg11: memref<1x1x32xf32, #tpu.memory_space<vmem>>, %arg12: memref<1x32x96xf32, #tpu.memory_space<vmem>>, %arg13: memref<1x1x96xf32, #tpu.memory_space<vmem>>, %arg14: memref<1x24x96xf32, #tpu.memory_space<vmem>>, %arg15: memref<1x32x64xf32, #tpu.memory_space<vmem>>, %arg16: memref<1x64x32xf32, #tpu.memory_space<vmem>>, %arg17: memref<1x1x32xf32, #tpu.memory_space<vmem>>, %arg18: memref<1x32x96xf32, #tpu.memory_space<vmem>>, %arg19: memref<1x1x96xf32, #tpu.memory_space<vmem>>, %arg20: memref<3x32x64xf32, #tpu.memory_space<vmem>>, %arg21: memref<3x64x32xf32, #tpu.memory_space<vmem>>, %arg22: memref<3x1x32xf32, #tpu.memory_space<vmem>>, %arg23: memref<3x32x64xf32, #tpu.memory_space<vmem>>, %arg24: memref<3x1x64xf32, #tpu.memory_space<vmem>>, %arg25: memref<32x32xf32, #tpu.memory_space<vmem>>, %arg26: memref<1x32xf32, #tpu.memory_space<vmem>>, %arg27: memref<32x1xf32, #tpu.memory_space<vmem>>, %arg28: memref<1x1xf32, #tpu.memory_space<vmem>>, %arg29: memref<2x1xf32, #tpu.memory_space<vmem>>, %arg30: memref<16x32xf32, #tpu.memory_space<vmem>>, %arg31: memref<48x32xf32, #tpu.memory_space<vmem>>) attributes {dimension_semantics = [#tpu.dimension_semantics<arbitrary>], iteration_bounds = array<i64: 3>, scalar_prefetch = 0 : i64, scratch_operands = 2 : i64, tpu.core_type = #tpu.core_type<tc>, window_params = [{pipeline_mode = #tpu.pipeline_mode<synchronous>, transform_indices = @transform_0, window_bounds = array<i64: 16, 8>}, {pipeline_mode = #tpu.pipeline_mode<synchronous>, transform_indices = @transform_1, window_bounds = array<i64: 8, 32>}, {pipeline_mode = #tpu.pipeline_mode<synchronous>, transform_indices = @transform_2, window_bounds = array<i64: 1, 32>}, {pipeline_mode = #tpu.pipeline_mode<synchronous>, transform_indices = @transform_3, window_bounds = array<i64: 112, 24>}, {pipeline_mode = #tpu.pipeline_mode<synchronous>, transform_indices = @transform_4, window_bounds = array<i64: 112, 3>}, {pipeline_mode = #tpu.pipeline_mode<synchronous>, transform_indices = @transform_5, window_bounds = array<i64: 112, 16>}, {pipeline_mode = #tpu.pipeline_mode<synchronous>, transform_indices = @transform_6, window_bounds = array<i64: 16, 112>}, {pipeline_mode = #tpu.pipeline_mode<synchronous>, transform_indices = @transform_7, window_bounds = array<i64: 2, 16>}, {pipeline_mode = #tpu.pipeline_mode<synchronous>, transform_indices = @transform_8, window_bounds = array<i64: 2, 1>}, {transform_indices = @transform_9, window_bounds = array<i64: 1, 32, 32>}, {transform_indices = @transform_10, window_bounds = array<i64: 1, 1, 32>}, {transform_indices = @transform_11, window_bounds = array<i64: 1, 32, 96>}, {transform_indices = @transform_12, window_bounds = array<i64: 1, 1, 96>}, {transform_indices = @transform_13, window_bounds = array<i64: 1, 24, 96>}, {transform_indices = @transform_14, window_bounds = array<i64: 1, 32, 64>}, {transform_indices = @transform_15, window_bounds = array<i64: 1, 64, 32>}, {transform_indices = @transform_16, window_bounds = array<i64: 1, 1, 32>}, {transform_indices = @transform_17, window_bounds = array<i64: 1, 32, 96>}, {transform_indices = @transform_18, window_bounds = array<i64: 1, 1, 96>}, {pipeline_mode = #tpu.pipeline_mode<synchronous>, transform_indices = @transform_19, window_bounds = array<i64: 3, 32, 64>}, {pipeline_mode = #tpu.pipeline_mode<synchronous>, transform_indices = @transform_20, window_bounds = array<i64: 3, 64, 32>}, {pipeline_mode = #tpu.pipeline_mode<synchronous>, transform_indices = @transform_21, window_bounds = array<i64: 3, 1, 32>}, {pipeline_mode = #tpu.pipeline_mode<synchronous>, transform_indices = @transform_22, window_bounds = array<i64: 3, 32, 64>}, {pipeline_mode = #tpu.pipeline_mode<synchronous>, transform_indices = @transform_23, window_bounds = array<i64: 3, 1, 64>}, {pipeline_mode = #tpu.pipeline_mode<synchronous>, transform_indices = @transform_24, window_bounds = array<i64: 32, 32>}, {pipeline_mode = #tpu.pipeline_mode<synchronous>, transform_indices = @transform_25, window_bounds = array<i64: 1, 32>}, {pipeline_mode = #tpu.pipeline_mode<synchronous>, transform_indices = @transform_26, window_bounds = array<i64: 32, 1>}, {pipeline_mode = #tpu.pipeline_mode<synchronous>, transform_indices = @transform_27, window_bounds = array<i64: 1, 1>}, {pipeline_mode = #tpu.pipeline_mode<synchronous>, transform_indices = @transform_28, window_bounds = array<i64: 2, 1>}]} {
    %c0_i32 = arith.constant 0 : i32
    %0 = arith.cmpi eq, %arg0, %c0_i32 : i32
    %1 = arith.extui %0 : i1 to i32
    %c0_i32_0 = arith.constant 0 : i32
    %2 = arith.cmpi ne, %1, %c0_i32_0 : i32
    scf.if %2 {
      %c0_58 = arith.constant 0 : index
      %c0_59 = arith.constant 0 : index
      %145 = vector.load %arg1[%c0_58, %c0_59] : memref<16x8xf32, #tpu.memory_space<vmem>>, vector<16x8xf32>
      %c0_60 = arith.constant 0 : index
      %c0_61 = arith.constant 0 : index
      %146 = vector.load %arg2[%c0_60, %c0_61] : memref<8x32xf32, #tpu.memory_space<vmem>>, vector<8x32xf32>
      %147 = arith.truncf %145 : vector<16x8xf32> to vector<16x8xbf16>
      %148 = arith.truncf %146 : vector<8x32xf32> to vector<8x32xbf16>
      %cst_62 = arith.constant dense<0.000000e+00> : vector<16x32xf32>
      %149 = tpu.matmul %147, %148, %cst_62 {dimension_numbers = #tpu.dot_dimension_numbers<[1], [0], [0], [1], [0, 0, 1, 1], [], []>} : vector<16x8xbf16>, vector<8x32xbf16>, vector<16x32xf32> -> vector<16x32xf32>
      %c0_63 = arith.constant 0 : index
      %c0_64 = arith.constant 0 : index
      %150 = vector.load %arg3[%c0_63, %c0_64] : memref<1x32xf32, #tpu.memory_space<vmem>>, vector<1x32xf32>
      %151 = vector.broadcast %150 : vector<1x32xf32> to vector<16x32xf32>
      %152 = arith.addf %149, %151 : vector<16x32xf32>
      %c0_65 = arith.constant 0 : index
      %c0_66 = arith.constant 0 : index
      %153 = vector.load %arg30[%c0_65, %c0_66] : memref<16x32xf32, #tpu.memory_space<vmem>>, vector<16x32xf32>
      tpu.vector_store %arg30[%c0_65, %c0_66], %152 {strides = array<i32>} : memref<16x32xf32, #tpu.memory_space<vmem>>, vector<16x32xf32>,
      %cst_67 = arith.constant 0.000000e+00 : f32
      %154 = vector.broadcast %cst_67 : f32 to vector<48x32xf32>
      %c0_68 = arith.constant 0 : index
      %c0_69 = arith.constant 0 : index
      %155 = vector.load %arg31[%c0_68, %c0_69] : memref<48x32xf32, #tpu.memory_space<vmem>>, vector<48x32xf32>
      tpu.vector_store %arg31[%c0_68, %c0_69], %154 {strides = array<i32>} : memref<48x32xf32, #tpu.memory_space<vmem>>, vector<48x32xf32>,
    } else {
    }
    %c0 = arith.constant 0 : index
    %c0_1 = arith.constant 0 : index
    %3 = vector.load %arg30[%c0, %c0_1] : memref<16x32xf32, #tpu.memory_space<vmem>>, vector<16x32xf32>
    %c0_2 = arith.constant 0 : index
    %c0_3 = arith.constant 0 : index
    %4 = vector.load %arg31[%c0_2, %c0_3] : memref<48x32xf32, #tpu.memory_space<vmem>>, vector<48x32xf32>
    %c0_4 = arith.constant 0 : index
    %c0_5 = arith.constant 0 : index
    %5 = vector.load %arg5[%c0_4, %c0_5] : memref<112x3xf32, #tpu.memory_space<vmem>>, vector<112x3xf32>
    %c0_6 = arith.constant 0 : index
    %c0_7 = arith.constant 0 : index
    %c0_8 = arith.constant 0 : index
    %6 = vector.load %arg10[%c0_6, %c0_7, %c0_8] : memref<1x32x32xf32, #tpu.memory_space<vmem>>, vector<1x32x32xf32>
    %7 = vector.shape_cast %6 : vector<1x32x32xf32> to vector<32x32xf32>
    %8 = arith.truncf %3 : vector<16x32xf32> to vector<16x32xbf16>
    %9 = arith.truncf %7 : vector<32x32xf32> to vector<32x32xbf16>
    %cst = arith.constant dense<0.000000e+00> : vector<16x32xf32>
    %10 = tpu.matmul %8, %9, %cst {dimension_numbers = #tpu.dot_dimension_numbers<[1], [0], [0], [1], [0, 0, 1, 1], [], []>} : vector<16x32xbf16>, vector<32x32xbf16>, vector<16x32xf32> -> vector<16x32xf32>
    %c0_9 = arith.constant 0 : index
    %c0_10 = arith.constant 0 : index
    %c0_11 = arith.constant 0 : index
    %11 = vector.load %arg11[%c0_9, %c0_10, %c0_11] : memref<1x1x32xf32, #tpu.memory_space<vmem>>, vector<1x1x32xf32>
    %12 = vector.shape_cast %11 : vector<1x1x32xf32> to vector<1x32xf32>
    %13 = vector.broadcast %12 : vector<1x32xf32> to vector<16x32xf32>
    %14 = arith.addf %10, %13 : vector<16x32xf32>
    %15 = arith.negf %14 : vector<16x32xf32>
    %16 = math.exp %15 : vector<16x32xf32>
    %cst_12 = arith.constant 1.000000e+00 : f32
    %17 = vector.broadcast %cst_12 : f32 to vector<16x32xf32>
    %18 = arith.addf %17, %16 : vector<16x32xf32>
    %19 = arith.divf %17, %18 : vector<16x32xf32>
    %20 = arith.mulf %14, %19 : vector<16x32xf32>
    %c0_13 = arith.constant 0 : index
    %c0_14 = arith.constant 0 : index
    %c0_15 = arith.constant 0 : index
    %21 = vector.load %arg12[%c0_13, %c0_14, %c0_15] : memref<1x32x96xf32, #tpu.memory_space<vmem>>, vector<1x32x96xf32>
    %22 = vector.shape_cast %21 : vector<1x32x96xf32> to vector<32x96xf32>
    %23 = arith.truncf %20 : vector<16x32xf32> to vector<16x32xbf16>
    %24 = arith.truncf %22 : vector<32x96xf32> to vector<32x96xbf16>
    %cst_16 = arith.constant dense<0.000000e+00> : vector<16x96xf32>
    %25 = tpu.matmul %23, %24, %cst_16 {dimension_numbers = #tpu.dot_dimension_numbers<[1], [0], [0], [1], [0, 0, 1, 1], [], []>} : vector<16x32xbf16>, vector<32x96xbf16>, vector<16x96xf32> -> vector<16x96xf32>
    %c0_17 = arith.constant 0 : index
    %c0_18 = arith.constant 0 : index
    %c0_19 = arith.constant 0 : index
    %26 = vector.load %arg13[%c0_17, %c0_18, %c0_19] : memref<1x1x96xf32, #tpu.memory_space<vmem>>, vector<1x1x96xf32>
    %27 = vector.shape_cast %26 : vector<1x1x96xf32> to vector<1x96xf32>
    %28 = vector.broadcast %27 : vector<1x96xf32> to vector<16x96xf32>
    %29 = arith.addf %25, %28 : vector<16x96xf32>
    %c0_20 = arith.constant 0 : index
    %c0_21 = arith.constant 0 : index
    %30 = vector.load %arg4[%c0_20, %c0_21] : memref<112x24xf32, #tpu.memory_space<vmem>>, vector<112x24xf32>
    %c0_22 = arith.constant 0 : index
    %c0_23 = arith.constant 0 : index
    %c0_24 = arith.constant 0 : index
    %31 = vector.load %arg14[%c0_22, %c0_23, %c0_24] : memref<1x24x96xf32, #tpu.memory_space<vmem>>, vector<1x24x96xf32>
    %32 = vector.shape_cast %31 : vector<1x24x96xf32> to vector<24x96xf32>
    %33 = arith.truncf %30 : vector<112x24xf32> to vector<112x24xbf16>
    %34 = arith.truncf %32 : vector<24x96xf32> to vector<24x96xbf16>
    %cst_25 = arith.constant dense<0.000000e+00> : vector<112x96xf32>
    %35 = tpu.matmul %33, %34, %cst_25 {dimension_numbers = #tpu.dot_dimension_numbers<[1], [0], [0], [1], [0, 0, 1, 1], [], []>} : vector<112x24xbf16>, vector<24x96xbf16>, vector<112x96xf32> -> vector<112x96xf32>
    %36 = vector.extract_strided_slice %4 {offsets = [0, 0], sizes = [16, 32], strides = [1, 1]} : vector<48x32xf32> to vector<16x32xf32>
    %37 = vector.extract_strided_slice %4 {offsets = [16, 0], sizes = [16, 32], strides = [1, 1]} : vector<48x32xf32> to vector<16x32xf32>
    %38 = vector.extract_strided_slice %4 {offsets = [32, 0], sizes = [16, 32], strides = [1, 1]} : vector<48x32xf32> to vector<16x32xf32>
    %39 = tpu.concatenate %29, %36, %37, %38 in 1 : vector<16x96xf32>, vector<16x32xf32>, vector<16x32xf32>, vector<16x32xf32> -> vector<16x192xf32>
    %c0_26 = arith.constant 0 : index
    %c0_27 = arith.constant 0 : index
    %40 = vector.load %arg6[%c0_26, %c0_27] : memref<112x16xf32, #tpu.memory_space<vmem>>, vector<112x16xf32>
    %cst_28 = arith.constant dense<0.000000e+00> : vector<112x192xf32>
    %41 = tpu.matmul %40, %39, %cst_28 {dimension_numbers = #tpu.dot_dimension_numbers<[1], [0], [0], [1], [0, 0, 1, 1], [], []>} : vector<112x16xf32>, vector<16x192xf32>, vector<112x192xf32> -> vector<112x192xf32>
    %42 = vector.extract_strided_slice %41 {offsets = [0, 0], sizes = [112, 96], strides = [1, 1]} : vector<112x192xf32> to vector<112x96xf32>
    %43 = arith.mulf %42, %35 : vector<112x96xf32>
    %44 = vector.extract_strided_slice %43 {offsets = [0, 0], sizes = [112, 32], strides = [1, 1]} : vector<112x96xf32> to vector<112x32xf32>
    %45 = vector.extract_strided_slice %43 {offsets = [0, 32], sizes = [112, 32], strides = [1, 1]} : vector<112x96xf32> to vector<112x32xf32>
    %46 = vector.extract_strided_slice %43 {offsets = [0, 64], sizes = [112, 32], strides = [1, 1]} : vector<112x96xf32> to vector<112x32xf32>
    %47 = vector.extract_strided_slice %41 {offsets = [0, 96], sizes = [112, 32], strides = [1, 1]} : vector<112x192xf32> to vector<112x32xf32>
    %48 = arith.mulf %45, %47 : vector<112x32xf32>
    %49 = vector.extract_strided_slice %5 {offsets = [0, 0], sizes = [112, 1], strides = [1, 1]} : vector<112x3xf32> to vector<112x1xf32>
    %50 = vector.broadcast %49 : vector<112x1xf32> to vector<112x32xf32>
    %51 = arith.mulf %46, %50 : vector<112x32xf32>
    %52 = arith.addf %48, %51 : vector<112x32xf32>
    %53 = vector.extract_strided_slice %41 {offsets = [0, 128], sizes = [112, 32], strides = [1, 1]} : vector<112x192xf32> to vector<112x32xf32>
    %54 = arith.mulf %45, %53 : vector<112x32xf32>
    %55 = vector.extract_strided_slice %5 {offsets = [0, 1], sizes = [112, 1], strides = [1, 1]} : vector<112x3xf32> to vector<112x1xf32>
    %56 = vector.broadcast %55 : vector<112x1xf32> to vector<112x32xf32>
    %57 = arith.mulf %46, %56 : vector<112x32xf32>
    %58 = arith.addf %54, %57 : vector<112x32xf32>
    %59 = vector.extract_strided_slice %41 {offsets = [0, 160], sizes = [112, 32], strides = [1, 1]} : vector<112x192xf32> to vector<112x32xf32>
    %60 = arith.mulf %45, %59 : vector<112x32xf32>
    %61 = vector.extract_strided_slice %5 {offsets = [0, 2], sizes = [112, 1], strides = [1, 1]} : vector<112x3xf32> to vector<112x1xf32>
    %62 = vector.broadcast %61 : vector<112x1xf32> to vector<112x32xf32>
    %63 = arith.mulf %46, %62 : vector<112x32xf32>
    %64 = arith.addf %60, %63 : vector<112x32xf32>
    %65 = tpu.concatenate %44, %52, %58, %64 in 1 : vector<112x32xf32>, vector<112x32xf32>, vector<112x32xf32>, vector<112x32xf32> -> vector<112x128xf32>
    %c0_29 = arith.constant 0 : index
    %c0_30 = arith.constant 0 : index
    %66 = vector.load %arg7[%c0_29, %c0_30] : memref<16x112xf32, #tpu.memory_space<vmem>>, vector<16x112xf32>
    %cst_31 = arith.constant dense<0.000000e+00> : vector<16x128xf32>
    %67 = tpu.matmul %66, %65, %cst_31 {dimension_numbers = #tpu.dot_dimension_numbers<[1], [0], [0], [1], [0, 0, 1, 1], [], []>} : vector<16x112xf32>, vector<112x128xf32>, vector<16x128xf32> -> vector<16x128xf32>
    %68 = vector.extract_strided_slice %67 {offsets = [0, 0], sizes = [16, 32], strides = [1, 1]} : vector<16x128xf32> to vector<16x32xf32>
    %69 = arith.addf %3, %68 : vector<16x32xf32>
    %70 = vector.extract_strided_slice %67 {offsets = [0, 32], sizes = [16, 32], strides = [1, 1]} : vector<16x128xf32> to vector<16x32xf32>
    %71 = vector.extract_strided_slice %67 {offsets = [0, 64], sizes = [16, 32], strides = [1, 1]} : vector<16x128xf32> to vector<16x32xf32>
    %72 = vector.extract_strided_slice %67 {offsets = [0, 96], sizes = [16, 32], strides = [1, 1]} : vector<16x128xf32> to vector<16x32xf32>
    %73 = tpu.concatenate %70, %71, %72 in 0 : vector<16x32xf32>, vector<16x32xf32>, vector<16x32xf32> -> vector<48x32xf32>
    %74 = arith.addf %4, %73 : vector<48x32xf32>
    %c0_32 = arith.constant 0 : index
    %c0_33 = arith.constant 0 : index
    %c0_34 = arith.constant 0 : index
    %75 = vector.load %arg15[%c0_32, %c0_33, %c0_34] : memref<1x32x64xf32, #tpu.memory_space<vmem>>, vector<1x32x64xf32>
    %76 = vector.shape_cast %75 : vector<1x32x64xf32> to vector<32x64xf32>
    %77 = arith.truncf %74 : vector<48x32xf32> to vector<48x32xbf16>
    %78 = arith.truncf %76 : vector<32x64xf32> to vector<32x64xbf16>
    %cst_35 = arith.constant dense<0.000000e+00> : vector<48x64xf32>
    %79 = tpu.matmul %77, %78, %cst_35 {dimension_numbers = #tpu.dot_dimension_numbers<[1], [0], [0], [1], [0, 0, 1, 1], [], []>} : vector<48x32xbf16>, vector<32x64xbf16>, vector<48x64xf32> -> vector<48x64xf32>
    %80 = vector.extract_strided_slice %79 {offsets = [0, 0], sizes = [16, 32], strides = [1, 1]} : vector<48x64xf32> to vector<16x32xf32>
    %81 = vector.extract_strided_slice %79 {offsets = [16, 0], sizes = [16, 32], strides = [1, 1]} : vector<48x64xf32> to vector<16x32xf32>
    %82 = vector.extract_strided_slice %79 {offsets = [32, 0], sizes = [16, 32], strides = [1, 1]} : vector<48x64xf32> to vector<16x32xf32>
    %83 = vector.extract_strided_slice %79 {offsets = [0, 32], sizes = [16, 32], strides = [1, 1]} : vector<48x64xf32> to vector<16x32xf32>
    %84 = vector.extract_strided_slice %79 {offsets = [16, 32], sizes = [16, 32], strides = [1, 1]} : vector<48x64xf32> to vector<16x32xf32>
    %85 = vector.extract_strided_slice %79 {offsets = [32, 32], sizes = [16, 32], strides = [1, 1]} : vector<48x64xf32> to vector<16x32xf32>
    %86 = arith.mulf %83, %83 : vector<16x32xf32>
    %87 = arith.mulf %84, %84 : vector<16x32xf32>
    %88 = arith.addf %86, %87 : vector<16x32xf32>
    %89 = arith.mulf %85, %85 : vector<16x32xf32>
    %90 = arith.addf %88, %89 : vector<16x32xf32>
    %cst_36 = arith.constant 9.99999993E-9 : f32
    %91 = vector.broadcast %cst_36 : f32 to vector<16x32xf32>
    %92 = arith.addf %90, %91 : vector<16x32xf32>
    %93 = math.sqrt %92 : vector<16x32xf32>
    %94 = arith.mulf %80, %83 : vector<16x32xf32>
    %95 = arith.mulf %81, %84 : vector<16x32xf32>
    %96 = arith.addf %94, %95 : vector<16x32xf32>
    %97 = arith.mulf %82, %85 : vector<16x32xf32>
    %98 = arith.addf %96, %97 : vector<16x32xf32>
    %c0_37 = arith.constant 0 : index
    %c0_38 = arith.constant 0 : index
    %c0_39 = arith.constant 0 : index
    %99 = vector.load %arg16[%c0_37, %c0_38, %c0_39] : memref<1x64x32xf32, #tpu.memory_space<vmem>>, vector<1x64x32xf32>
    %100 = vector.shape_cast %99 : vector<1x64x32xf32> to vector<64x32xf32>
    %101 = vector.extract_strided_slice %100 {offsets = [0, 0], sizes = [32, 32], strides = [1, 1]} : vector<64x32xf32> to vector<32x32xf32>
    %102 = arith.truncf %69 : vector<16x32xf32> to vector<16x32xbf16>
    %103 = arith.truncf %101 : vector<32x32xf32> to vector<32x32xbf16>
    %cst_40 = arith.constant dense<0.000000e+00> : vector<16x32xf32>
    %104 = tpu.matmul %102, %103, %cst_40 {dimension_numbers = #tpu.dot_dimension_numbers<[1], [0], [0], [1], [0, 0, 1, 1], [], []>} : vector<16x32xbf16>, vector<32x32xbf16>, vector<16x32xf32> -> vector<16x32xf32>
    %105 = vector.extract_strided_slice %100 {offsets = [32, 0], sizes = [32, 32], strides = [1, 1]} : vector<64x32xf32> to vector<32x32xf32>
    %106 = arith.truncf %93 : vector<16x32xf32> to vector<16x32xbf16>
    %107 = arith.truncf %105 : vector<32x32xf32> to vector<32x32xbf16>
    %cst_41 = arith.constant dense<0.000000e+00> : vector<16x32xf32>
    %108 = tpu.matmul %106, %107, %cst_41 {dimension_numbers = #tpu.dot_dimension_numbers<[1], [0], [0], [1], [0, 0, 1, 1], [], []>} : vector<16x32xbf16>, vector<32x32xbf16>, vector<16x32xf32> -> vector<16x32xf32>
    %109 = arith.addf %104, %108 : vector<16x32xf32>
    %c0_42 = arith.constant 0 : index
    %c0_43 = arith.constant 0 : index
    %c0_44 = arith.constant 0 : index
    %110 = vector.load %arg17[%c0_42, %c0_43, %c0_44] : memref<1x1x32xf32, #tpu.memory_space<vmem>>, vector<1x1x32xf32>
    %111 = vector.shape_cast %110 : vector<1x1x32xf32> to vector<1x32xf32>
    %112 = vector.broadcast %111 : vector<1x32xf32> to vector<16x32xf32>
    %113 = arith.addf %109, %112 : vector<16x32xf32>
    %114 = arith.negf %113 : vector<16x32xf32>
    %115 = math.exp %114 : vector<16x32xf32>
    %cst_45 = arith.constant 1.000000e+00 : f32
    %116 = vector.broadcast %cst_45 : f32 to vector<16x32xf32>
    %117 = arith.addf %116, %115 : vector<16x32xf32>
    %118 = arith.divf %116, %117 : vector<16x32xf32>
    %119 = arith.mulf %113, %118 : vector<16x32xf32>
    %c0_46 = arith.constant 0 : index
    %c0_47 = arith.constant 0 : index
    %c0_48 = arith.constant 0 : index
    %120 = vector.load %arg18[%c0_46, %c0_47, %c0_48] : memref<1x32x96xf32, #tpu.memory_space<vmem>>, vector<1x32x96xf32>
    %121 = vector.shape_cast %120 : vector<1x32x96xf32> to vector<32x96xf32>
    %122 = arith.truncf %119 : vector<16x32xf32> to vector<16x32xbf16>
    %123 = arith.truncf %121 : vector<32x96xf32> to vector<32x96xbf16>
    %cst_49 = arith.constant dense<0.000000e+00> : vector<16x96xf32>
    %124 = tpu.matmul %122, %123, %cst_49 {dimension_numbers = #tpu.dot_dimension_numbers<[1], [0], [0], [1], [0, 0, 1, 1], [], []>} : vector<16x32xbf16>, vector<32x96xbf16>, vector<16x96xf32> -> vector<16x96xf32>
    %c0_50 = arith.constant 0 : index
    %c0_51 = arith.constant 0 : index
    %c0_52 = arith.constant 0 : index
    %125 = vector.load %arg19[%c0_50, %c0_51, %c0_52] : memref<1x1x96xf32, #tpu.memory_space<vmem>>, vector<1x1x96xf32>
    %126 = vector.shape_cast %125 : vector<1x1x96xf32> to vector<1x96xf32>
    %127 = vector.broadcast %126 : vector<1x96xf32> to vector<16x96xf32>
    %128 = arith.addf %124, %127 : vector<16x96xf32>
    %129 = vector.extract_strided_slice %128 {offsets = [0, 0], sizes = [16, 32], strides = [1, 1]} : vector<16x96xf32> to vector<16x32xf32>
    %130 = vector.extract_strided_slice %128 {offsets = [0, 32], sizes = [16, 32], strides = [1, 1]} : vector<16x96xf32> to vector<16x32xf32>
    %131 = vector.extract_strided_slice %128 {offsets = [0, 64], sizes = [16, 32], strides = [1, 1]} : vector<16x96xf32> to vector<16x32xf32>
    %132 = arith.addf %69, %131 : vector<16x32xf32>
    %133 = arith.mulf %130, %98 : vector<16x32xf32>
    %134 = arith.addf %132, %133 : vector<16x32xf32>
    %c0_53 = arith.constant 0 : index
    %c0_54 = arith.constant 0 : index
    %135 = vector.load %arg30[%c0_53, %c0_54] : memref<16x32xf32, #tpu.memory_space<vmem>>, vector<16x32xf32>
    tpu.vector_store %arg30[%c0_53, %c0_54], %134 {strides = array<i32>} : memref<16x32xf32, #tpu.memory_space<vmem>>, vector<16x32xf32>,
    %136 = arith.mulf %129, %80 : vector<16x32xf32>
    %137 = arith.mulf %129, %81 : vector<16x32xf32>
    %138 = arith.mulf %129, %82 : vector<16x32xf32>
    %139 = tpu.concatenate %136, %137, %138 in 0 : vector<16x32xf32>, vector<16x32xf32>, vector<16x32xf32> -> vector<48x32xf32>
    %140 = arith.addf %74, %139 : vector<48x32xf32>
    %c0_55 = arith.constant 0 : index
    %c0_56 = arith.constant 0 : index
    %141 = vector.load %arg31[%c0_55, %c0_56] : memref<48x32xf32, #tpu.memory_space<vmem>>, vector<48x32xf32>
    tpu.vector_store %arg31[%c0_55, %c0_56], %140 {strides = array<i32>} : memref<48x32xf32, #tpu.memory_space<vmem>>, vector<48x32xf32>,
    %c2_i32 = arith.constant 2 : i32
    %142 = arith.cmpi eq, %arg0, %c2_i32 : i32
    %143 = arith.extui %142 : i1 to i32
    %c0_i32_57 = arith.constant 0 : i32
    %144 = arith.cmpi ne, %143, %c0_i32_57 : i32
    scf.if %144 {
      %c0_58 = arith.constant 0 : index
      %c0_59 = arith.constant 0 : index
      %145 = vector.load %arg30[%c0_58, %c0_59] : memref<16x32xf32, #tpu.memory_space<vmem>>, vector<16x32xf32>
      %c0_60 = arith.constant 0 : index
      %c0_61 = arith.constant 0 : index
      %146 = vector.load %arg31[%c0_60, %c0_61] : memref<48x32xf32, #tpu.memory_space<vmem>>, vector<48x32xf32>
      %c0_62 = arith.constant 0 : index
      %c0_63 = arith.constant 0 : index
      %c0_64 = arith.constant 0 : index
      %147 = vector.load %arg20[%c0_62, %c0_63, %c0_64] : memref<3x32x64xf32, #tpu.memory_space<vmem>>, vector<1x32x64xf32>
      %148 = vector.shape_cast %147 : vector<1x32x64xf32> to vector<32x64xf32>
      %149 = arith.truncf %146 : vector<48x32xf32> to vector<48x32xbf16>
      %150 = arith.truncf %148 : vector<32x64xf32> to vector<32x64xbf16>
      %cst_65 = arith.constant dense<0.000000e+00> : vector<48x64xf32>
      %151 = tpu.matmul %149, %150, %cst_65 {dimension_numbers = #tpu.dot_dimension_numbers<[1], [0], [0], [1], [0, 0, 1, 1], [], []>} : vector<48x32xbf16>, vector<32x64xbf16>, vector<48x64xf32> -> vector<48x64xf32>
      %152 = vector.extract_strided_slice %151 {offsets = [0, 0], sizes = [16, 32], strides = [1, 1]} : vector<48x64xf32> to vector<16x32xf32>
      %153 = vector.extract_strided_slice %151 {offsets = [16, 0], sizes = [16, 32], strides = [1, 1]} : vector<48x64xf32> to vector<16x32xf32>
      %154 = vector.extract_strided_slice %151 {offsets = [32, 0], sizes = [16, 32], strides = [1, 1]} : vector<48x64xf32> to vector<16x32xf32>
      %155 = vector.extract_strided_slice %151 {offsets = [0, 32], sizes = [16, 32], strides = [1, 1]} : vector<48x64xf32> to vector<16x32xf32>
      %156 = vector.extract_strided_slice %151 {offsets = [16, 32], sizes = [16, 32], strides = [1, 1]} : vector<48x64xf32> to vector<16x32xf32>
      %157 = vector.extract_strided_slice %151 {offsets = [32, 32], sizes = [16, 32], strides = [1, 1]} : vector<48x64xf32> to vector<16x32xf32>
      %158 = arith.mulf %152, %152 : vector<16x32xf32>
      %159 = arith.mulf %153, %153 : vector<16x32xf32>
      %160 = arith.addf %158, %159 : vector<16x32xf32>
      %161 = arith.mulf %154, %154 : vector<16x32xf32>
      %162 = arith.addf %160, %161 : vector<16x32xf32>
      %cst_66 = arith.constant 9.99999993E-9 : f32
      %163 = vector.broadcast %cst_66 : f32 to vector<16x32xf32>
      %164 = arith.addf %162, %163 : vector<16x32xf32>
      %165 = math.sqrt %164 : vector<16x32xf32>
      %c0_67 = arith.constant 0 : index
      %c0_68 = arith.constant 0 : index
      %c0_69 = arith.constant 0 : index
      %166 = vector.load %arg21[%c0_67, %c0_68, %c0_69] : memref<3x64x32xf32, #tpu.memory_space<vmem>>, vector<1x64x32xf32>
      %167 = vector.shape_cast %166 : vector<1x64x32xf32> to vector<64x32xf32>
      %168 = vector.extract_strided_slice %167 {offsets = [0, 0], sizes = [32, 32], strides = [1, 1]} : vector<64x32xf32> to vector<32x32xf32>
      %169 = arith.truncf %145 : vector<16x32xf32> to vector<16x32xbf16>
      %170 = arith.truncf %168 : vector<32x32xf32> to vector<32x32xbf16>
      %cst_70 = arith.constant dense<0.000000e+00> : vector<16x32xf32>
      %171 = tpu.matmul %169, %170, %cst_70 {dimension_numbers = #tpu.dot_dimension_numbers<[1], [0], [0], [1], [0, 0, 1, 1], [], []>} : vector<16x32xbf16>, vector<32x32xbf16>, vector<16x32xf32> -> vector<16x32xf32>
      %172 = vector.extract_strided_slice %167 {offsets = [32, 0], sizes = [32, 32], strides = [1, 1]} : vector<64x32xf32> to vector<32x32xf32>
      %173 = arith.truncf %165 : vector<16x32xf32> to vector<16x32xbf16>
      %174 = arith.truncf %172 : vector<32x32xf32> to vector<32x32xbf16>
      %cst_71 = arith.constant dense<0.000000e+00> : vector<16x32xf32>
      %175 = tpu.matmul %173, %174, %cst_71 {dimension_numbers = #tpu.dot_dimension_numbers<[1], [0], [0], [1], [0, 0, 1, 1], [], []>} : vector<16x32xbf16>, vector<32x32xbf16>, vector<16x32xf32> -> vector<16x32xf32>
      %176 = arith.addf %171, %175 : vector<16x32xf32>
      %c0_72 = arith.constant 0 : index
      %c0_73 = arith.constant 0 : index
      %c0_74 = arith.constant 0 : index
      %177 = vector.load %arg22[%c0_72, %c0_73, %c0_74] : memref<3x1x32xf32, #tpu.memory_space<vmem>>, vector<1x1x32xf32>
      %178 = vector.shape_cast %177 : vector<1x1x32xf32> to vector<1x32xf32>
      %179 = vector.broadcast %178 : vector<1x32xf32> to vector<16x32xf32>
      %180 = arith.addf %176, %179 : vector<16x32xf32>
      %181 = arith.negf %180 : vector<16x32xf32>
      %182 = math.exp %181 : vector<16x32xf32>
      %cst_75 = arith.constant 1.000000e+00 : f32
      %183 = vector.broadcast %cst_75 : f32 to vector<16x32xf32>
      %184 = arith.addf %183, %182 : vector<16x32xf32>
      %185 = arith.divf %183, %184 : vector<16x32xf32>
      %186 = arith.mulf %180, %185 : vector<16x32xf32>
      %c0_76 = arith.constant 0 : index
      %c0_77 = arith.constant 0 : index
      %c0_78 = arith.constant 0 : index
      %187 = vector.load %arg23[%c0_76, %c0_77, %c0_78] : memref<3x32x64xf32, #tpu.memory_space<vmem>>, vector<1x32x64xf32>
      %188 = vector.shape_cast %187 : vector<1x32x64xf32> to vector<32x64xf32>
      %189 = arith.truncf %186 : vector<16x32xf32> to vector<16x32xbf16>
      %190 = arith.truncf %188 : vector<32x64xf32> to vector<32x64xbf16>
      %cst_79 = arith.constant dense<0.000000e+00> : vector<16x64xf32>
      %191 = tpu.matmul %189, %190, %cst_79 {dimension_numbers = #tpu.dot_dimension_numbers<[1], [0], [0], [1], [0, 0, 1, 1], [], []>} : vector<16x32xbf16>, vector<32x64xbf16>, vector<16x64xf32> -> vector<16x64xf32>
      %c0_80 = arith.constant 0 : index
      %c0_81 = arith.constant 0 : index
      %c0_82 = arith.constant 0 : index
      %192 = vector.load %arg24[%c0_80, %c0_81, %c0_82] : memref<3x1x64xf32, #tpu.memory_space<vmem>>, vector<1x1x64xf32>
      %193 = vector.shape_cast %192 : vector<1x1x64xf32> to vector<1x64xf32>
      %194 = vector.broadcast %193 : vector<1x64xf32> to vector<16x64xf32>
      %195 = arith.addf %191, %194 : vector<16x64xf32>
      %196 = vector.extract_strided_slice %195 {offsets = [0, 0], sizes = [16, 32], strides = [1, 1]} : vector<16x64xf32> to vector<16x32xf32>
      %197 = vector.extract_strided_slice %195 {offsets = [0, 32], sizes = [16, 32], strides = [1, 1]} : vector<16x64xf32> to vector<16x32xf32>
      %198 = arith.mulf %197, %155 : vector<16x32xf32>
      %199 = arith.mulf %197, %156 : vector<16x32xf32>
      %200 = arith.mulf %197, %157 : vector<16x32xf32>
      %201 = tpu.concatenate %198, %199, %200 in 0 : vector<16x32xf32>, vector<16x32xf32>, vector<16x32xf32> -> vector<48x32xf32>
      %c1 = arith.constant 1 : index
      %c0_83 = arith.constant 0 : index
      %c0_84 = arith.constant 0 : index
      %202 = vector.load %arg20[%c1, %c0_83, %c0_84] : memref<3x32x64xf32, #tpu.memory_space<vmem>>, vector<1x32x64xf32>
      %203 = vector.shape_cast %202 : vector<1x32x64xf32> to vector<32x64xf32>
      %204 = arith.truncf %201 : vector<48x32xf32> to vector<48x32xbf16>
      %205 = arith.truncf %203 : vector<32x64xf32> to vector<32x64xbf16>
      %cst_85 = arith.constant dense<0.000000e+00> : vector<48x64xf32>
      %206 = tpu.matmul %204, %205, %cst_85 {dimension_numbers = #tpu.dot_dimension_numbers<[1], [0], [0], [1], [0, 0, 1, 1], [], []>} : vector<48x32xbf16>, vector<32x64xbf16>, vector<48x64xf32> -> vector<48x64xf32>
      %207 = vector.extract_strided_slice %206 {offsets = [0, 0], sizes = [16, 32], strides = [1, 1]} : vector<48x64xf32> to vector<16x32xf32>
      %208 = vector.extract_strided_slice %206 {offsets = [16, 0], sizes = [16, 32], strides = [1, 1]} : vector<48x64xf32> to vector<16x32xf32>
      %209 = vector.extract_strided_slice %206 {offsets = [32, 0], sizes = [16, 32], strides = [1, 1]} : vector<48x64xf32> to vector<16x32xf32>
      %210 = vector.extract_strided_slice %206 {offsets = [0, 32], sizes = [16, 32], strides = [1, 1]} : vector<48x64xf32> to vector<16x32xf32>
      %211 = vector.extract_strided_slice %206 {offsets = [16, 32], sizes = [16, 32], strides = [1, 1]} : vector<48x64xf32> to vector<16x32xf32>
      %212 = vector.extract_strided_slice %206 {offsets = [32, 32], sizes = [16, 32], strides = [1, 1]} : vector<48x64xf32> to vector<16x32xf32>
      %213 = arith.mulf %207, %207 : vector<16x32xf32>
      %214 = arith.mulf %208, %208 : vector<16x32xf32>
      %215 = arith.addf %213, %214 : vector<16x32xf32>
      %216 = arith.mulf %209, %209 : vector<16x32xf32>
      %217 = arith.addf %215, %216 : vector<16x32xf32>
      %cst_86 = arith.constant 9.99999993E-9 : f32
      %218 = vector.broadcast %cst_86 : f32 to vector<16x32xf32>
      %219 = arith.addf %217, %218 : vector<16x32xf32>
      %220 = math.sqrt %219 : vector<16x32xf32>
      %c1_87 = arith.constant 1 : index
      %c0_88 = arith.constant 0 : index
      %c0_89 = arith.constant 0 : index
      %221 = vector.load %arg21[%c1_87, %c0_88, %c0_89] : memref<3x64x32xf32, #tpu.memory_space<vmem>>, vector<1x64x32xf32>
      %222 = vector.shape_cast %221 : vector<1x64x32xf32> to vector<64x32xf32>
      %223 = vector.extract_strided_slice %222 {offsets = [0, 0], sizes = [32, 32], strides = [1, 1]} : vector<64x32xf32> to vector<32x32xf32>
      %224 = arith.truncf %196 : vector<16x32xf32> to vector<16x32xbf16>
      %225 = arith.truncf %223 : vector<32x32xf32> to vector<32x32xbf16>
      %cst_90 = arith.constant dense<0.000000e+00> : vector<16x32xf32>
      %226 = tpu.matmul %224, %225, %cst_90 {dimension_numbers = #tpu.dot_dimension_numbers<[1], [0], [0], [1], [0, 0, 1, 1], [], []>} : vector<16x32xbf16>, vector<32x32xbf16>, vector<16x32xf32> -> vector<16x32xf32>
      %227 = vector.extract_strided_slice %222 {offsets = [32, 0], sizes = [32, 32], strides = [1, 1]} : vector<64x32xf32> to vector<32x32xf32>
      %228 = arith.truncf %220 : vector<16x32xf32> to vector<16x32xbf16>
      %229 = arith.truncf %227 : vector<32x32xf32> to vector<32x32xbf16>
      %cst_91 = arith.constant dense<0.000000e+00> : vector<16x32xf32>
      %230 = tpu.matmul %228, %229, %cst_91 {dimension_numbers = #tpu.dot_dimension_numbers<[1], [0], [0], [1], [0, 0, 1, 1], [], []>} : vector<16x32xbf16>, vector<32x32xbf16>, vector<16x32xf32> -> vector<16x32xf32>
      %231 = arith.addf %226, %230 : vector<16x32xf32>
      %c1_92 = arith.constant 1 : index
      %c0_93 = arith.constant 0 : index
      %c0_94 = arith.constant 0 : index
      %232 = vector.load %arg22[%c1_92, %c0_93, %c0_94] : memref<3x1x32xf32, #tpu.memory_space<vmem>>, vector<1x1x32xf32>
      %233 = vector.shape_cast %232 : vector<1x1x32xf32> to vector<1x32xf32>
      %234 = vector.broadcast %233 : vector<1x32xf32> to vector<16x32xf32>
      %235 = arith.addf %231, %234 : vector<16x32xf32>
      %236 = arith.negf %235 : vector<16x32xf32>
      %237 = math.exp %236 : vector<16x32xf32>
      %cst_95 = arith.constant 1.000000e+00 : f32
      %238 = vector.broadcast %cst_95 : f32 to vector<16x32xf32>
      %239 = arith.addf %238, %237 : vector<16x32xf32>
      %240 = arith.divf %238, %239 : vector<16x32xf32>
      %241 = arith.mulf %235, %240 : vector<16x32xf32>
      %c1_96 = arith.constant 1 : index
      %c0_97 = arith.constant 0 : index
      %c0_98 = arith.constant 0 : index
      %242 = vector.load %arg23[%c1_96, %c0_97, %c0_98] : memref<3x32x64xf32, #tpu.memory_space<vmem>>, vector<1x32x64xf32>
      %243 = vector.shape_cast %242 : vector<1x32x64xf32> to vector<32x64xf32>
      %244 = arith.truncf %241 : vector<16x32xf32> to vector<16x32xbf16>
      %245 = arith.truncf %243 : vector<32x64xf32> to vector<32x64xbf16>
      %cst_99 = arith.constant dense<0.000000e+00> : vector<16x64xf32>
      %246 = tpu.matmul %244, %245, %cst_99 {dimension_numbers = #tpu.dot_dimension_numbers<[1], [0], [0], [1], [0, 0, 1, 1], [], []>} : vector<16x32xbf16>, vector<32x64xbf16>, vector<16x64xf32> -> vector<16x64xf32>
      %c1_100 = arith.constant 1 : index
      %c0_101 = arith.constant 0 : index
      %c0_102 = arith.constant 0 : index
      %247 = vector.load %arg24[%c1_100, %c0_101, %c0_102] : memref<3x1x64xf32, #tpu.memory_space<vmem>>, vector<1x1x64xf32>
      %248 = vector.shape_cast %247 : vector<1x1x64xf32> to vector<1x64xf32>
      %249 = vector.broadcast %248 : vector<1x64xf32> to vector<16x64xf32>
      %250 = arith.addf %246, %249 : vector<16x64xf32>
      %251 = vector.extract_strided_slice %250 {offsets = [0, 0], sizes = [16, 32], strides = [1, 1]} : vector<16x64xf32> to vector<16x32xf32>
      %252 = vector.extract_strided_slice %250 {offsets = [0, 32], sizes = [16, 32], strides = [1, 1]} : vector<16x64xf32> to vector<16x32xf32>
      %253 = arith.mulf %252, %210 : vector<16x32xf32>
      %254 = arith.mulf %252, %211 : vector<16x32xf32>
      %255 = arith.mulf %252, %212 : vector<16x32xf32>
      %256 = tpu.concatenate %253, %254, %255 in 0 : vector<16x32xf32>, vector<16x32xf32>, vector<16x32xf32> -> vector<48x32xf32>
      %c2 = arith.constant 2 : index
      %c0_103 = arith.constant 0 : index
      %c0_104 = arith.constant 0 : index
      %257 = vector.load %arg20[%c2, %c0_103, %c0_104] : memref<3x32x64xf32, #tpu.memory_space<vmem>>, vector<1x32x64xf32>
      %258 = vector.shape_cast %257 : vector<1x32x64xf32> to vector<32x64xf32>
      %259 = arith.truncf %256 : vector<48x32xf32> to vector<48x32xbf16>
      %260 = arith.truncf %258 : vector<32x64xf32> to vector<32x64xbf16>
      %cst_105 = arith.constant dense<0.000000e+00> : vector<48x64xf32>
      %261 = tpu.matmul %259, %260, %cst_105 {dimension_numbers = #tpu.dot_dimension_numbers<[1], [0], [0], [1], [0, 0, 1, 1], [], []>} : vector<48x32xbf16>, vector<32x64xbf16>, vector<48x64xf32> -> vector<48x64xf32>
      %262 = vector.extract_strided_slice %261 {offsets = [0, 0], sizes = [16, 32], strides = [1, 1]} : vector<48x64xf32> to vector<16x32xf32>
      %263 = vector.extract_strided_slice %261 {offsets = [16, 0], sizes = [16, 32], strides = [1, 1]} : vector<48x64xf32> to vector<16x32xf32>
      %264 = vector.extract_strided_slice %261 {offsets = [32, 0], sizes = [16, 32], strides = [1, 1]} : vector<48x64xf32> to vector<16x32xf32>
      %265 = arith.mulf %262, %262 : vector<16x32xf32>
      %266 = arith.mulf %263, %263 : vector<16x32xf32>
      %267 = arith.addf %265, %266 : vector<16x32xf32>
      %268 = arith.mulf %264, %264 : vector<16x32xf32>
      %269 = arith.addf %267, %268 : vector<16x32xf32>
      %cst_106 = arith.constant 9.99999993E-9 : f32
      %270 = vector.broadcast %cst_106 : f32 to vector<16x32xf32>
      %271 = arith.addf %269, %270 : vector<16x32xf32>
      %272 = math.sqrt %271 : vector<16x32xf32>
      %c2_107 = arith.constant 2 : index
      %c0_108 = arith.constant 0 : index
      %c0_109 = arith.constant 0 : index
      %273 = vector.load %arg21[%c2_107, %c0_108, %c0_109] : memref<3x64x32xf32, #tpu.memory_space<vmem>>, vector<1x64x32xf32>
      %274 = vector.shape_cast %273 : vector<1x64x32xf32> to vector<64x32xf32>
      %275 = vector.extract_strided_slice %274 {offsets = [0, 0], sizes = [32, 32], strides = [1, 1]} : vector<64x32xf32> to vector<32x32xf32>
      %276 = arith.truncf %251 : vector<16x32xf32> to vector<16x32xbf16>
      %277 = arith.truncf %275 : vector<32x32xf32> to vector<32x32xbf16>
      %cst_110 = arith.constant dense<0.000000e+00> : vector<16x32xf32>
      %278 = tpu.matmul %276, %277, %cst_110 {dimension_numbers = #tpu.dot_dimension_numbers<[1], [0], [0], [1], [0, 0, 1, 1], [], []>} : vector<16x32xbf16>, vector<32x32xbf16>, vector<16x32xf32> -> vector<16x32xf32>
      %279 = vector.extract_strided_slice %274 {offsets = [32, 0], sizes = [32, 32], strides = [1, 1]} : vector<64x32xf32> to vector<32x32xf32>
      %280 = arith.truncf %272 : vector<16x32xf32> to vector<16x32xbf16>
      %281 = arith.truncf %279 : vector<32x32xf32> to vector<32x32xbf16>
      %cst_111 = arith.constant dense<0.000000e+00> : vector<16x32xf32>
      %282 = tpu.matmul %280, %281, %cst_111 {dimension_numbers = #tpu.dot_dimension_numbers<[1], [0], [0], [1], [0, 0, 1, 1], [], []>} : vector<16x32xbf16>, vector<32x32xbf16>, vector<16x32xf32> -> vector<16x32xf32>
      %283 = arith.addf %278, %282 : vector<16x32xf32>
      %c2_112 = arith.constant 2 : index
      %c0_113 = arith.constant 0 : index
      %c0_114 = arith.constant 0 : index
      %284 = vector.load %arg22[%c2_112, %c0_113, %c0_114] : memref<3x1x32xf32, #tpu.memory_space<vmem>>, vector<1x1x32xf32>
      %285 = vector.shape_cast %284 : vector<1x1x32xf32> to vector<1x32xf32>
      %286 = vector.broadcast %285 : vector<1x32xf32> to vector<16x32xf32>
      %287 = arith.addf %283, %286 : vector<16x32xf32>
      %288 = arith.negf %287 : vector<16x32xf32>
      %289 = math.exp %288 : vector<16x32xf32>
      %cst_115 = arith.constant 1.000000e+00 : f32
      %290 = vector.broadcast %cst_115 : f32 to vector<16x32xf32>
      %291 = arith.addf %290, %289 : vector<16x32xf32>
      %292 = arith.divf %290, %291 : vector<16x32xf32>
      %293 = arith.mulf %287, %292 : vector<16x32xf32>
      %c2_116 = arith.constant 2 : index
      %c0_117 = arith.constant 0 : index
      %c0_118 = arith.constant 0 : index
      %294 = vector.load %arg23[%c2_116, %c0_117, %c0_118] : memref<3x32x64xf32, #tpu.memory_space<vmem>>, vector<1x32x64xf32>
      %295 = vector.shape_cast %294 : vector<1x32x64xf32> to vector<32x64xf32>
      %296 = arith.truncf %293 : vector<16x32xf32> to vector<16x32xbf16>
      %297 = arith.truncf %295 : vector<32x64xf32> to vector<32x64xbf16>
      %cst_119 = arith.constant dense<0.000000e+00> : vector<16x64xf32>
      %298 = tpu.matmul %296, %297, %cst_119 {dimension_numbers = #tpu.dot_dimension_numbers<[1], [0], [0], [1], [0, 0, 1, 1], [], []>} : vector<16x32xbf16>, vector<32x64xbf16>, vector<16x64xf32> -> vector<16x64xf32>
      %c2_120 = arith.constant 2 : index
      %c0_121 = arith.constant 0 : index
      %c0_122 = arith.constant 0 : index
      %299 = vector.load %arg24[%c2_120, %c0_121, %c0_122] : memref<3x1x64xf32, #tpu.memory_space<vmem>>, vector<1x1x64xf32>
      %300 = vector.shape_cast %299 : vector<1x1x64xf32> to vector<1x64xf32>
      %301 = vector.broadcast %300 : vector<1x64xf32> to vector<16x64xf32>
      %302 = arith.addf %298, %301 : vector<16x64xf32>
      %303 = vector.extract_strided_slice %302 {offsets = [0, 0], sizes = [16, 32], strides = [1, 1]} : vector<16x64xf32> to vector<16x32xf32>
      %c0_123 = arith.constant 0 : index
      %c0_124 = arith.constant 0 : index
      %304 = vector.load %arg25[%c0_123, %c0_124] : memref<32x32xf32, #tpu.memory_space<vmem>>, vector<32x32xf32>
      %305 = arith.truncf %303 : vector<16x32xf32> to vector<16x32xbf16>
      %306 = arith.truncf %304 : vector<32x32xf32> to vector<32x32xbf16>
      %cst_125 = arith.constant dense<0.000000e+00> : vector<16x32xf32>
      %307 = tpu.matmul %305, %306, %cst_125 {dimension_numbers = #tpu.dot_dimension_numbers<[1], [0], [0], [1], [0, 0, 1, 1], [], []>} : vector<16x32xbf16>, vector<32x32xbf16>, vector<16x32xf32> -> vector<16x32xf32>
      %c0_126 = arith.constant 0 : index
      %c0_127 = arith.constant 0 : index
      %308 = vector.load %arg26[%c0_126, %c0_127] : memref<1x32xf32, #tpu.memory_space<vmem>>, vector<1x32xf32>
      %309 = vector.broadcast %308 : vector<1x32xf32> to vector<16x32xf32>
      %310 = arith.addf %307, %309 : vector<16x32xf32>
      %311 = arith.negf %310 : vector<16x32xf32>
      %312 = math.exp %311 : vector<16x32xf32>
      %cst_128 = arith.constant 1.000000e+00 : f32
      %313 = vector.broadcast %cst_128 : f32 to vector<16x32xf32>
      %314 = arith.addf %313, %312 : vector<16x32xf32>
      %315 = arith.divf %313, %314 : vector<16x32xf32>
      %316 = arith.mulf %310, %315 : vector<16x32xf32>
      %c0_129 = arith.constant 0 : index
      %c0_130 = arith.constant 0 : index
      %317 = vector.load %arg8[%c0_129, %c0_130] : memref<2x16xf32, #tpu.memory_space<vmem>>, vector<2x16xf32>
      %cst_131 = arith.constant dense<0.000000e+00> : vector<2x32xf32>
      %318 = tpu.matmul %317, %316, %cst_131 {dimension_numbers = #tpu.dot_dimension_numbers<[1], [0], [0], [1], [0, 0, 1, 1], [], []>} : vector<2x16xf32>, vector<16x32xf32>, vector<2x32xf32> -> vector<2x32xf32>
      %c0_132 = arith.constant 0 : index
      %c0_133 = arith.constant 0 : index
      %319 = vector.load %arg27[%c0_132, %c0_133] : memref<32x1xf32, #tpu.memory_space<vmem>>, vector<32x1xf32>
      %320 = arith.truncf %318 : vector<2x32xf32> to vector<2x32xbf16>
      %321 = arith.truncf %319 : vector<32x1xf32> to vector<32x1xbf16>
      %cst_134 = arith.constant dense<0.000000e+00> : vector<2x1xf32>
      %322 = tpu.matmul %320, %321, %cst_134 {dimension_numbers = #tpu.dot_dimension_numbers<[1], [0], [0], [1], [0, 0, 1, 1], [], []>} : vector<2x32xbf16>, vector<32x1xbf16>, vector<2x1xf32> -> vector<2x1xf32>
      %c0_135 = arith.constant 0 : index
      %c0_136 = arith.constant 0 : index
      %323 = vector.load %arg9[%c0_135, %c0_136] : memref<2x1xf32, #tpu.memory_space<vmem>>, vector<2x1xf32>
      %c0_137 = arith.constant 0 : index
      %c0_138 = arith.constant 0 : index
      %324 = vector.load %arg28[%c0_137, %c0_138] : memref<1x1xf32, #tpu.memory_space<vmem>>, vector<1x1xf32>
      %325 = vector.broadcast %324 : vector<1x1xf32> to vector<2x1xf32>
      %326 = arith.mulf %323, %325 : vector<2x1xf32>
      %327 = arith.addf %322, %326 : vector<2x1xf32>
      %c0_139 = arith.constant 0 : index
      %c0_140 = arith.constant 0 : index
      %328 = vector.load %arg29[%c0_139, %c0_140] : memref<2x1xf32, #tpu.memory_space<vmem>>, vector<2x1xf32>
      tpu.vector_store %arg29[%c0_139, %c0_140], %327 {strides = array<i32>} : memref<2x1xf32, #tpu.memory_space<vmem>>, vector<2x1xf32>,
    } else {
    }
    return
  }
  func.func @transform_0(%arg0: i32) -> (i32, i32) {
    %c0_i32 = arith.constant 0 : i32
    %c0_i32_0 = arith.constant 0 : i32
    %c0_i32_1 = arith.constant 0 : i32
    return %c0_i32, %c0_i32_0 : i32, i32
  }
  func.func @transform_1(%arg0: i32) -> (i32, i32) {
    %c0_i32 = arith.constant 0 : i32
    %c0_i32_0 = arith.constant 0 : i32
    %c0_i32_1 = arith.constant 0 : i32
    return %c0_i32, %c0_i32_0 : i32, i32
  }
  func.func @transform_2(%arg0: i32) -> (i32, i32) {
    %c0_i32 = arith.constant 0 : i32
    %c0_i32_0 = arith.constant 0 : i32
    %c0_i32_1 = arith.constant 0 : i32
    return %c0_i32, %c0_i32_0 : i32, i32
  }
  func.func @transform_3(%arg0: i32) -> (i32, i32) {
    %c0_i32 = arith.constant 0 : i32
    %c0_i32_0 = arith.constant 0 : i32
    %c0_i32_1 = arith.constant 0 : i32
    return %c0_i32, %c0_i32_0 : i32, i32
  }
  func.func @transform_4(%arg0: i32) -> (i32, i32) {
    %c0_i32 = arith.constant 0 : i32
    %c0_i32_0 = arith.constant 0 : i32
    %c0_i32_1 = arith.constant 0 : i32
    return %c0_i32, %c0_i32_0 : i32, i32
  }
  func.func @transform_5(%arg0: i32) -> (i32, i32) {
    %c0_i32 = arith.constant 0 : i32
    %c0_i32_0 = arith.constant 0 : i32
    %c0_i32_1 = arith.constant 0 : i32
    return %c0_i32, %c0_i32_0 : i32, i32
  }
  func.func @transform_6(%arg0: i32) -> (i32, i32) {
    %c0_i32 = arith.constant 0 : i32
    %c0_i32_0 = arith.constant 0 : i32
    %c0_i32_1 = arith.constant 0 : i32
    return %c0_i32, %c0_i32_0 : i32, i32
  }
  func.func @transform_7(%arg0: i32) -> (i32, i32) {
    %c0_i32 = arith.constant 0 : i32
    %c0_i32_0 = arith.constant 0 : i32
    %c0_i32_1 = arith.constant 0 : i32
    return %c0_i32, %c0_i32_0 : i32, i32
  }
  func.func @transform_8(%arg0: i32) -> (i32, i32) {
    %c0_i32 = arith.constant 0 : i32
    %c0_i32_0 = arith.constant 0 : i32
    %c0_i32_1 = arith.constant 0 : i32
    return %c0_i32, %c0_i32_0 : i32, i32
  }
  func.func @transform_9(%arg0: i32) -> (i32, i32, i32) {
    %c0_i32 = arith.constant 0 : i32
    %c0_i32_0 = arith.constant 0 : i32
    %c0_i32_1 = arith.constant 0 : i32
    return %arg0, %c0_i32, %c0_i32_0 : i32, i32, i32
  }
  func.func @transform_10(%arg0: i32) -> (i32, i32, i32) {
    %c0_i32 = arith.constant 0 : i32
    %c0_i32_0 = arith.constant 0 : i32
    %c0_i32_1 = arith.constant 0 : i32
    return %arg0, %c0_i32, %c0_i32_0 : i32, i32, i32
  }
  func.func @transform_11(%arg0: i32) -> (i32, i32, i32) {
    %c0_i32 = arith.constant 0 : i32
    %c0_i32_0 = arith.constant 0 : i32
    %c0_i32_1 = arith.constant 0 : i32
    return %arg0, %c0_i32, %c0_i32_0 : i32, i32, i32
  }
  func.func @transform_12(%arg0: i32) -> (i32, i32, i32) {
    %c0_i32 = arith.constant 0 : i32
    %c0_i32_0 = arith.constant 0 : i32
    %c0_i32_1 = arith.constant 0 : i32
    return %arg0, %c0_i32, %c0_i32_0 : i32, i32, i32
  }
  func.func @transform_13(%arg0: i32) -> (i32, i32, i32) {
    %c0_i32 = arith.constant 0 : i32
    %c0_i32_0 = arith.constant 0 : i32
    %c0_i32_1 = arith.constant 0 : i32
    return %arg0, %c0_i32, %c0_i32_0 : i32, i32, i32
  }
  func.func @transform_14(%arg0: i32) -> (i32, i32, i32) {
    %c0_i32 = arith.constant 0 : i32
    %c0_i32_0 = arith.constant 0 : i32
    %c0_i32_1 = arith.constant 0 : i32
    return %arg0, %c0_i32, %c0_i32_0 : i32, i32, i32
  }
  func.func @transform_15(%arg0: i32) -> (i32, i32, i32) {
    %c0_i32 = arith.constant 0 : i32
    %c0_i32_0 = arith.constant 0 : i32
    %c0_i32_1 = arith.constant 0 : i32
    return %arg0, %c0_i32, %c0_i32_0 : i32, i32, i32
  }
  func.func @transform_16(%arg0: i32) -> (i32, i32, i32) {
    %c0_i32 = arith.constant 0 : i32
    %c0_i32_0 = arith.constant 0 : i32
    %c0_i32_1 = arith.constant 0 : i32
    return %arg0, %c0_i32, %c0_i32_0 : i32, i32, i32
  }
  func.func @transform_17(%arg0: i32) -> (i32, i32, i32) {
    %c0_i32 = arith.constant 0 : i32
    %c0_i32_0 = arith.constant 0 : i32
    %c0_i32_1 = arith.constant 0 : i32
    return %arg0, %c0_i32, %c0_i32_0 : i32, i32, i32
  }
  func.func @transform_18(%arg0: i32) -> (i32, i32, i32) {
    %c0_i32 = arith.constant 0 : i32
    %c0_i32_0 = arith.constant 0 : i32
    %c0_i32_1 = arith.constant 0 : i32
    return %arg0, %c0_i32, %c0_i32_0 : i32, i32, i32
  }
  func.func @transform_19(%arg0: i32) -> (i32, i32, i32) {
    %c0_i32 = arith.constant 0 : i32
    %c0_i32_0 = arith.constant 0 : i32
    %c0_i32_1 = arith.constant 0 : i32
    %c0_i32_2 = arith.constant 0 : i32
    return %c0_i32, %c0_i32_0, %c0_i32_1 : i32, i32, i32
  }
  func.func @transform_20(%arg0: i32) -> (i32, i32, i32) {
    %c0_i32 = arith.constant 0 : i32
    %c0_i32_0 = arith.constant 0 : i32
    %c0_i32_1 = arith.constant 0 : i32
    %c0_i32_2 = arith.constant 0 : i32
    return %c0_i32, %c0_i32_0, %c0_i32_1 : i32, i32, i32
  }
  func.func @transform_21(%arg0: i32) -> (i32, i32, i32) {
    %c0_i32 = arith.constant 0 : i32
    %c0_i32_0 = arith.constant 0 : i32
    %c0_i32_1 = arith.constant 0 : i32
    %c0_i32_2 = arith.constant 0 : i32
    return %c0_i32, %c0_i32_0, %c0_i32_1 : i32, i32, i32
  }
  func.func @transform_22(%arg0: i32) -> (i32, i32, i32) {
    %c0_i32 = arith.constant 0 : i32
    %c0_i32_0 = arith.constant 0 : i32
    %c0_i32_1 = arith.constant 0 : i32
    %c0_i32_2 = arith.constant 0 : i32
    return %c0_i32, %c0_i32_0, %c0_i32_1 : i32, i32, i32
  }
  func.func @transform_23(%arg0: i32) -> (i32, i32, i32) {
    %c0_i32 = arith.constant 0 : i32
    %c0_i32_0 = arith.constant 0 : i32
    %c0_i32_1 = arith.constant 0 : i32
    %c0_i32_2 = arith.constant 0 : i32
    return %c0_i32, %c0_i32_0, %c0_i32_1 : i32, i32, i32
  }
  func.func @transform_24(%arg0: i32) -> (i32, i32) {
    %c0_i32 = arith.constant 0 : i32
    %c0_i32_0 = arith.constant 0 : i32
    %c0_i32_1 = arith.constant 0 : i32
    return %c0_i32, %c0_i32_0 : i32, i32
  }
  func.func @transform_25(%arg0: i32) -> (i32, i32) {
    %c0_i32 = arith.constant 0 : i32
    %c0_i32_0 = arith.constant 0 : i32
    %c0_i32_1 = arith.constant 0 : i32
    return %c0_i32, %c0_i32_0 : i32, i32
  }
  func.func @transform_26(%arg0: i32) -> (i32, i32) {
    %c0_i32 = arith.constant 0 : i32
    %c0_i32_0 = arith.constant 0 : i32
    %c0_i32_1 = arith.constant 0 : i32
    return %c0_i32, %c0_i32_0 : i32, i32
  }
  func.func @transform_27(%arg0: i32) -> (i32, i32) {
    %c0_i32 = arith.constant 0 : i32
    %c0_i32_0 = arith.constant 0 : i32
    %c0_i32_1 = arith.constant 0 : i32
    return %c0_i32, %c0_i32_0 : i32, i32
  }
  func.func @transform_28(%arg0: i32) -> (i32, i32) {
    %c0_i32 = arith.constant 0 : i32
    %c0_i32_0 = arith.constant 0 : i32
    %c0_i32_1 = arith.constant 0 : i32
    return %c0_i32, %c0_i32_0 : i32, i32
  }
}

</mosaic_0001>

<bundles_post_ra>
// kernel: painn_forward.1
= control target key start
LH: loop header
LB: loop body
LE: loop exit
PB: predicated region body
PF: predicated region fallthrough
CT: control target
= control target key end

     0   :  { %s6293_s0 = inlined_call_operand.vmem [shape: f32[16,8], index: 0, kind: input, shape index: {}]   ;;  %s6294_s1 = inlined_call_operand.vmem [shape: f32[8,32], index: 1, kind: input, shape index: {}]   ;;  %s6295_s2 = inlined_call_operand.vmem [shape: f32[1,32], index: 2, kind: input, shape index: {}]   ;;  %s6296_s3 = inlined_call_operand.vmem [shape: f32[112,24], index: 3, kind: input, shape index: {}]   ;;  %s6297_s4 = inlined_call_operand.vmem [shape: f32[112,3], index: 4, kind: input, shape index: {}]   ;;  %s6298_s5 = inlined_call_operand.vmem [shape: f32[112,16], index: 5, kind: input, shape index: {}]   ;;  %s6299_s6 = inlined_call_operand.vmem [shape: f32[16,112], index: 6, kind: input, shape index: {}]   ;;  %s6300_s7 = inlined_call_operand.vmem [shape: f32[2,16], index: 7, kind: input, shape index: {}]   ;;  %s6301_s8 = inlined_call_operand.vmem [shape: f32[2,1], index: 8, kind: input, shape index: {}]   ;;  %s6302_s9 = inlined_call_operand.vmem [shape: f32[3,32,32], index: 9, kind: input, shape index: {}]   ;;  %s6303_s10 = inlined_call_operand.vmem [shape: f32[3,1,32], index: 10, kind: input, shape index: {}]   ;;  %s6304_s11 = inlined_call_operand.vmem [shape: f32[3,32,96], index: 11, kind: input, shape index: {}]   ;;  %s6305_s12 = inlined_call_operand.vmem [shape: f32[3,1,96], index: 12, kind: input, shape index: {}]   ;;  %s6306_s13 = inlined_call_operand.vmem [shape: f32[3,24,96], index: 13, kind: input, shape index: {}]   ;;  %s6307_s14 = inlined_call_operand.vmem [shape: f32[3,32,64], index: 14, kind: input, shape index: {}]   ;;  %s6308_s15 = inlined_call_operand.vmem [shape: f32[3,64,32], index: 15, kind: input, shape index: {}]   ;;  %s6309_s16 = inlined_call_operand.vmem [shape: f32[3,1,32], index: 16, kind: input, shape index: {}]   ;;  %s6310_s17 = inlined_call_operand.vmem [shape: f32[3,32,96], index: 17, kind: input, shape index: {}]   ;;  %s6311_s18 = inlined_call_operand.vmem [shape: f32[3,1,96], index: 18, kind: input, shape index: {}]   ;;  %s6312_s19 = inlined_call_operand.vmem [shape: f32[3,32,64], index: 19, kind: input, shape index: {}]   ;;  %s6313_s20 = inlined_call_operand.vmem [shape: f32[3,64,32], index: 20, kind: input, shape index: {}]   ;;  %s6314_s21 = inlined_call_operand.vmem [shape: f32[3,1,32], index: 21, kind: input, shape index: {}]   ;;  %s6315_s22 = inlined_call_operand.vmem [shape: f32[3,32,64], index: 22, kind: input, shape index: {}]   ;;  %s6316_s23 = inlined_call_operand.vmem [shape: f32[3,1,64], index: 23, kind: input, shape index: {}]   ;;  %s6317_s24 = inlined_call_operand.vmem [shape: f32[32,32], index: 24, kind: input, shape index: {}]   ;;  %s6318_s25 = inlined_call_operand.vmem [shape: f32[1,32], index: 25, kind: input, shape index: {}]   ;;  %s6319_s26 = inlined_call_operand.vmem [shape: f32[32,1], index: 26, kind: input, shape index: {}]   ;;  %s6320_s27 = inlined_call_operand.<no memory space> [shape: f32[1,1], index: 27, kind: input, shape index: {}]   ;;  %s6321_s28 = inlined_call_operand.vmem [shape: f32[2,1], index: 28, kind: output, shape index: {}]  }
   0x1   :  { %6336 = sst [smem:[#allocation7_spill]] %s6293_s0  ;;  %v33_v0 = vstv %s6320_s27 }
   0x2   :  { %6337 = sst [smem:[#allocation8_spill]] %s6294_s1  ;;  %34 = vst [vmem:[#allocation4] sm:$0x1] %v33_v0 }
   0x3   :  { %6338 = sst [smem:[#allocation9_spill]] %s6295_s2 }
   0x4   :  { %6339 = sst [smem:[#allocation10_spill]] %s6296_s3 }
   0x5   :  { %6340 = sst [smem:[#allocation11_spill]] %s6297_s4 }
   0x6   :  { %6341 = sst [smem:[#allocation12_spill]] %s6298_s5 }
   0x7   :  { %6342 = sst [smem:[#allocation13_spill]] %s6299_s6 }
   0x8   :  { %6343 = sst [smem:[#allocation14_spill]] %s6300_s7 }
   0x9   :  { %6344 = sst [smem:[#allocation15_spill]] %s6301_s8 }
   0xa   :  { %6345 = sst [smem:[#allocation16_spill]] %s6302_s9  ;;  %s4846_s9 = smov 0  }
   0xb   :  { %6346 = sst [smem:[#allocation17_spill]] %s6303_s10 }
   0xc   :  { %6347 = sst [smem:[#allocation18_spill]] %s6304_s11 }
   0xd   :  { %6348 = sst [smem:[#allocation19_spill]] %s6305_s12 }
   0xe   :  { %6349 = sst [smem:[#allocation20_spill]] %s6314_s21 }
   0xf   :  { %6350 = sst [smem:[#allocation21_spill]] %s6316_s23 }
  0x10   :  { %6351 = sst [smem:[#allocation22_spill]] %s6317_s24 }
  0x11   :  { %6352 = sst [smem:[#allocation23_spill]] %s6318_s25 }
  0x12   :  { %6353 = sst [smem:[#allocation24_spill]] %s6319_s26 }
  0x13   :  { %6354 = sst [smem:[#allocation25_spill]] %s6321_s28 }
  0x14 LB: > { %6355 = sst [smem:[#allocation5_spill]] %s4683_s9  ;;  %s4852_s30 = sadd.s32 4294967295, %s4683_s9   ;;  %s4683_s9 = sphi %s4846_s9, %s40_s9  }
  0x15   : > { %p4067_p0 = scmp.ge.s32.totalorder %s4683_s9, 1  ;;  %p841_p1 = scmp.lt.s32.totalorder %s4683_s9, 4 }
  0x17   : > { %p842_p2 = pnand %p4067_p0, %p841_p1 }
  0x19   : > { %845 = sbr.rel (%p842_p2) target bundleno = 5557 (0x15b5), region = 132 }
  0x1e   : > { %p947_p3 = scmp.lt.s32.totalorder %s4852_s30, 2  ;;  %s6357_s7 = sld [smem:[#allocation16_spill]] }
  0x1f   : > { %s6358_s8 = sld [smem:[#allocation18_spill]]  ;;  %p4079_p4 = scmp.ne.s32.totalorder %s4852_s30, 0 }
  0x20   : > { %s4858_s27 = scalar_select %p947_p3, %s4852_s30, 2 }
  0x21   : > { %s6362_s9 = sld [smem:[#allocation9_spill]] (!%p4079_p4) }
  0x22   : > { %s4197_s3 = sshll.u32 %s4858_s27, 5  ;;  %s4568_s24 = smul.u32 24, %s4858_s27 }
  0x23   : > { %s4883_s6 = scalar_lea.vmem %s6307_s14, %s4197_s3  ;;  %s4200_s10 = sshll.u32 %s4858_s27, 6 }
  0x24   : > { %s4868_s12 = scalar_lea.vmem %s6357_s7, %s4197_s3  ;;  %s4889_s2 = scalar_lea.vmem %s6306_s13, %s4568_s24 }
  0x25   : > { %s4873_s5 = scalar_lea.vmem %s6358_s8, %s4197_s3  ;;  %s4894_s4 = scalar_lea.vmem %s6308_s15, %s4200_s10 }
  0x26   : > { %s980_s25 = scalar_lea.vmem %s6309_s16, %s4858_s27  ;;  %s4903_s21 = scalar_lea.vmem %s6310_s17, %s4197_s3 }
  0x27   : > { %s988_s0 = scalar_lea.vmem %s6311_s18, %s4858_s27  ;;  %993 = sbr.rel (%p4079_p4) target bundleno = 253 (0xfd), region = 136 }
  0x28   : > { %s6360_s10 = sld [smem:[#allocation8_spill]] (!%p4079_p4) }
  0x29   : > { %s6361_s8 = sld [smem:[#allocation7_spill]] (!%p4079_p4) }
  0x2c   : > { %vm1010_vm0 = vcmask 1043456   ;;  %v4685_v4 = vmov 0.0   ;;  %vm4686_vm1 = vmmov 0   ;;  %vm1006_vm2 = vcmask 64512   ;;  %v4080_v8 = vld [vmem:[%s6362_s9] ss:$0 sm:$0xff] }
  0x2d   : > { %4300 = vmatprep.subr.bf16.mxu0 %v4685_v4  ;;  %4302 = vmatprep.mubr.msk.bf16.mxu0 %vm4686_vm1, %v4685_v4  ;;  %vm1055_vm3 = vcmask 261120  }
  0x2e   : > { %v996_v1 = vld [vmem:[%s6360_s10] sm:$0xff]  ;;  %1058 = vst.msk [vmem:[#allocation3] sm:$0xff] %vm1055_vm3, %v4685_v4  ;;  %1059 = vst.msk [vmem:[#allocation3 + $0x8] sm:$0xff] %vm1055_vm3, %v4685_v4 }
  0x2f   : > { %v994_v2 = vld [vmem:[%s6361_s8] sm:$0xff]  ;;  %v995_v3 = vld [vmem:[%s6361_s8 + $0x8] sm:$0xff]  ;;  %v998_v5 = vpack.c.bf16 %v996_v1, %v996_v1  ;;  %1060 = vst.msk [vmem:[#allocation3 + $0x10] sm:$0xff] %vm1055_vm3, %v4685_v4  ;;  %1061 = vst.msk [vmem:[#allocation3 + $0x18] sm:$0xff] %vm1055_vm3, %v4685_v4 }
  0x30   : > { %v997_v7 = vpack.c.bf16 %v995_v3, %v994_v2  ;;  %1062 = vst.msk [vmem:[#allocation3 + $0x20] sm:$0xff] %vm1055_vm3, %v4685_v4  ;;  %1063 = vst.msk [vmem:[#allocation3 + $0x28] sm:$0xff] %vm1055_vm3, %v4685_v4 }
  0x31   : > { %v1012_v6 = vsel %vm1010_vm0, %v998_v5, 0 }
  0x32   : > { %4301 = vmatpush3.bf16.msra.mxu0 %v1012_v6 }
  0x35   : > { %4303 = vmatmul.mubr.msk.bf16.vlgmr.msra.gmra.mxu0 %vm1006_vm2, %v997_v7 }
  0xf5   : > { %v1048_v9 = vpop.f32.mrf.mxu0 }
  0xf6   : > { %v1049_v10 = vadd.f32 %v4080_v8, %v1048_v9 }
  0xf7   : > { %v4304_v11 = vpop.f32.mrf.mxu0 }
  0xf8   : > { %1056 = vst.msk [vmem:[#allocation2] sm:$0xff] %vm1055_vm3, %v1049_v10 }
  0xf9   : > { %v1051_v12 = vpop.f32.mrf.mxu0 }
  0xfa   : > { %v1052_v13 = vadd.f32 %v4080_v8, %v1051_v12 }
  0xfb   : > { %v4305_v14 = vpop.f32.mrf.mxu0 }
  0xfc   : > { %1057 = vst.msk [vmem:[#allocation2 + $0x8] sm:$0xff] %vm1055_vm3, %v1052_v13 }
  0xfd PF: > { %v1088_v15 = vld [vmem:[%s4868_s12 + $0x10] sm:$0xff]  ;;  %v1089_v16 = vld [vmem:[%s4868_s12 + $0x18] sm:$0xff]  ;;  %v1086_v17 = vld [vmem:[%s4868_s12] sm:$0xff]  ;;  %v6332_v18 = vmov 0.0   ;;  %vm4688_vm4 = vmmov 0   ;;  %vm1100_vm5 = vcmask 261120  }
  0xfe   : > { %4306 = vmatprep.subr.bf16.mxu0 %v6332_v18  ;;  %v1092_v19 = vpack.c.bf16 %v1089_v16, %v1088_v15  ;;  %v1087_v20 = vld [vmem:[%s4868_s12 + $0x8] sm:$0xff]  ;;  %4310 = vmatprep.mubr.msk.bf16.mxu0 %vm4688_vm4, %v6332_v18  ;;  %v1161_v25 = vld [vmem:[%s4873_s5 + $0x10] sm:$0xff]  ;;  %v1162_v26 = vld [vmem:[%s4873_s5 + $0x18] sm:$0xff]  ;;  %s4689_s12 = smov 32   ;;  %vm1265_vm6 = vcmask 1043456   ;;  %v4690_v37 = vmov 1  }
  0xff   : > { %4314 = vmatprep.subr.bf16.mxu1 %v6332_v18  ;;  %4318 = vmatprep.mubr.msk.bf16.mxu1 %vm4688_vm4, %v6332_v18  ;;  %v1091_v21 = vpack.c.bf16 %v1087_v20, %v1086_v17  ;;  %v1064_v22 = vld [vmem:[#allocation2] sm:$0xff]  ;;  %v1165_v27 = vpack.c.bf16 %v1162_v26, %v1161_v25  ;;  %v1160_v29 = vld [vmem:[%s4873_s5 + $0x8] sm:$0xff]  ;;  %v1070_v31 = vld [vmem:[#allocation3 + $0x20] sm:$0xff]  ;;  %v4691_v38 = vmov 2   ;;  %s6363_s29 = sld [smem:[#allocation11_spill]]  ;;  %vm1243_vm7 = vcmask 195584  }
 0x100   : > { %4307 = vmatpush3.bf16.msra.mxu0 %v1092_v19  ;;  %v1159_v28 = vld [vmem:[%s4873_s5] sm:$0xff]  ;;  %v1071_v32 = vld [vmem:[#allocation3 + $0x28] sm:$0xff]  ;;  %1368 = vrot.lane.b32.xlu1 %v1070_v31, %s4689_s12  ;;  %v1233_v33 = vld [vmem:[%s4889_s2 + $0x10] sm:$0xff]  ;;  %s4692_s5 = smov 96   ;;  %s6364_s1 = sld [smem:[#allocation17_spill]]  ;;  %vm1374_vm8 = vcmask 785408  }
 0x101   : > { %4308 = vmatprep.subr.bf16.mxu0 %v6332_v18  ;;  %4315 = vmatpush3.bf16.msra.mxu1 %v1165_v27  ;;  %v1164_v30 = vpack.c.bf16 %v1160_v29, %v1159_v28  ;;  %v1066_v34 = vld [vmem:[#allocation3] sm:$0xff]  ;;  %v1067_v35 = vld [vmem:[#allocation3 + $0x8] sm:$0xff]  ;;  %v1242_v36 = vpack.c.bf16 %v1233_v33, %v1233_v33  ;;  %v1231_v59 = vld [vmem:[%s4889_s2] sm:$0xff]  ;;  %s6366_s11 = sld [smem:[#allocation10_spill]]  ;;  %v4693_v27 = vmov 0   ;;  %vm1393_vm9 = vcmask 130048  }
 0x102   : > { %4316 = vmatprep.subr.bf16.mxu1 %v6332_v18  ;;  %1370 = vrot.lane.b32.xlu0 %v1071_v32, %s4689_s12  ;;  %v1232_v60 = vld [vmem:[%s4889_s2 + $0x8] sm:$0xff]  ;;  %s6367_s2 = sld [smem:[#allocation19_spill]]  ;;  %vm2344_vm10 = vcmask 916480   ;;  %vm2313_vm11 = vcmask 523264   ;;  %p4121_p5 = scmp.ne.s32.totalorder %s4852_s30, 2 }
 0x103   : > { %v1065_v23 = vld [vmem:[#allocation2 + $0x8] sm:$0xff]  ;;  %4590 = vset.pattern.permute.xlu0 %v4690_v37  ;;  %4591 = vset.pattern.permute.xlu1 %v4691_v38  ;;  %v1267_v39 = vsel %vm1265_vm6, %v1242_v36, 0  ;;  %v1241_v61 = vpack.c.bf16 %v1232_v60, %v1231_v59  ;;  %s6369_s26 = sld [smem:[#allocation12_spill]]  ;;  %s4697_s10 = smov (!%p4121_p5), 96  }
 0x104   : > { %v1090_v24 = vpack.c.bf16 %v1065_v23, %v1064_v22  ;;  %4309 = vmatpush3.bf16.msra.mxu0 %v1091_v21  ;;  %1360 = vrot.lane.b32.xlu1 %v1066_v34, %s4692_s5  ;;  %v1069_v63 = vld [vmem:[#allocation3 + $0x18] sm:$0xff]  ;;  %s6371_s23 = sld [smem:[#allocation13_spill]] }
 0x105   : > { %4322 = vmatprep.subr.bf16.mxu0 %v6332_v18  ;;  %4317 = vmatpush3.bf16.msra.mxu1 %v1164_v30  ;;  %v4952_v40 = vld [vmem:[%s6363_s29 + $0x68] sm:$0xff]  ;;  %v4977_v3 = vld [vmem:[%s6363_s29 + $0x50] sm:$0xff]  ;;  %v4984_v5 = vld [vmem:[%s6363_s29 + $0x60] sm:$0xff]  ;;  %s6375_s24 = sld [smem:[#allocation21_spill]] (!%p4121_p5) }
 0x106   : > { %1362 = vrot.lane.b32.xlu0 %v1067_v35, %s4692_s5  ;;  %s6365_s28 = scalar_lea.vmem %s6364_s1, %s4858_s27  ;;  %v4992_v6 = vld [vmem:[%s6363_s29 + $0x38] sm:$0xff]  ;;  %v5001_v8 = vld [vmem:[%s6363_s29 + $0x20] sm:$0xff]  ;;  %v5014_v11 = vld [vmem:[%s6363_s29 + $0x8] sm:$0xff]  ;;  %s6378_s30 = sld [smem:[#allocation23_spill]] (!%p4121_p5) }
 0x107   : > { %4311 = vmatmul.mubr.msk.bf16.vlgmr.msra.gmra.mxu0 %vm1100_vm5, %v1090_v24  ;;  %v4082_v41 = vld [vmem:[%s6365_s28] ss:$0 sm:$0xff]  ;;  %v1218_v1 = vld [vmem:[%s6366_s11 + $0x8] sm:$0xff]  ;;  %v1083_v7 = vld [vmem:[%s6363_s29 + $0x58] sm:$0xff]  ;;  %s4694_s28 = smov 64  }
 0x108   : > { %4326 = vmatprep.mubr.msk.bf16.mxu0 %vm4688_vm4, %v6332_v18  ;;  %4323 = vmatpush3.bf16.msra.mxu0 %v1267_v39  ;;  %v1217_v0 = vld [vmem:[%s6366_s11] sm:$0xff]  ;;  %v1219_v9 = vld [vmem:[%s6366_s11 + $0x10] sm:$0xff]  ;;  %v1220_v10 = vld [vmem:[%s6366_s11 + $0x18] sm:$0xff]  ;;  %s6368_s7 = scalar_lea.vmem %s6367_s2, %s4858_s27  ;;  %s6374_s27 = sld [smem:[#allocation20_spill]] (!%p4121_p5) }
 0x109   : > { %4324 = vmatprep.subr.bf16.mxu0 %v6332_v18  ;;  %2100 = vperm.xlu1 %4591, %v4952_v40   ;;  %v1234_v4 = vpack.c.bf16 %v1218_v1, %v1217_v0  ;;  %v1235_v12 = vpack.c.bf16 %v1220_v10, %v1219_v9  ;;  %v1081_v13 = vld [vmem:[%s6363_s29 + $0x48] sm:$0xff]  ;;  %v1221_v14 = vld [vmem:[%s6366_s11 + $0x20] sm:$0xff]  ;;  %v1078_v19 = vld [vmem:[%s6363_s29 + $0x30] sm:$0xff] }
 0x10a   : > { %1946 = vperm.xlu0 %4590, %v4952_v40   ;;  %v1222_v15 = vld [vmem:[%s6366_s11 + $0x28] sm:$0xff]  ;;  %v1080_v17 = vld [vmem:[%s6363_s29 + $0x40] sm:$0xff]  ;;  %v1075_v20 = vld [vmem:[%s6363_s29 + $0x18] sm:$0xff] }
 0x10b   : > { %v1236_v16 = vpack.c.bf16 %v1222_v15, %v1221_v14  ;;  %v1223_v21 = vld [vmem:[%s6366_s11 + $0x30] sm:$0xff]  ;;  %v1224_v22 = vld [vmem:[%s6366_s11 + $0x38] sm:$0xff]  ;;  %v1072_v24 = vld [vmem:[%s6363_s29] sm:$0xff] }
 0x10c   : > { %4325 = vmatpush3.bf16.msra.mxu0 %v1241_v61  ;;  %v1237_v23 = vpack.c.bf16 %v1224_v22, %v1223_v21  ;;  %v1225_v25 = vld [vmem:[%s6366_s11 + $0x40] sm:$0xff]  ;;  %v1226_v26 = vld [vmem:[%s6366_s11 + $0x48] sm:$0xff]  ;;  %v1227_v30 = vld [vmem:[%s6366_s11 + $0x50] sm:$0xff] }
 0x10d   : > { %4592 = vset.pattern.permute.xlu1 %v4690_v37  ;;  %v1238_v28 = vpack.c.bf16 %v1226_v26, %v1225_v25  ;;  %v1077_v29 = vld [vmem:[%s6363_s29 + $0x28] sm:$0xff]  ;;  %v1228_v31 = vld [vmem:[%s6366_s11 + $0x58] sm:$0xff]  ;;  %v1229_v33 = vld [vmem:[%s6366_s11 + $0x60] sm:$0xff] }
 0x10e   : > { %1934 = vperm.xlu0 %4590, %v4977_v3   ;;  %1942 = vperm.xlu1 %4592, %v4984_v5   ;;  %v1239_v32 = vpack.c.bf16 %v1228_v31, %v1227_v30  ;;  %v1230_v34 = vld [vmem:[%s6366_s11 + $0x68] sm:$0xff]  ;;  %v1074_v36 = vld [vmem:[%s6363_s29 + $0x10] sm:$0xff]  ;;  %v1387_v59 = vld [vmem:[%s6369_s26 + $0x40] sm:$0xff] }
 0x10f   : > { %4327 = vmatmul.mubr.msk.bf16.vlgmr.msra.gmra.mxu0 %vm1243_vm7, %v1234_v4  ;;  %v1240_v35 = vpack.c.bf16 %v1230_v34, %v1229_v33  ;;  %v1388_v60 = vld [vmem:[%s6369_s26 + $0x48] sm:$0xff]  ;;  %v1389_v61 = vld [vmem:[%s6369_s26 + $0x50] sm:$0xff] }
 0x110   : > { %4330 = vmatprep.mubr.msk.bf16.mxu0 %vm4688_vm4, %v6332_v18  ;;  %v1392_v0 = vld [vmem:[%s6369_s26 + $0x68] sm:$0xff] }
 0x112   : > { %1922 = vperm.xlu0 %4590, %v4992_v6   ;;  %1938 = vperm.xlu1 %4592, %v1083_v7  }
 0x116   : > { %1910 = vperm.xlu0 %4590, %v5001_v8   ;;  %4593 = vset.pattern.permute.xlu1 %v4691_v38 }
 0x117   : > { %2092 = vperm.xlu1 %4593, %v1083_v7   ;;  %4331 = vmatmul.mubr.msk.bf16.gmra.mxu0 %vm1243_vm7, %v1235_v12 }
 0x118   : > { %4334 = vmatprep.mubr.msk.bf16.mxu0 %vm4688_vm4, %v6332_v18 }
 0x11a   : > { %1898 = vperm.xlu0 %4590, %v5014_v11  }
 0x11b   : > { %2088 = vperm.xlu1 %4593, %v4977_v3  }
 0x11e   : > { %4600 = vset.pattern.permute.xlu0 %v4691_v38 }
 0x11f   : > { %2096 = vperm.xlu0 %4600, %v4984_v5   ;;  %4594 = vset.pattern.permute.xlu1 %v4690_v37 }
 0x120   : > { %1930 = vperm.xlu1 %4594, %v1081_v13   ;;  %4335 = vmatmul.mubr.msk.bf16.gmra.mxu0 %vm1243_vm7, %v1236_v16 }
 0x121   : > { %4338 = vmatprep.mubr.msk.bf16.mxu0 %vm4688_vm4, %v6332_v18 }
 0x123   : > { %2084 = vperm.xlu0 %4600, %v1081_v13  }
 0x124   : > { %1926 = vperm.xlu1 %4594, %v1080_v17  }
 0x127   : > { %2072 = vperm.xlu0 %4600, %v1078_v19  }
 0x128   : > { %4595 = vset.pattern.permute.xlu1 %v4691_v38  ;;  %4339 = vmatmul.mubr.msk.bf16.gmra.mxu0 %vm1243_vm7, %v1237_v23 }
 0x129   : > { %2080 = vperm.xlu1 %4595, %v1080_v17   ;;  %4342 = vmatprep.mubr.msk.bf16.mxu0 %vm4688_vm4, %v6332_v18 }
 0x12b   : > { %2060 = vperm.xlu0 %4600, %v1075_v20  }
 0x12d   : > { %2076 = vperm.xlu1 %4595, %v4992_v6  }
 0x12f   : > { %2048 = vperm.xlu0 %4600, %v1072_v24  }
 0x130   : > { %4343 = vmatmul.mubr.msk.bf16.gmra.mxu0 %vm1243_vm7, %v1238_v28 }
 0x131   : > { %4596 = vset.pattern.permute.xlu1 %v4690_v37  ;;  %4346 = vmatprep.mubr.msk.bf16.mxu0 %vm4688_vm4, %v6332_v18 }
 0x132   : > { %1918 = vperm.xlu1 %4596, %v1078_v19  }
 0x133   : > { %4603 = vset.pattern.permute.xlu0 %v4693_v27 }
 0x134   : > { %1726 = vperm.xlu0 %4603, %v1083_v7  }
 0x136   : > { %1914 = vperm.xlu1 %4596, %v1077_v29  }
 0x138   : > { %1716 = vperm.xlu0 %4603, %v1081_v13   ;;  %4347 = vmatmul.mubr.msk.bf16.gmra.mxu0 %vm1243_vm7, %v1239_v32 }
 0x139   : > { %4350 = vmatprep.mubr.msk.bf16.mxu0 %vm4688_vm4, %v6332_v18 }
 0x13a   : > { %4597 = vset.pattern.permute.xlu1 %v4691_v38 }
 0x13b   : > { %2068 = vperm.xlu1 %4597, %v1077_v29  }
 0x13c   : > { %1711 = vperm.xlu0 %4603, %v1080_v17  }
 0x13f   : > { %2064 = vperm.xlu1 %4597, %v5001_v8  }
 0x140   : > { %1706 = vperm.xlu0 %4603, %v4992_v6   ;;  %4351 = vmatmul.mubr.msk.bf16.gmra.mxu0 %vm1243_vm7, %v1240_v35 }
 0x143   : > { %4598 = vset.pattern.permute.xlu1 %v4690_v37 }
 0x144   : > { %1701 = vperm.xlu0 %4603, %v1078_v19   ;;  %1906 = vperm.xlu1 %4598, %v1075_v20  }
 0x148   : > { %1696 = vperm.xlu0 %4603, %v1077_v29   ;;  %1902 = vperm.xlu1 %4598, %v1074_v36  }
 0x14c   : > { %1691 = vperm.xlu0 %4603, %v5001_v8   ;;  %4599 = vset.pattern.permute.xlu1 %v4691_v38 }
 0x14d   : > { %2056 = vperm.xlu1 %4599, %v1074_v36  }
 0x150   : > { %1686 = vperm.xlu0 %4603, %v1075_v20  }
 0x151   : > { %2052 = vperm.xlu1 %4599, %v5014_v11  }
 0x154   : > { %1681 = vperm.xlu0 %4603, %v1074_v36  }
 0x155   : > { %4601 = vset.pattern.permute.xlu1 %v4690_v37  ;;  %v4086_v37 = vld [vmem:[%s6368_s7] ss:$0 sm:$0xff]  ;;  %s6381_s7 = sld [smem:[#allocation25_spill]] (!%p4121_p5) }
 0x156   : > { %1894 = vperm.xlu1 %4601, %v1072_v24  }
 0x158   : > { %1676 = vperm.xlu0 %4603, %v5014_v11  }
 0x15a   : > { %4602 = vset.pattern.permute.xlu1 %v4693_v27 }
 0x15b   : > { %1736 = vperm.xlu1 %4602, %v4952_v40  }
 0x15c   : > { %1671 = vperm.xlu0 %4603, %v1072_v24  }
 0x15f   : > { %1731 = vperm.xlu1 %4602, %v4984_v5  }
 0x160   : > { %4604 = vset.pattern.permute.xlu0 %v4691_v38 }
 0x163   : > { %1721 = vperm.xlu1 %4602, %v4977_v3  }
 0x172   : > { %v1369_v39 = vpop.permute.xlu1 %1368 }
 0x174   : > { %v1371_v62 = vpop.permute.xlu0 %1370 }
 0x175   : > { %v1378_v2 = vsel %vm1100_vm5, %v1069_v63, %v1371_v62  ;;  %v1390_v62 = vld [vmem:[%s6369_s26 + $0x58] sm:$0xff]  ;;  %v1391_v63 = vld [vmem:[%s6369_s26 + $0x60] sm:$0xff] }
 0x176   : > { %1464 = vmatprep.subr.mxu1 %v1378_v2  ;;  %v1361_v40 = vpop.permute.xlu1 %1360 }
 0x184   : > { %v5194_v15 = vpop.permute.xlu1 %2100 }
 0x189   : > { %v5200_v20 = vpop.permute.xlu1 %1942 }
 0x18d   : > { %v5204_v24 = vpop.permute.xlu1 %1938 }
 0x192   : > { %v5210_v28 = vpop.permute.xlu1 %2092 }
 0x196   : > { %v5214_v32 = vpop.permute.xlu1 %2088 }
 0x19b   : > { %v5218_v35 = vpop.permute.xlu1 %1930 }
 0x19f   : > { %v5220_v36 = vpop.permute.xlu1 %1926 }
 0x1c7   : > { %v1138_v42 = vpop.f32.mrf.mxu0 }
 0x1c8   : > { %v1139_v43 = vadd.f32 %v4082_v41, %v1138_v42 }
 0x1c9   : > { %v4312_v44 = vpop.f32.mrf.mxu0 }
 0x1ca   : > { %v4084_v45 = vmul.f32 -1.442695, %v1139_v43  ;;  %v1363_v44 = vpop.permute.xlu0 %1362 }
 0x1cb   : > { %v1141_v46 = vpop.f32.mrf.mxu0 }
 0x1cc   : > { %4605 = vpow2.f32 %v4084_v45  ;;  %v1142_v47 = vadd.f32 %v4082_v41, %v1141_v46 }
 0x1cd   : > { %v4313_v48 = vpop.f32.mrf.mxu0 }
 0x1ce   : > { %v4085_v49 = vmul.f32 -1.442695, %v1142_v47 }
 0x1cf   : > { %v1303_v1 = vpop.f32.mrf.mxu0 }
 0x1d0   : > { %4607 = vpow2.f32 %v4085_v49 }
 0x1d1   : > { %v4328_v2 = vpop.f32.mrf.mxu0 }
 0x1d3   : > { %v1306_v3 = vpop.f32.mrf.mxu0 }
 0x1d5   : > { %v4329_v4 = vpop.f32.mrf.mxu0 }
 0x1d7   : > { %v5184_v5 = vpop.f32.mrf.mxu0 }
 0x1d9   : > { %v4606_v50 = vpop.eup %4605  ;;  %v4332_v6 = vpop.f32.mrf.mxu0 }
 0x1da   : > { %v1151_v51 = vadd.f32 1.0, %v4606_v50  ;;  %v1379_v50 = vld [vmem:[%s6369_s26] sm:$0xff] }
 0x1db   : > { %v5186_v7 = vpop.f32.mrf.mxu0 }
 0x1dc   : > { %4609 = vrcp.f32 %v1151_v51 }
 0x1dd   : > { %v4608_v52 = vpop.eup %4607  ;;  %v4333_v8 = vpop.f32.mrf.mxu0 }
 0x1de   : > { %v1152_v53 = vadd.f32 1.0, %v4608_v52  ;;  %v1380_v52 = vld [vmem:[%s6369_s26 + $0x8] sm:$0xff] }
 0x1e0   : > { %4611 = vrcp.f32 %v1152_v53  ;;  %v1381_v53 = vld [vmem:[%s6369_s26 + $0x10] sm:$0xff]  ;;  %v5188_v9 = vpop.f32.mrf.mxu0 }
 0x1e2   : > { %v4336_v10 = vpop.f32.mrf.mxu0 }
 0x1e4   : > { %v5190_v11 = vpop.f32.mrf.mxu0 }
 0x1e6   : > { %v4337_v12 = vpop.f32.mrf.mxu0 }
 0x1e8   : > { %v5192_v13 = vpop.f32.mrf.mxu0 }
 0x1e9   : > { %v4610_v54 = vpop.eup %4609 }
 0x1ea   : > { %v1157_v56 = vmul.f32 %v4610_v54, %v1139_v43  ;;  %v1382_v54 = vld [vmem:[%s6369_s26 + $0x18] sm:$0xff]  ;;  %v4340_v14 = vpop.f32.mrf.mxu0 }
 0x1ec   : > { %v5196_v16 = vpop.f32.mrf.mxu0 }
 0x1ed   : > { %v4612_v55 = vpop.eup %4611 }
 0x1ee   : > { %v1158_v57 = vmul.f32 %v4612_v55, %v1142_v47  ;;  %v1068_v47 = vld [vmem:[#allocation3 + $0x10] sm:$0xff]  ;;  %v4341_v17 = vpop.f32.mrf.mxu0 }
 0x1ef   : > { %v1377_v49 = vsel %vm1100_vm5, %v1068_v47, %v1369_v39  ;;  %v1383_v55 = vld [vmem:[%s6369_s26 + $0x20] sm:$0xff]  ;;  %v5222_v39 = vpop.permute.xlu1 %2080 }
 0x1f0   : > { %v1163_v58 = vpack.c.bf16 %v1158_v57, %v1157_v56  ;;  %v1384_v56 = vld [vmem:[%s6369_s26 + $0x28] sm:$0xff]  ;;  %v1385_v57 = vld [vmem:[%s6369_s26 + $0x30] sm:$0xff]  ;;  %v5198_v19 = vpop.f32.mrf.mxu0 }
 0x1f2   : > { %4319 = vmatmul.mubr.msk.bf16.vlgmr.msra.gmra.mxu1 %vm1100_vm5, %v1163_v58  ;;  %v1386_v58 = vld [vmem:[%s6369_s26 + $0x38] sm:$0xff]  ;;  %v4344_v21 = vpop.f32.mrf.mxu0 }
 0x1f3   : > { %1500 = vmatprep.mubr.f32.mxu1 %v6332_v18 }
 0x1f4   : > { %v5202_v22 = vpop.f32.mrf.mxu0 }
 0x1f6   : > { %v4345_v23 = vpop.f32.mrf.mxu0 }
 0x1f8   : > { %v5206_v25 = vpop.f32.mrf.mxu0 }
 0x1fa   : > { %v4348_v26 = vpop.f32.mrf.mxu0 }
 0x1fc   : > { %v5208_v27 = vpop.f32.mrf.mxu0 }
 0x1fe   : > { %v4349_v29 = vpop.f32.mrf.mxu0 }
 0x200   : > { %v5212_v30 = vpop.f32.mrf.mxu0 }
 0x202   : > { %v4352_v31 = vpop.f32.mrf.mxu0 }
 0x204   : > { %v5216_v33 = vpop.f32.mrf.mxu0 }
 0x206   : > { %v4353_v34 = vpop.f32.mrf.mxu0 }
 0x2b2   : > { %v1210_v41 = vpop.f32.mrf.mxu1 }
 0x2b3   : > { %v1211_v45 = vadd.f32 %v4086_v37, %v1210_v41  ;;  %v5224_v41 = vpop.permute.xlu1 %2076 }
 0x2b4   : > { %v4320_v42 = vpop.f32.mrf.mxu1 }
 0x2b5   : > { %v1375_v51 = vsel %vm1374_vm8, %v1211_v45, %v1361_v40 }
 0x2b6   : > { %v1213_v43 = vpop.f32.mrf.mxu1 }
 0x2b7   : > { %v1214_v46 = vadd.f32 %v4086_v37, %v1213_v43  ;;  %v5226_v37 = vpop.permute.xlu0 %1946  ;;  %v5228_v42 = vpop.permute.xlu1 %1918 }
 0x2b8   : > { %v4321_v38 = vpop.f32.mrf.mxu1 }
 0x2b9   : > { %v1376_v48 = vsel %vm1374_vm8, %v1214_v46, %v1363_v44 }
 0x2ba   : > { %1465 = vmatpush1.msra.mxu1 %v1376_v48 }
 0x2bb   : > { %1466 = vmatprep.subr.mxu1 %v1377_v49  ;;  %v5230_v43 = vpop.permute.xlu0 %1934  ;;  %v1915_v44 = vpop.permute.xlu1 %1914 }
 0x2bc   : > { %1467 = vmatpush1.msra.mxu1 %v1375_v51 }
 0x2bd   : > { %4095 = vmatmul.mubr.msk.f32.vlgmr.msra.gmra.mxu1 %vm1393_vm9, %v1379_v50  ;;  %4385 = vmatprep.subr.bf16.mxu1 %v6332_v18 }
 0x2be   : > { %1506 = vmatprep.mubr.f32.mxu1 %v6332_v18 }
 0x2bf   : > { %v5232_v45 = vpop.permute.xlu0 %1922  ;;  %v5234_v46 = vpop.permute.xlu1 %2068 }
 0x2c1   : > { %4096 = vmatmul.mubr.msk.f32.gmra.mxu1 %vm1393_vm9, %v1380_v52 }
 0x2c2   : > { %1512 = vmatprep.mubr.f32.mxu1 %v6332_v18 }
 0x2c3   : > { %v1911_v47 = vpop.permute.xlu0 %1910  ;;  %v2065_v40 = vpop.permute.xlu1 %2064 }
 0x2c5   : > { %4097 = vmatmul.mubr.msk.f32.gmra.mxu1 %vm1393_vm9, %v1381_v53 }
 0x2c6   : > { %1518 = vmatprep.mubr.f32.mxu1 %v6332_v18 }
 0x2c7   : > { %v1899_v38 = vpop.permute.xlu0 %1898  ;;  %v1907_v48 = vpop.permute.xlu1 %1906 }
 0x2c9   : > { %4098 = vmatmul.mubr.msk.f32.gmra.mxu1 %vm1393_vm9, %v1382_v54 }
 0x2ca   : > { %1524 = vmatprep.mubr.f32.mxu1 %v6332_v18 }
 0x2cb   : > { %v5236_v49 = vpop.permute.xlu0 %2096  ;;  %v1903_v50 = vpop.permute.xlu1 %1902 }
 0x2cd   : > { %4099 = vmatmul.mubr.msk.f32.gmra.mxu1 %vm1393_vm9, %v1383_v55 }
 0x2ce   : > { %1530 = vmatprep.mubr.f32.mxu1 %v6332_v18 }
 0x2cf   : > { %v5238_v51 = vpop.permute.xlu0 %2084  ;;  %v2057_v52 = vpop.permute.xlu1 %2056 }
 0x2d1   : > { %4100 = vmatmul.mubr.msk.f32.gmra.mxu1 %vm1393_vm9, %v1384_v56 }
 0x2d2   : > { %1536 = vmatprep.mubr.f32.mxu1 %v6332_v18 }
 0x2d3   : > { %v5240_v53 = vpop.permute.xlu0 %2072  ;;  %v2053_v54 = vpop.permute.xlu1 %2052 }
 0x2d5   : > { %4101 = vmatmul.mubr.msk.f32.gmra.mxu1 %vm1393_vm9, %v1385_v57 }
 0x2d6   : > { %1542 = vmatprep.mubr.f32.mxu1 %v6332_v18 }
 0x2d7   : > { %v2061_v55 = vpop.permute.xlu0 %2060  ;;  %v1895_v57 = vpop.permute.xlu1 %1894 }
 0x2d9   : > { %4102 = vmatmul.mubr.msk.f32.gmra.mxu1 %vm1393_vm9, %v1386_v58 }
 0x2da   : > { %1548 = vmatprep.mubr.f32.mxu1 %v6332_v18 }
 0x2dd   : > { %4103 = vmatmul.mubr.msk.f32.gmra.mxu1 %vm1393_vm9, %v1387_v59 }
 0x2de   : > { %1554 = vmatprep.mubr.f32.mxu1 %v6332_v18 }
 0x2e1   : > { %4104 = vmatmul.mubr.msk.f32.gmra.mxu1 %vm1393_vm9, %v1388_v60 }
 0x2e2   : > { %1560 = vmatprep.mubr.f32.mxu1 %v6332_v18 }
 0x2e5   : > { %4105 = vmatmul.mubr.msk.f32.gmra.mxu1 %vm1393_vm9, %v1389_v61  ;;  %v2049_v61 = vpop.permute.xlu0 %2048 }
 0x2e6   : > { %1566 = vmatprep.mubr.f32.mxu1 %v6332_v18 }
 0x2e9   : > { %4106 = vmatmul.mubr.msk.f32.gmra.mxu1 %vm1393_vm9, %v1390_v62 }
 0x2ea   : > { %1572 = vmatprep.mubr.f32.mxu1 %v6332_v18 }
 0x2ed   : > { %4107 = vmatmul.mubr.msk.f32.gmra.mxu1 %vm1393_vm9, %v1391_v63 }
 0x2ee   : > { %1578 = vmatprep.mubr.f32.mxu1 %v6332_v18 }
 0x2f1   : > { %4108 = vmatmul.mubr.msk.f32.gmra.mxu1 %vm1393_vm9, %v1392_v0 }
 0x2f2   : > { %4389 = vmatprep.mubr.msk.bf16.mxu1 %vm4688_vm4, %v6332_v18 }
 0x37d   : > { %v5242_v56 = vpop.f32.mrf.mxu1 }
 0x37e   : > { %v5245_v58 = vmul.f32 %v5242_v56, %v1303_v1 }
 0x37f   : > { %v5247_v59 = vpop.f32.mrf.mxu1 }
 0x380   : > { %v1949_v60 = vmul.f32 %v1895_v57, %v5245_v58  ;;  %1837 = vrot.lane.b32.xlu0 %v5247_v59, %s4689_s12  ;;  %v2103_v0 = vmul.f32 %v2049_v61, %v5245_v58 }
 0x381   : > { %v5252_v62 = vpop.f32.mrf.mxu1 }
 0x382   : > { %v5255_v63 = vmul.f32 %v5252_v62, %v1306_v3  ;;  %1977 = vrot.lane.b32.xlu1 %v1949_v60, %s4692_s5 }
 0x383   : > { %v5259_v2 = vpop.f32.mrf.mxu1 }
 0x384   : > { %2131 = vrot.lane.b32.xlu0 %v2103_v0, %s4692_s5  ;;  %v2104_v4 = vmul.f32 %v2053_v54, %v5255_v63  ;;  %v1950_v8 = vmul.f32 %v1899_v38, %v5255_v63 }
 0x385   : > { %v5262_v1 = vpop.f32.mrf.mxu1 }
 0x386   : > { %1839 = vrot.lane.b32.xlu1 %v5259_v2, %s4689_s12  ;;  %v5271_v3 = vmul.f32 %v5262_v1, %v5184_v5 }
 0x387   : > { %v5267_v6 = vpop.f32.mrf.mxu1 }
 0x388   : > { %2133 = vrot.lane.b32.xlu0 %v2104_v4, %s4692_s5  ;;  %v2105_v14 = vmul.f32 %v2057_v52, %v5271_v3  ;;  %v1951_v21 = vmul.f32 %v1903_v50, %v5271_v3 }
 0x389   : > { %v5275_v10 = vpop.f32.mrf.mxu1 }
 0x38a   : > { %1979 = vrot.lane.b32.xlu1 %v1950_v8, %s4692_s5  ;;  %v5287_v5 = vmul.f32 %v5275_v10, %v5186_v7 }
 0x38b   : > { %v5278_v12 = vpop.f32.mrf.mxu1 }
 0x38c   : > { %1841 = vrot.lane.b32.xlu0 %v5267_v6, %s4689_s12  ;;  %v2106_v7 = vmul.f32 %v2061_v55, %v5287_v5  ;;  %v1952_v34 = vmul.f32 %v1907_v48, %v5287_v5 }
 0x38d   : > { %v5283_v17 = vpop.f32.mrf.mxu1 }
 0x38e   : > { %2135 = vrot.lane.b32.xlu1 %v2105_v14, %s4692_s5  ;;  %v5298_v29 = vmul.f32 %v5283_v17, %v5188_v9 }
 0x38f   : > { %v5291_v23 = vpop.f32.mrf.mxu1 }
 0x390   : > { %1981 = vrot.lane.b32.xlu0 %v1951_v21, %s4692_s5  ;;  %v1953_v9 = vmul.f32 %v1911_v47, %v5298_v29  ;;  %v2107_v47 = vmul.f32 %v2065_v40, %v5298_v29 }
 0x391   : > { %v5294_v26 = vpop.f32.mrf.mxu1 }
 0x392   : > { %1843 = vrot.lane.b32.xlu1 %v5278_v12, %s4689_s12  ;;  %v5311_v50 = vmul.f32 %v5294_v26, %v5190_v11  ;;  %v1727_v11 = vpop.permute.xlu0 %1726 }
 0x393   : > { %v5303_v31 = vpop.f32.mrf.mxu1 }
 0x394   : > { %2137 = vrot.lane.b32.xlu0 %v2106_v7, %s4692_s5  ;;  %6370 = vst [vmem:[#allocation6_spill] sm:$0xff] %v5311_v50  ;;  %v1954_v48 = vmul.f32 %v1915_v44, %v5311_v50 }
 0x395   : > { %v5307_v38 = vpop.f32.mrf.mxu1 }
 0x396   : > { %1983 = vrot.lane.b32.xlu1 %v1952_v34, %s4692_s5  ;;  %v5320_v55 = vmul.f32 %v5307_v38, %v5192_v13  ;;  %v1717_v0 = vpop.permute.xlu0 %1716 }
 0x397   : > { %v5315_v52 = vpop.f32.mrf.mxu1 }
 0x398   : > { %1985 = vrot.lane.b32.xlu0 %v1953_v9, %s4692_s5  ;;  %v1955_v13 = vmul.f32 %v5228_v42, %v5320_v55  ;;  %v2108_v42 = vmul.f32 %v5234_v46, %v5311_v50  ;;  %v2109_v46 = vmul.f32 %v5240_v53, %v5320_v55 }
 0x399   : > { %v1544_v54 = vpop.f32.mrf.mxu1 }
 0x39a   : > { %1845 = vrot.lane.b32.xlu1 %v5291_v23, %s4689_s12  ;;  %v5330_v60 = vmul.f32 %v1544_v54, %v5196_v16 }
 0x39b   : > { %v5325_v57 = vpop.f32.mrf.mxu1 }
 0x39c   : > { %1987 = vrot.lane.b32.xlu0 %v1954_v48, %s4692_s5  ;;  %v1956_v40 = vmul.f32 %v5232_v45, %v5330_v60 }
 0x39d   : > { %v1550_v61 = vpop.f32.mrf.mxu1 }
 0x39e   : > { %2139 = vrot.lane.b32.xlu1 %v2107_v47, %s4692_s5  ;;  %v5337_v44 = vmul.f32 %v1550_v61, %v5198_v19  ;;  %v1712_v19 = vpop.permute.xlu0 %1711 }
 0x39f   : > { %v5343_v16 = vpop.f32.mrf.mxu1 }
 0x3a0   : > { %1989 = vrot.lane.b32.xlu0 %v1955_v13, %s4692_s5  ;;  %v1957_v4 = vmul.f32 %v5220_v36, %v5337_v44  ;;  %v1747_v14 = vmul.f32 %v1712_v19, %v5337_v44  ;;  %v5363_v36 = vpop.permute.xlu1 %1736 }
 0x3a1   : > { %v1556_v8 = vpop.f32.mrf.mxu1 }
 0x3a2   : > { %1847 = vrot.lane.b32.xlu1 %v5303_v31, %s4689_s12  ;;  %v5354_v45 = vmul.f32 %v1556_v8, %v5202_v22 }
 0x3a3   : > { %v5358_v21 = vpop.f32.mrf.mxu1 }
 0x3a4   : > { %1991 = vrot.lane.b32.xlu0 %v1956_v40, %s4692_s5  ;;  %v1958_v7 = vmul.f32 %v5218_v35, %v5354_v45  ;;  %v1748_v22 = vmul.f32 %v1717_v0, %v5354_v45  ;;  %v5374_v48 = vpop.permute.xlu1 %1731 }
 0x3a5   : > { %v1562_v34 = vpop.f32.mrf.mxu1 }
 0x3a6   : > { %2141 = vrot.lane.b32.xlu1 %v2108_v42, %s4692_s5  ;;  %v5371_v9 = vmul.f32 %v1562_v34, %v5206_v25  ;;  %v2110_v25 = vmul.f32 %v5224_v41, %v5330_v60  ;;  %v1707_v42 = vpop.permute.xlu0 %1706 }
 0x3a7   : > { %v5381_v53 = vpop.f32.mrf.mxu1 }
 0x3a8   : > { %1993 = vrot.lane.b32.xlu0 %v1957_v4, %s4692_s5  ;;  %v1959_v35 = vmul.f32 %v5230_v43, %v5371_v9  ;;  %v1722_v47 = vpop.permute.xlu1 %1721 }
 0x3a9   : > { %v1749_v13 = vmul.f32 %v1722_v47, %v5371_v9 }
 0x3aa   : > { %1849 = vrot.lane.b32.xlu1 %v5315_v52, %s4689_s12  ;;  %v1702_v19 = vpop.permute.xlu0 %1701 }
 0x3ac   : > { %1783 = vrot.lane.b32.xlu0 %v1747_v14, %s4692_s5 }
 0x3ae   : > { %2143 = vrot.lane.b32.xlu1 %v2109_v46, %s4692_s5 }
 0x3b0   : > { %1995 = vrot.lane.b32.xlu0 %v1958_v7, %s4692_s5  ;;  %v1697_v7 = vpop.permute.xlu0 %1696 }
 0x3b2   : > { %1627 = vrot.lane.b32.xlu1 %v1544_v54, %s4694_s28  ;;  %v1568_v54 = vpop.f32.mrf.mxu1 }
 0x3b3   : > { %v5390_v0 = vmul.f32 %v1568_v54, %v5208_v27  ;;  %v2111_v27 = vmul.f32 %v5222_v39, %v5337_v44 }
 0x3b4   : > { %1785 = vrot.lane.b32.xlu0 %v1748_v22, %s4692_s5  ;;  %v5393_v43 = vpop.f32.mrf.mxu1  ;;  %v1744_v22 = vmul.f32 %v1697_v7, %v5311_v50 }
 0x3b5   : > { %v1960_v41 = vmul.f32 %v5204_v24, %v5390_v0  ;;  %v1750_v4 = vmul.f32 %v1727_v11, %v5390_v0 }
 0x3b6   : > { %1851 = vrot.lane.b32.xlu1 %v5325_v57, %s4689_s12  ;;  %v1574_v40 = vpop.f32.mrf.mxu1 }
 0x3b7   : > { %v5409_v14 = vmul.f32 %v1574_v40, %v5212_v30  ;;  %v2112_v30 = vmul.f32 %v5238_v51, %v5354_v45 }
 0x3b8   : > { %1997 = vrot.lane.b32.xlu0 %v1959_v35, %s4692_s5 }
 0x3b9   : > { %v1961_v39 = vmul.f32 %v5200_v20, %v5409_v14  ;;  %v1745_v20 = vmul.f32 %v1702_v19, %v5320_v55 }
 0x3ba   : > { %2145 = vrot.lane.b32.xlu1 %v2110_v25, %s4692_s5  ;;  %v2114_v25 = vmul.f32 %v5210_v28, %v5390_v0  ;;  %v1751_v28 = vmul.f32 %v5374_v48, %v5409_v14 }
 0x3bc   : > { %1635 = vrot.lane.b32.xlu0 %v1568_v54, %s4694_s28  ;;  %v2115_v54 = vmul.f32 %v5236_v49, %v5409_v14 }
 0x3be   : > { %1629 = vrot.lane.b32.xlu1 %v1550_v61, %s4694_s28  ;;  %v5404_v61 = vpop.f32.mrf.mxu1 }
 0x3c0   : > { %1787 = vrot.lane.b32.xlu0 %v1749_v13, %s4692_s5  ;;  %v1580_v24 = vpop.f32.mrf.mxu1 }
 0x3c1   : > { %v5414_v46 = vmul.f32 %v1580_v24, %v5216_v33  ;;  %v1692_v33 = vpop.permute.xlu0 %1691 }
 0x3c2   : > { %1853 = vrot.lane.b32.xlu1 %v5343_v16, %s4689_s12  ;;  %v1743_v35 = vmul.f32 %v1692_v33, %v5298_v29  ;;  %v5471_v49 = vpop.f32.mrf.mxu1 }
 0x3c3   : > { %v1962_v11 = vmul.f32 %v5226_v37, %v5414_v46  ;;  %v2113_v37 = vmul.f32 %v5214_v32, %v5371_v9  ;;  %v2116_v48 = vmul.f32 %v5194_v15, %v5414_v46 }
 0x3c4   : > { %1999 = vrot.lane.b32.xlu0 %v1960_v41, %s4692_s5 }
 0x3c5   : > { %v1687_v51 = vpop.permute.xlu0 %1686 }
 0x3c6   : > { %2147 = vrot.lane.b32.xlu1 %v2111_v27, %s4692_s5  ;;  %v1742_v32 = vmul.f32 %v1687_v51, %v5287_v5 }
 0x3c8   : > { %1637 = vrot.lane.b32.xlu0 %v1574_v40, %s4694_s28 }
 0x3ca   : > { %1631 = vrot.lane.b32.xlu1 %v1556_v8, %s4694_s28  ;;  %v1746_v8 = vmul.f32 %v1707_v42, %v5330_v60 }
 0x3cc   : > { %1789 = vrot.lane.b32.xlu0 %v1750_v4, %s4692_s5 }
 0x3ce   : > { %1855 = vrot.lane.b32.xlu1 %v5358_v21, %s4689_s12 }
 0x3d0   : > { %2001 = vrot.lane.b32.xlu0 %v1961_v39, %s4692_s5 }
 0x3d2   : > { %2149 = vrot.lane.b32.xlu1 %v2112_v30, %s4692_s5 }
 0x3d4   : > { %2003 = vrot.lane.b32.xlu0 %v1962_v11, %s4692_s5  ;;  %v2036_v11 = vmul.f32 %v5287_v5, %v5278_v12 }
 0x3d6   : > { %1633 = vrot.lane.b32.xlu1 %v1562_v34, %s4694_s28  ;;  %v5439_v34 = vpop.permute.xlu0 %1681 }
 0x3d8   : > { %1781 = vrot.lane.b32.xlu0 %v1746_v8, %s4692_s5 }
 0x3da   : > { %1857 = vrot.lane.b32.xlu1 %v5381_v53, %s4689_s12  ;;  %v5449_v47 = vpop.permute.xlu0 %1676 }
 0x3dc   : > { %1779 = vrot.lane.b32.xlu0 %v1745_v20, %s4692_s5 }
 0x3de   : > { %2151 = vrot.lane.b32.xlu1 %v2113_v37, %s4692_s5  ;;  %v5456_v13 = vpop.permute.xlu0 %1671 }
 0x3e0   : > { %1777 = vrot.lane.b32.xlu0 %v1744_v22, %s4692_s5 }
 0x3e2   : > { %1859 = vrot.lane.b32.xlu1 %v5393_v43, %s4689_s12 }
 0x3e4   : > { %1775 = vrot.lane.b32.xlu0 %v1743_v35, %s4692_s5  ;;  %v1752_v35 = vmul.f32 %v5363_v36, %v5414_v46 }
 0x3e6   : > { %2153 = vrot.lane.b32.xlu1 %v2114_v25, %s4692_s5 }
 0x3e8   : > { %1773 = vrot.lane.b32.xlu0 %v1742_v32, %s4692_s5 }
 0x3ea   : > { %1861 = vrot.lane.b32.xlu1 %v5404_v61, %s4689_s12 }
 0x3ee   : > { %2155 = vrot.lane.b32.xlu1 %v2115_v54, %s4692_s5 }
 0x3f2   : > { %v5459_v41 = vpop.permute.xlu0 %1837  ;;  %1639 = vrot.lane.b32.xlu1 %v1580_v24, %s4694_s28 }
 0x3f4   : > { %v5464_v40 = vpop.permute.xlu1 %1977 }
 0x3f6   : > { %v5466_v42 = vpop.permute.xlu0 %2131  ;;  %1791 = vrot.lane.b32.xlu1 %v1751_v28, %s4692_s5 }
 0x3f8   : > { %v5469_v27 = vpop.permute.xlu1 %1839 }
 0x3fa   : > { %v5473_v4 = vpop.permute.xlu0 %2133  ;;  %1863 = vrot.lane.b32.xlu1 %v5471_v49, %s4689_s12 }
 0x3fc   : > { %v5477_v19 = vpop.permute.xlu1 %1979 }
 0x3fe   : > { %v5481_v24 = vpop.permute.xlu0 %1841  ;;  %2157 = vrot.lane.b32.xlu1 %v2116_v48, %s4692_s5 }
 0x400   : > { %v5484_v39 = vpop.permute.xlu1 %2135 }
 0x402   : > { %v5486_v7 = vpop.permute.xlu0 %1981  ;;  %1625 = vrot.lane.b32.xlu1 %v5307_v38, %s4694_s28 }
 0x404   : > { %v5490_v30 = vpop.permute.xlu1 %1843 }
 0x406   : > { %v2138_v33 = vpop.permute.xlu0 %2137  ;;  %1623 = vrot.lane.b32.xlu1 %v5294_v26, %s4694_s28 }
 0x407   : > { %v5496_v15 = vadd.f32 %v2138_v33, %v2036_v11 }
 0x408   : > { %v5498_v8 = vpop.permute.xlu1 %1983 }
 0x40a   : > { %v1986_v20 = vpop.permute.xlu0 %1985  ;;  %1621 = vrot.lane.b32.xlu1 %v5283_v17, %s4694_s28 }
 0x40c   : > { %v1846_v51 = vpop.permute.xlu1 %1845 }
 0x40d   : > { %v1883_v38 = vmul.f32 %v1846_v51, %v5298_v29 }
 0x40e   : > { %v1988_v37 = vpop.permute.xlu0 %1987  ;;  %1619 = vrot.lane.b32.xlu1 %v5275_v10, %s4694_s28  ;;  %v2038_v10 = vmul.f32 %v5311_v50, %v5303_v31 }
 0x40f   : > { %v2023_v12 = vadd.f32 %v1986_v20, %v1883_v38  ;;  %v2039_v20 = vmul.f32 %v5320_v55, %v5315_v52 }
 0x410   : > { %v5505_v22 = vpop.permute.xlu1 %2139 }
 0x411   : > { %2209 = vrot.lane.b32.xlu0 %v2023_v12, %s4689_s12 }
 0x412   : > { %v1990_v26 = vpop.permute.xlu0 %1989  ;;  %1617 = vrot.lane.b32.xlu1 %v5262_v1, %s4694_s28 }
 0x414   : > { %v1848_v17 = vpop.permute.xlu1 %1847 }
 0x415   : > { %v1884_v25 = vmul.f32 %v1848_v17, %v5311_v50 }
 0x416   : > { %v1992_v32 = vpop.permute.xlu0 %1991  ;;  %1793 = vrot.lane.b32.xlu1 %v1752_v35, %s4692_s5 }
 0x417   : > { %v2024_v54 = vadd.f32 %v1988_v37, %v1884_v25 }
 0x418   : > { %v2142_v28 = vpop.permute.xlu1 %2141 }
 0x419   : > { %v2178_v48 = vadd.f32 %v2142_v28, %v2038_v10  ;;  %2211 = vrot.lane.b32.xlu0 %v2024_v54, %s4689_s12  ;;  %v2040_v54 = vmul.f32 %v5330_v60, %v5325_v57 }
 0x41a   : > { %v1994_v11 = vpop.permute.xlu0 %1993 }
 0x41b   : > { %2267 = vrot.lane.b32.xlu1 %v2178_v48, %s4694_s28 }
 0x41c   : > { %v1850_v1 = vpop.permute.xlu1 %1849 }
 0x41d   : > { %v1885_v36 = vmul.f32 %v1850_v1, %v5320_v55 }
 0x41e   : > { %v5519_v33 = vpop.permute.xlu0 %1783 }
 0x41f   : > { %v2025_v51 = vadd.f32 %v1990_v26, %v1885_v36 }
 0x420   : > { %v2144_v38 = vpop.permute.xlu1 %2143 }
 0x421   : > { %v2179_v12 = vadd.f32 %v2144_v38, %v2039_v20  ;;  %2213 = vrot.lane.b32.xlu0 %v2025_v51, %s4689_s12 }
 0x422   : > { %v1996_v31 = vpop.permute.xlu0 %1995 }
 0x423   : > { %2269 = vrot.lane.b32.xlu1 %v2179_v12, %s4694_s28  ;;  %v2041_v12 = vmul.f32 %v5337_v44, %v5343_v16 }
 0x424   : > { %v5525_v37 = vpop.permute.xlu1 %1627 }
 0x426   : > { %v1786_v35 = vpop.permute.xlu0 %1785 }
 0x428   : > { %v1852_v17 = vpop.permute.xlu1 %1851 }
 0x429   : > { %v1886_v25 = vmul.f32 %v1852_v17, %v5330_v60 }
 0x42a   : > { %v1998_v10 = vpop.permute.xlu0 %1997 }
 0x42b   : > { %v2026_v28 = vadd.f32 %v1992_v32, %v1886_v25 }
 0x42c   : > { %v2146_v52 = vpop.permute.xlu1 %2145 }
 0x42d   : > { %v2180_v26 = vadd.f32 %v2146_v52, %v2040_v54  ;;  %2215 = vrot.lane.b32.xlu0 %v2026_v28, %s4689_s12 }
 0x42e   : > { %v1636_v48 = vpop.permute.xlu0 %1635 }
 0x42f   : > { %2271 = vrot.lane.b32.xlu1 %v2180_v26, %s4694_s28  ;;  %v1666_v28 = vmul.f32 %v1636_v48, %v5390_v0 }
 0x430   : > { %v5532_v1 = vpop.permute.xlu1 %1629 }
 0x432   : > { %v1788_v36 = vpop.permute.xlu0 %1787 }
 0x434   : > { %v1854_v20 = vpop.permute.xlu1 %1853 }
 0x435   : > { %v1887_v51 = vmul.f32 %v1854_v20, %v5337_v44 }
 0x436   : > { %v2000_v38 = vpop.permute.xlu0 %1999 }
 0x437   : > { %v2027_v17 = vadd.f32 %v1994_v11, %v1887_v51  ;;  %v2042_v11 = vmul.f32 %v5354_v45, %v5358_v21 }
 0x438   : > { %v2148_v57 = vpop.permute.xlu1 %2147 }
 0x439   : > { %v2181_v32 = vadd.f32 %v2148_v57, %v2041_v12  ;;  %2217 = vrot.lane.b32.xlu0 %v2027_v17, %s4689_s12 }
 0x43a   : > { %v1638_v25 = vpop.permute.xlu0 %1637 }
 0x43b   : > { %2273 = vrot.lane.b32.xlu1 %v2181_v32, %s4694_s28 }
 0x43c   : > { %v1632_v54 = vpop.permute.xlu1 %1631 }
 0x43d   : > { %v1664_v52 = vmul.f32 %v1632_v54, %v5354_v45 }
 0x43e   : > { %v1790_v26 = vpop.permute.xlu0 %1789 }
 0x43f   : > { %v5541_v18 = vadd.f32 %v1786_v35, %v1664_v52  ;;  %v5543_v20 = vadd.f32 %v1790_v26, %v1666_v28 }
 0x440   : > { %v1856_v50 = vpop.permute.xlu1 %1855 }
 0x441   : > { %v1888_v16 = vmul.f32 %v1856_v50, %v5354_v45  ;;  %v2043_v50 = vmul.f32 %v5371_v9, %v5381_v53 }
 0x443   : > { %v2028_v51 = vadd.f32 %v1996_v31, %v1888_v16 }
 0x444   : > { %v2150_v12 = vpop.permute.xlu1 %2149 }
 0x445   : > { %v2182_v17 = vadd.f32 %v2150_v12, %v2042_v11  ;;  %2219 = vrot.lane.b32.xlu0 %v2028_v51, %s4689_s12  ;;  %v2002_v12 = vpop.permute.xlu0 %2001 }
 0x447   : > { %2275 = vrot.lane.b32.xlu1 %v2182_v17, %s4694_s28  ;;  %v2045_v17 = vmul.f32 %v5409_v14, %v5404_v61  ;;  %v2046_v61 = vmul.f32 %v5414_v46, %v5471_v49 }
 0x448   : > { %v1634_v48 = vpop.permute.xlu1 %1633 }
 0x449   : > { %v1665_v57 = vmul.f32 %v1634_v48, %v5371_v9 }
 0x44b   : > { %v5551_v35 = vadd.f32 %v1788_v36, %v1665_v57  ;;  %v2044_v36 = vmul.f32 %v5390_v0, %v5393_v43 }
 0x44c   : > { %v1858_v32 = vpop.permute.xlu1 %1857 }
 0x44d   : > { %v1889_v54 = vmul.f32 %v1858_v32, %v5371_v9 }
 0x44f   : > { %v2029_v28 = vadd.f32 %v1998_v10, %v1889_v54 }
 0x450   : > { %v2152_v21 = vpop.permute.xlu1 %2151 }
 0x451   : > { %v2183_v31 = vadd.f32 %v2152_v21, %v2043_v50  ;;  %2221 = vrot.lane.b32.xlu0 %v2029_v28, %s4689_s12 }
 0x453   : > { %2277 = vrot.lane.b32.xlu1 %v2183_v31, %s4694_s28  ;;  %v2004_v31 = vpop.permute.xlu0 %2003 }
 0x454   : > { %v1860_v52 = vpop.permute.xlu1 %1859 }
 0x455   : > { %v1890_v26 = vmul.f32 %v1860_v52, %v5390_v0 }
 0x457   : > { %v2030_v16 = vadd.f32 %v2000_v38, %v1890_v26  ;;  %v1667_v38 = vmul.f32 %v1638_v25, %v5409_v14  ;;  %v1741_v25 = vmul.f32 %v5439_v34, %v5271_v3  ;;  %v1740_v34 = vmul.f32 %v5449_v47, %v5255_v63  ;;  %v2342_v47 = vld [vmem:[%s6371_s23] sm:$0xff] }
 0x458   : > { %v2154_v11 = vpop.permute.xlu1 %2153  ;;  %4382 = vmatprep.mubr.msk.f32.mxu0 %vm2344_vm10, %v2342_v47 }
 0x459   : > { %v2184_v51 = vadd.f32 %v2154_v11, %v2044_v36  ;;  %2223 = vrot.lane.b32.xlu0 %v2030_v16, %s4689_s12  ;;  %v1882_v16 = vmul.f32 %v5490_v30, %v5287_v5  ;;  %v2037_v11 = vmul.f32 %v5298_v29, %v5291_v23  ;;  %v1881_v30 = vmul.f32 %v5481_v24, %v5271_v3 }
 0x45a   : > { %v1739_v24 = vmul.f32 %v5456_v13, %v5245_v58  ;;  %v1879_v13 = vmul.f32 %v5459_v41, %v5245_v58 }
 0x45b   : > { %2279 = vrot.lane.b32.xlu1 %v2184_v51, %s4694_s28  ;;  %v2022_v49 = vadd.f32 %v5498_v8, %v1882_v16  ;;  %v2177_v51 = vadd.f32 %v5505_v22, %v2037_v11  ;;  %v2021_v23 = vadd.f32 %v5486_v7, %v1881_v30  ;;  %v2033_v7 = vmul.f32 %v5245_v58, %v5247_v59  ;;  %v1782_v22 = vpop.permute.xlu0 %1781 }
 0x45c   : > { %v1862_v53 = vpop.permute.xlu1 %1861 }
 0x45d   : > { %v1891_v10 = vmul.f32 %v1862_v53, %v5409_v14 }
 0x45f   : > { %v2031_v48 = vadd.f32 %v2002_v12, %v1891_v10  ;;  %v1780_v53 = vpop.permute.xlu0 %1779 }
 0x460   : > { %v2156_v57 = vpop.permute.xlu1 %2155 }
 0x461   : > { %v2185_v32 = vadd.f32 %v2156_v57, %v2045_v17  ;;  %2225 = vrot.lane.b32.xlu0 %v2031_v48, %s4689_s12 }
 0x463   : > { %2281 = vrot.lane.b32.xlu1 %v2185_v32, %s4694_s28  ;;  %v1778_v41 = vpop.permute.xlu0 %1777 }
 0x464   : > { %v5568_v43 = vpop.permute.xlu1 %1639 }
 0x465   : > { %v1668_v11 = vmul.f32 %v5568_v43, %v5414_v46 }
 0x467   : > { %v5633_v12 = vpop.permute.xlu0 %1775 }
 0x468   : > { %v1792_v54 = vpop.permute.xlu1 %1791 }
 0x469   : > { %v5571_v50 = vadd.f32 %v1792_v54, %v1667_v38 }
 0x46b   : > { %v5637_v17 = vpop.permute.xlu0 %1773  ;;  %v2311_v47 = vsel %vm1100_vm5, %v5409_v14, %v5571_v50 }
 0x46c   : > { %v1864_v28 = vpop.permute.xlu1 %1863 }
 0x46d   : > { %v1892_v21 = vmul.f32 %v1864_v28, %v5414_v46 }
 0x46f   : > { %v2032_v52 = vadd.f32 %v2004_v31, %v1892_v21 }
 0x470   : > { %v2158_v26 = vpop.permute.xlu1 %2157 }
 0x471   : > { %v2186_v36 = vadd.f32 %v2158_v26, %v2046_v61  ;;  %2227 = vrot.lane.b32.xlu0 %v2032_v52, %s4689_s12 }
 0x473   : > { %2283 = vrot.lane.b32.xlu1 %v2186_v36, %s4694_s28 }
 0x475   : > { %1771 = vrot.lane.b32.xlu0 %v1741_v25, %s4692_s5 }
 0x477   : > { %1615 = vrot.lane.b32.xlu1 %v5252_v62, %s4694_s28  ;;  %v2035_v62 = vmul.f32 %v5271_v3, %v5267_v6  ;;  %v1880_v6 = vmul.f32 %v5469_v27, %v5255_v63  ;;  %v2019_v27 = vadd.f32 %v5464_v40, %v1879_v13  ;;  %v2309_v13 = vsel %vm1100_vm5, %v5371_v9, %v5551_v35 }
 0x479   : > { %2207 = vrot.lane.b32.xlu0 %v2022_v49, %s4689_s12  ;;  %v2175_v8 = vadd.f32 %v5484_v39, %v2035_v62 }
 0x47b   : > { %2265 = vrot.lane.b32.xlu1 %v2177_v51, %s4694_s28 }
 0x47d   : > { %1769 = vrot.lane.b32.xlu0 %v1740_v34, %s4692_s5 }
 0x47f   : > { %1613 = vrot.lane.b32.xlu1 %v5242_v56, %s4694_s28  ;;  %v2034_v56 = vmul.f32 %v5255_v63, %v5259_v2  ;;  %v2173_v2 = vadd.f32 %v5466_v42, %v2033_v7 }
 0x481   : > { %2205 = vrot.lane.b32.xlu0 %v2021_v23, %s4689_s12  ;;  %v2174_v39 = vadd.f32 %v5473_v4, %v2034_v56  ;;  %v1626_v4 = vpop.permute.xlu1 %1625 }
 0x482   : > { %v1661_v50 = vmul.f32 %v1626_v4, %v5320_v55 }
 0x483   : > { %2263 = vrot.lane.b32.xlu1 %v5496_v15, %s4694_s28  ;;  %v2020_v15 = vadd.f32 %v5477_v19, %v1880_v6  ;;  %v5639_v40 = vpop.permute.xlu0 %2209  ;;  %v2310_v6 = vsel %vm1100_vm5, %v5390_v0, %v5543_v20 }
 0x484   : > { %v1815_v35 = vadd.f32 %v1780_v53, %v1661_v50 }
 0x485   : > { %2261 = vrot.lane.b32.xlu0 %v2175_v8, %s4694_s28  ;;  %v1624_v59 = vpop.permute.xlu1 %1623  ;;  %v1663_v8 = vmul.f32 %v5532_v1, %v5337_v44 }
 0x487   : > { %1767 = vrot.lane.b32.xlu1 %v1739_v24, %s4692_s5  ;;  %v1817_v14 = vadd.f32 %v5519_v33, %v1663_v8  ;;  %v2308_v33 = vsel %vm1100_vm5, %v5354_v45, %v5541_v18 }
 0x489   : > { %2259 = vrot.lane.b32.xlu0 %v2174_v39, %s4694_s28  ;;  %v5629_v10 = vpop.permute.xlu1 %1621 }
 0x48a   : > { %v1659_v18 = vmul.f32 %v5629_v10, %v5298_v29 }
 0x48b   : > { %2203 = vrot.lane.b32.xlu1 %v2020_v15, %s4689_s12  ;;  %v5641_v57 = vpop.permute.xlu0 %2211 }
 0x48d   : > { %2257 = vrot.lane.b32.xlu0 %v2173_v2, %s4694_s28  ;;  %v5631_v19 = vpop.permute.xlu1 %1619  ;;  %v6372_v2 = vld [vmem:[#allocation6_spill] sm:$0xff] }
 0x48f   : > { %2201 = vrot.lane.b32.xlu1 %v2019_v27, %s4689_s12  ;;  %v1660_v27 = vmul.f32 %v1624_v59, %v6372_v2 }
 0x491   : > { %v5635_v42 = vpop.permute.xlu1 %1617 }
 0x493   : > { %v5645_v38 = vpop.permute.xlu0 %2213 }
 0x495   : > { %v1794_v48 = vpop.permute.xlu1 %1793 }
 0x496   : > { %v1822_v51 = vadd.f32 %v1794_v48, %v1668_v11  ;;  %v1814_v11 = vadd.f32 %v1778_v41, %v1660_v27 }
 0x498   : > { %v2312_v62 = vsel %vm1100_vm5, %v5414_v46, %v1822_v51  ;;  %v1662_v46 = vmul.f32 %v5525_v37, %v5330_v60 }
 0x499   : > { %v5643_v32 = vpop.permute.xlu1 %2267 }
 0x49a   : > { %v1816_v37 = vadd.f32 %v1782_v22, %v1662_v46 }
 0x49c   : > { %v2306_v45 = vsel %vm1100_vm5, %v5330_v60, %v1816_v37  ;;  %v2458_v37 = vld [vmem:[%s4883_s6] sm:$0xff] }
 0x49d   : > { %v5647_v54 = vpop.permute.xlu1 %2269 }
 0x49f   : > { %v2216_v28 = vpop.permute.xlu0 %2215 }
 0x4a1   : > { %v5649_v21 = vpop.permute.xlu1 %2271 }
 0x4ab   : > { %v2218_v31 = vpop.permute.xlu0 %2217 }
 0x4ad   : > { %v2274_v61 = vpop.permute.xlu1 %2273 }
 0x4b7   : > { %v2220_v52 = vpop.permute.xlu0 %2219 }
 0x4b8   : > { %v2323_v48 = vsel %vm2313_vm11, %v2308_v33, %v2220_v52  ;;  %v2321_v52 = vsel %vm2313_vm11, %v2306_v45, %v2216_v28  ;;  %v2304_v28 = vsel %vm1100_vm5, %v6372_v2, %v1814_v11  ;;  %v2459_v2 = vld [vmem:[%s4883_s6 + $0x8] sm:$0xff] }
 0x4b9   : > { %v2276_v26 = vpop.permute.xlu1 %2275  ;;  %v2465_v27 = vpack.c.bf16 %v2459_v2, %v2458_v37 }
 0x4ba   : > { %v2337_v53 = vsel %vm1374_vm8, %v2323_v48, %v2276_v26  ;;  %v1813_v26 = vadd.f32 %v5633_v12, %v1659_v18 }
 0x4c3   : > { %v2222_v36 = vpop.permute.xlu0 %2221 }
 0x4c4   : > { %v2324_v20 = vsel %vm2313_vm11, %v2309_v13, %v2222_v36  ;;  %v2307_v36 = vsel %vm1100_vm5, %v5337_v44, %v1817_v14  ;;  %v2343_v13 = vld [vmem:[%s6371_s23 + $0x8] sm:$0xff] }
 0x4c5   : > { %v2278_v25 = vpop.permute.xlu1 %2277  ;;  %v2322_v59 = vsel %vm2313_vm11, %v2307_v36, %v2218_v31  ;;  %v2305_v31 = vsel %vm1100_vm5, %v5320_v55, %v1815_v35  ;;  %v2319_v55 = vsel %vm2313_vm11, %v2304_v28, %v5641_v57  ;;  %v4625_v35 = vld [vmem:[#allocation3 + $0x8] sm:$0xff] }
 0x4c6   : > { %v2338_v22 = vsel %vm1374_vm8, %v2324_v20, %v2278_v25  ;;  %v1658_v25 = vmul.f32 %v5631_v19, %v5287_v5  ;;  %v2336_v41 = vsel %vm1374_vm8, %v2322_v59, %v2274_v61  ;;  %v2320_v10 = vsel %vm2313_vm11, %v2305_v31, %v5645_v38  ;;  %v2461_v20 = vld [vmem:[%s4883_s6 + $0x18] sm:$0xff] }
 0x4c7   : > { %v2335_v19 = vsel %vm1374_vm8, %v2321_v52, %v5649_v21  ;;  %v1657_v38 = vmul.f32 %v5635_v42, %v5271_v3  ;;  %v2334_v12 = vsel %vm1374_vm8, %v2320_v10, %v5647_v54  ;;  %v2333_v57 = vsel %vm1374_vm8, %v2319_v55, %v5643_v32  ;;  %v4627_v52 = vld [vmem:[#allocation3 + $0x18] sm:$0xff] }
 0x4c8   : > { %v1812_v61 = vadd.f32 %v5637_v17, %v1658_v25  ;;  %v4628_v25 = vld [vmem:[#allocation3 + $0x10] sm:$0xff] }
 0x4ca   : > { %v2302_v54 = vsel %vm1100_vm5, %v5287_v5, %v1812_v61 }
 0x4cb   : > { %v2224_v16 = vpop.permute.xlu0 %2223 }
 0x4cc   : > { %v2325_v1 = vsel %vm2313_vm11, %v2310_v6, %v2224_v16 }
 0x4cd   : > { %v2280_v49 = vpop.permute.xlu1 %2279 }
 0x4ce   : > { %v2339_v4 = vsel %vm1374_vm8, %v2325_v1, %v2280_v49 }
 0x4d3   : > { %v2226_v34 = vpop.permute.xlu0 %2225 }
 0x4d4   : > { %v2326_v43 = vsel %vm2313_vm11, %v2311_v47, %v2226_v34  ;;  %v2303_v34 = vsel %vm1100_vm5, %v5298_v29, %v1813_v26  ;;  %v4629_v26 = vld [vmem:[#allocation3 + $0x20] sm:$0xff] }
 0x4d5   : > { %v2282_v30 = vpop.permute.xlu1 %2281  ;;  %v2318_v17 = vsel %vm2313_vm11, %v2303_v34, %v5639_v40 }
 0x4d6   : > { %v2340_v0 = vsel %vm1374_vm8, %v2326_v43, %v2282_v30 }
 0x4e3   : > { %v2228_v23 = vpop.permute.xlu0 %2227 }
 0x4e4   : > { %v2327_v24 = vsel %vm2313_vm11, %v2312_v62, %v2228_v23 }
 0x4e5   : > { %v2284_v56 = vpop.permute.xlu1 %2283 }
 0x4e6   : > { %v2341_v39 = vsel %vm1374_vm8, %v2327_v24, %v2284_v56 }
 0x4e7   : > { %v1772_v7 = vpop.permute.xlu0 %1771  ;;  %4354 = vmatprep.subr.mxu0 %v2341_v39 }
 0x4e8   : > { %4355 = vmatpush3.msra.mxu0 %v2341_v39  ;;  %v1811_v21 = vadd.f32 %v1772_v7, %v1657_v38 }
 0x4e9   : > { %v1616_v15 = vpop.permute.xlu1 %1615  ;;  %4356 = vmatprep.subr.mxu0 %v2340_v0 }
 0x4ea   : > { %4357 = vmatpush3.msra.mxu0 %v2340_v0  ;;  %v1656_v30 = vmul.f32 %v1616_v15, %v5255_v63  ;;  %v2301_v32 = vsel %vm1100_vm5, %v5271_v3, %v1811_v21  ;;  %v6373_v0 = vmov 0.0   ;;  %v2599_v21 = vld [vmem:[%s4894_s4 + $0x30] sm:$0xff] }
 0x4eb   : > { %v2208_v9 = vpop.permute.xlu0 %2207  ;;  %4358 = vmatprep.subr.mxu0 %v2339_v4 }
 0x4ec   : > { %4359 = vmatpush3.msra.mxu0 %v2339_v4  ;;  %v2317_v29 = vsel %vm2313_vm11, %v2302_v54, %v2208_v9 }
 0x4ed   : > { %v2266_v16 = vpop.permute.xlu1 %2265  ;;  %4360 = vmatprep.subr.mxu0 %v2338_v22 }
 0x4ee   : > { %4361 = vmatpush3.msra.mxu0 %v2338_v22  ;;  %v2332_v23 = vsel %vm1374_vm8, %v2318_v17, %v2266_v16  ;;  %v4626_v22 = vld [vmem:[#allocation3] sm:$0xff]  ;;  %v2597_v17 = vld [vmem:[%s4894_s4 + $0x20] sm:$0xff] }
 0x4ef   : > { %v1770_v44 = vpop.permute.xlu0 %1769  ;;  %4362 = vmatprep.subr.mxu0 %v2337_v53 }
 0x4f0   : > { %4363 = vmatpush3.msra.mxu0 %v2337_v53  ;;  %v1810_v62 = vadd.f32 %v1770_v44, %v1656_v30 }
 0x4f1   : > { %v1614_v60 = vpop.permute.xlu1 %1613  ;;  %4364 = vmatprep.subr.mxu0 %v2336_v41 }
 0x4f2   : > { %4365 = vmatpush3.msra.mxu0 %v2336_v41  ;;  %v1655_v47 = vmul.f32 %v1614_v60, %v5245_v58  ;;  %v2300_v6 = vsel %vm1100_vm5, %v5255_v63, %v1810_v62 }
 0x4f3   : > { %v2206_v49 = vpop.permute.xlu0 %2205  ;;  %4366 = vmatprep.subr.mxu0 %v2335_v19 }
 0x4f4   : > { %4367 = vmatpush3.msra.mxu0 %v2335_v19  ;;  %v2316_v24 = vsel %vm2313_vm11, %v2301_v32, %v2206_v49  ;;  %v4630_v19 = vld [vmem:[#allocation3 + $0x28] sm:$0xff] }
 0x4f5   : > { %v2264_v51 = vpop.permute.xlu1 %2263  ;;  %4368 = vmatprep.subr.mxu0 %v2334_v12 }
 0x4f6   : > { %4369 = vmatpush3.msra.mxu0 %v2334_v12  ;;  %v2331_v40 = vsel %vm1374_vm8, %v2317_v29, %v2264_v51 }
 0x4f7   : > { %v2262_v42 = vpop.permute.xlu0 %2261  ;;  %4370 = vmatprep.subr.mxu0 %v2333_v57 }
 0x4f8   : > { %4371 = vmatpush3.msra.mxu0 %v2333_v57  ;;  %v2330_v43 = vsel %vm1374_vm8, %v2316_v24, %v2262_v42  ;;  %v2600_v57 = vld [vmem:[%s4894_s4 + $0x38] sm:$0xff]  ;;  %v2598_v42 = vld [vmem:[%s4894_s4 + $0x28] sm:$0xff] }
 0x4f9   : > { %v1768_v8 = vpop.permute.xlu1 %1767  ;;  %4372 = vmatprep.subr.mxu0 %v2332_v23  ;;  %v2606_v30 = vpack.c.bf16 %v2600_v57, %v2599_v21 }
 0x4fa   : > { %4373 = vmatpush3.msra.mxu0 %v2332_v23  ;;  %v1809_v56 = vadd.f32 %v1768_v8, %v1655_v47  ;;  %v2605_v23 = vpack.c.bf16 %v2598_v42, %v2597_v17  ;;  %v4632_v17 = vld [vmem:[#allocation2 + $0x8] sm:$0xff] }
 0x4fb   : > { %4374 = vmatprep.subr.mxu0 %v2331_v40  ;;  %v2260_v5 = vpop.permute.xlu0 %2259 }
 0x4fc   : > { %4375 = vmatpush3.msra.mxu0 %v2331_v40  ;;  %v2299_v1 = vsel %vm1100_vm5, %v5245_v58, %v1809_v56  ;;  %v2460_v58 = vld [vmem:[%s4883_s6 + $0x10] sm:$0xff]  ;;  %s6379_s6 = sld [smem:[#allocation14_spill]] (!%p4121_p5) }
 0x4fd   : > { %v2204_v39 = vpop.permute.xlu1 %2203  ;;  %4376 = vmatprep.subr.mxu0 %v2330_v43  ;;  %v2466_v15 = vpack.c.bf16 %v2461_v20, %v2460_v58 }
 0x4fe   : > { %v2315_v3 = vsel %vm2313_vm11, %v2300_v6, %v2204_v39  ;;  %4377 = vmatpush3.msra.mxu0 %v2330_v43 }
 0x4ff   : > { %v2329_v46 = vsel %vm1374_vm8, %v2315_v3, %v2260_v5  ;;  %v2258_v14 = vpop.permute.xlu0 %2257  ;;  %4386 = vmatpush3.bf16.msra.mxu1 %v2466_v15 }
 0x500   : > { %4378 = vmatprep.subr.mxu0 %v2329_v46  ;;  %4387 = vmatprep.subr.bf16.mxu1 %v6373_v0 }
 0x501   : > { %v2202_v7 = vpop.permute.xlu1 %2201  ;;  %4379 = vmatpush3.msra.mxu0 %v2329_v46 }
 0x502   : > { %v2314_v63 = vsel %vm2313_vm11, %v2299_v1, %v2202_v7 }
 0x503   : > { %v2328_v50 = vsel %vm1374_vm8, %v2314_v63, %v2258_v14  ;;  %4388 = vmatpush3.bf16.msra.mxu1 %v2465_v27 }
 0x504   : > { %4380 = vmatprep.subr.mxu0 %v2328_v50 }
 0x505   : > { %4381 = vmatpush3.msra.mxu0 %v2328_v50 }
 0x506   : > { %4383 = vmatmul.mubr.msk.f32.vlgmr.msra.gmra.mxu0 %vm2344_vm10, %v2343_v13  ;;  %4401 = vmatprep.subr.bf16.mxu0 %v6373_v0 }
 0x507   : > { %4405 = vmatprep.mubr.msk.bf16.mxu0 %vm4688_vm4, %v6373_v0  ;;  %4402 = vmatpush3.bf16.msra.mxu0 %v2606_v30 }
 0x508   : > { %4403 = vmatprep.subr.bf16.mxu0 %v6373_v0 }
 0x50b   : > { %4404 = vmatpush3.bf16.msra.mxu0 %v2605_v23 }
 0x50c   : > { %4409 = vmatprep.subr.bf16.mxu0 %v6373_v0 }
 0x5c6   : > { %v5748_v33 = vpop.f32.mrf.mxu0 }
 0x5c7   : > { %2432 = vrot.lane.b32.xlu0 %v5748_v33, %s4692_s5  ;;  %v5848_v30 = vadd.f32 %v4632_v17, %v5748_v33 }
 0x5c8   : > { %v5752_v4 = vpop.f32.mrf.mxu0 }
 0x5c9   : > { %2430 = vrot.lane.b32.xlu1 %v5752_v4, %s4692_s5 }
 0x5cb   : > { %2436 = vrot.lane.b32.xlu0 %v5748_v33, %s4694_s28 }
 0x5cd   : > { %2434 = vrot.lane.b32.xlu1 %v5752_v4, %s4694_s28 }
 0x639   : > { %v2433_v48 = vpop.permute.xlu0 %2432 }
 0x63a   : > { %2440 = vrot.lane.b32.xlu0 %v2433_v48, %s4692_s5  ;;  %v5761_v36 = vadd.f32 %v4625_v35, %v2433_v48 }
 0x63b   : > { %v2431_v9 = vpop.permute.xlu1 %2430 }
 0x63c   : > { %v5763_v59 = vadd.f32 %v4626_v22, %v2431_v9  ;;  %2438 = vrot.lane.b32.xlu1 %v2431_v9, %s4692_s5 }
 0x63d   : > { %v2437_v16 = vpop.permute.xlu0 %2436 }
 0x63e   : > { %v2462_v11 = vpack.c.bf16 %v5761_v36, %v5763_v59  ;;  %2444 = vrot.lane.b32.xlu0 %v2437_v16, %s4692_s5 }
 0x63f   : > { %v2435_v18 = vpop.permute.xlu1 %2434 }
 0x640   : > { %4390 = vmatmul.mubr.msk.bf16.vlgmr.msra.gmra.mxu1 %vm1100_vm5, %v2462_v11  ;;  %2442 = vrot.lane.b32.xlu1 %v2435_v18, %s4692_s5 }
 0x641   : > { %4393 = vmatprep.mubr.msk.bf16.mxu1 %vm4688_vm4, %v6373_v0 }
 0x6ac   : > { %v2441_v45 = vpop.permute.xlu0 %2440 }
 0x6ad   : > { %v5773_v44 = vadd.f32 %v4627_v52, %v2441_v45 }
 0x6ae   : > { %v2439_v53 = vpop.permute.xlu1 %2438 }
 0x6af   : > { %v5775_v31 = vadd.f32 %v4628_v25, %v2439_v53 }
 0x6b0   : > { %v2445_v60 = vpop.permute.xlu0 %2444 }
 0x6b1   : > { %v2463_v41 = vpack.c.bf16 %v5773_v44, %v5775_v31  ;;  %v5784_v55 = vadd.f32 %v4630_v19, %v2445_v60  ;;  %v2594_v19 = vld [vmem:[%s4894_s4 + $0x8] sm:$0xff] }
 0x6b2   : > { %v2443_v10 = vpop.permute.xlu1 %2442 }
 0x6b3   : > { %4394 = vmatmul.mubr.msk.bf16.gmra.mxu1 %vm1100_vm5, %v2463_v41  ;;  %v5782_v28 = vadd.f32 %v4629_v26, %v2443_v10  ;;  %v2595_v41 = vld [vmem:[%s4894_s4 + $0x10] sm:$0xff]  ;;  %v2596_v10 = vld [vmem:[%s4894_s4 + $0x18] sm:$0xff]  ;;  %v2593_v26 = vld [vmem:[%s4894_s4] sm:$0xff] }
 0x6b4   : > { %4397 = vmatprep.mubr.msk.bf16.mxu1 %vm4688_vm4, %v6373_v0  ;;  %v2603_v60 = vpack.c.bf16 %v2596_v10, %v2595_v41 }
 0x6b5   : > { %v2464_v49 = vpack.c.bf16 %v5784_v55, %v5782_v28 }
 0x6bb   : > { %4398 = vmatmul.mubr.msk.bf16.gmra.mxu1 %vm1100_vm5, %v2464_v49 }
 0x700   : > { %v5789_v61 = vpop.f32.mrf.mxu1 }
 0x701   : > { %2561 = vrot.lane.b32.xlu0 %v5789_v61, %s4692_s5  ;;  %v2533_v32 = vmul.f32 %v5789_v61, %v5789_v61 }
 0x702   : > { %v4391_v38 = vpop.f32.mrf.mxu1 }
 0x703   : > { %v2602_v38 = vpack.c.bf16 %v2594_v19, %v2593_v26 }
 0x704   : > { %v5793_v12 = vpop.f32.mrf.mxu1 }
 0x705   : > { %v2534_v56 = vmul.f32 %v5793_v12, %v5793_v12 }
 0x706   : > { %v4392_v51 = vpop.f32.mrf.mxu1 }
 0x707   : > { %v4631_v51 = vld [vmem:[#allocation2] sm:$0xff] }
 0x708   : > { %v5844_v21 = vadd.f32 %v4631_v51, %v5752_v4 }
 0x70a   : > { %v2601_v42 = vpack.c.bf16 %v5848_v30, %v5844_v21 }
 0x773   : > { %v5795_v34 = vpop.f32.mrf.mxu1  ;;  %v2562_v22 = vpop.permute.xlu0 %2561 }
 0x774   : > { %2571 = vrot.lane.b32.xlu0 %v5795_v34, %s4692_s5  ;;  %v2535_v62 = vmul.f32 %v5795_v34, %v5795_v34  ;;  %v2567_v18 = vmul.f32 %v2562_v22, %v5789_v61 }
 0x775   : > { %v4395_v54 = vpop.f32.mrf.mxu1 }
 0x776   : > { %v2537_v47 = vadd.f32 %v2535_v62, %v2533_v32 }
 0x777   : > { %v5803_v29 = vpop.f32.mrf.mxu1 }
 0x778   : > { %v2536_v24 = vmul.f32 %v5803_v29, %v5803_v29 }
 0x779   : > { %v4396_v8 = vpop.f32.mrf.mxu1 }
 0x77a   : > { %v2538_v3 = vadd.f32 %v2536_v24, %v2534_v56  ;;  %v2724_v24 = vld [vmem:[%s4903_s21 + $0x18] sm:$0xff]  ;;  %v2722_v56 = vld [vmem:[%s4903_s21 + $0x8] sm:$0xff] }
 0x77b   : > { %v5810_v40 = vpop.f32.mrf.mxu1 }
 0x77c   : > { %v2539_v5 = vmul.f32 %v5810_v40, %v5810_v40  ;;  %2583 = vrot.lane.b32.xlu0 %v5810_v40, %s4692_s5 }
 0x77d   : > { %v4399_v43 = vpop.f32.mrf.mxu1 }
 0x77e   : > { %v2541_v6 = vadd.f32 %v2539_v5, %v2537_v47  ;;  %v2723_v47 = vld [vmem:[%s4903_s21 + $0x10] sm:$0xff]  ;;  %v2721_v43 = vld [vmem:[%s4903_s21] sm:$0xff] }
 0x77f   : > { %v5821_v39 = vpop.f32.mrf.mxu1  ;;  %v2727_v5 = vpack.c.bf16 %v2724_v24, %v2723_v47 }
 0x780   : > { %v2543_v46 = vadd.f32 1e-08, %v2541_v6  ;;  %v2540_v1 = vmul.f32 %v5821_v39, %v5821_v39  ;;  %v2726_v6 = vpack.c.bf16 %v2722_v56, %v2721_v43 }
 0x781   : > { %v4400_v7 = vpop.f32.mrf.mxu1 }
 0x782   : > { %4613 = vrsqrt.f32 %v2543_v46  ;;  %v2542_v14 = vadd.f32 %v2540_v1, %v2538_v3  ;;  %vm2547_vm12 = vcmp.eq.f32.partialorder %v2543_v46, inf  ;;  %v2550_v37 = vand.u32 2147483648, %v2543_v46 }
 0x783   : > { %vm2549_vm14 = vcmp.eq.f32.partialorder %v2543_v46, 0.0 }
 0x784   : > { %v2544_v63 = vadd.f32 1e-08, %v2542_v14 }
 0x786   : > { %4615 = vrsqrt.f32 %v2544_v63  ;;  %vm2554_vm13 = vcmp.eq.f32.partialorder %v2544_v63, inf  ;;  %v2557_v2 = vand.u32 2147483648, %v2544_v63  ;;  %vm2556_vm15 = vcmp.eq.f32.partialorder %v2544_v63, 0.0 }
 0x78f   : > { %v4614_v50 = vpop.eup %4613 }
 0x790   : > { %v2546_v13 = vmul.f32 %v4614_v50, %v2543_v46 }
 0x792   : > { %v2548_v20 = vsel %vm2547_vm12, %v2543_v46, %v2546_v13 }
 0x793   : > { %v4616_v58 = vpop.eup %4615  ;;  %v2551_v48 = vsel %vm2549_vm14, %v2550_v37, %v2548_v20 }
 0x794   : > { %v2553_v15 = vmul.f32 %v4616_v58, %v2544_v63 }
 0x796   : > { %v2555_v27 = vsel %vm2554_vm13, %v2544_v63, %v2553_v15  ;;  %v4116_v63 = vld [vmem:[%s980_s25] ss:$0 sm:$0xff]  ;;  %s6377_s25 = sld [smem:[#allocation24_spill]] (!%p4121_p5) }
 0x797   : > { %v2558_v9 = vsel %vm2556_vm15, %v2557_v2, %v2555_v27 }
 0x798   : > { %v2604_v35 = vpack.c.bf16 %v2558_v9, %v2551_v48 }
 0x79a   : > { %2608 = vrot.lane.b32.xlu1 %v2604_v35, %s4692_s5 }
 0x79e   : > { %2563 = vrot.lane.b32.xlu1 %v5793_v12, %s4692_s5 }
 0x7a2   : > { %2573 = vrot.lane.b32.xlu1 %v5803_v29, %s4692_s5 }
 0x7a6   : > { %2585 = vrot.lane.b32.xlu1 %v5821_v39, %s4692_s5 }
 0x7e6   : > { %v2572_v16 = vpop.permute.xlu0 %2571 }
 0x7e7   : > { %v2577_v11 = vmul.f32 %v2572_v16, %v5795_v34 }
 0x7e9   : > { %v2579_v53 = vadd.f32 %v2577_v11, %v2567_v18 }
 0x7ee   : > { %v2584_v45 = vpop.permute.xlu0 %2583 }
 0x7ef   : > { %v2589_v52 = vmul.f32 %v2584_v45, %v5810_v40 }
 0x7f1   : > { %v2591_v25 = vadd.f32 %v2589_v52, %v2579_v53  ;;  %v4119_v52 = vld [vmem:[%s988_s0] ss:$0 sm:$0xff]  ;;  %s6380_s0 = sld [smem:[#allocation15_spill]] (!%p4121_p5) }
 0x7f3   : > { %2791 = vrot.lane.b32.xlu0 %v2591_v25, %s4689_s12 }
 0x80c   : > { %v2609_v49 = vpop.permute.xlu1 %2608 }
 0x80d   : > { %4406 = vmatmul.mubr.msk.bf16.vlgmr.msra.gmra.mxu0 %vm1100_vm5, %v2609_v49 }
 0x80e   : > { %4410 = vmatpush3.bf16.msra.mxu0 %v2603_v60  ;;  %4413 = vmatprep.mubr.msk.bf16.mxu0 %vm4688_vm4, %v6373_v0 }
 0x80f   : > { %4411 = vmatprep.subr.bf16.mxu0 %v6373_v0 }
 0x810   : > { %v2564_v57 = vpop.permute.xlu1 %2563 }
 0x811   : > { %v2568_v23 = vmul.f32 %v2564_v57, %v5793_v12 }
 0x812   : > { %4412 = vmatpush3.bf16.msra.mxu0 %v2602_v38 }
 0x813   : > { %4417 = vmatprep.subr.bf16.mxu0 %v6373_v0 }
 0x814   : > { %v2574_v54 = vpop.permute.xlu1 %2573 }
 0x815   : > { %v2578_v4 = vmul.f32 %v2574_v54, %v5803_v29  ;;  %4414 = vmatmul.mubr.msk.bf16.vlgmr.msra.gmra.mxu0 %vm1100_vm5, %v2601_v42 }
 0x816   : > { %4421 = vmatprep.mubr.msk.bf16.mxu0 %vm4688_vm4, %v6373_v0  ;;  %4418 = vmatpush3.bf16.msra.mxu0 %v2727_v5 }
 0x817   : > { %v2580_v62 = vadd.f32 %v2578_v4, %v2568_v23  ;;  %4419 = vmatprep.subr.bf16.mxu0 %v6373_v0 }
 0x818   : > { %v2586_v33 = vpop.permute.xlu1 %2585 }
 0x819   : > { %v2590_v8 = vmul.f32 %v2586_v33, %v5821_v39 }
 0x81a   : > { %4420 = vmatpush3.bf16.msra.mxu0 %v2726_v6 }
 0x81b   : > { %v2592_v32 = vadd.f32 %v2590_v8, %v2580_v62 }
 0x81d   : > { %2793 = vrot.lane.b32.xlu1 %v2592_v32, %s4689_s12 }
 0x865   : > { %v2792_v60 = vpop.permute.xlu0 %2791 }
 0x8cd   : > { %v2647_v3 = vpop.f32.mrf.mxu0 }
 0x8cf   : > { %v4407_v46 = vpop.f32.mrf.mxu0 }
 0x8d1   : > { %v2650_v1 = vpop.f32.mrf.mxu0 }
 0x8d3   : > { %v4408_v7 = vpop.f32.mrf.mxu0 }
 0x8d5   : > { %v2691_v14 = vpop.f32.mrf.mxu0 }
 0x8d6   : > { %v2692_v50 = vadd.f32 %v2691_v14, %v2647_v3 }
 0x8d7   : > { %v4415_v13 = vpop.f32.mrf.mxu0 }
 0x8d8   : > { %v2705_v58 = vadd.f32 %v4116_v63, %v2692_v50 }
 0x8d9   : > { %v2694_v20 = vpop.f32.mrf.mxu0 }
 0x8da   : > { %v4117_v15 = vmul.f32 -1.442695, %v2705_v58  ;;  %v2695_v0 = vadd.f32 %v2694_v20, %v2650_v1 }
 0x8db   : > { %v4416_v37 = vpop.f32.mrf.mxu0 }
 0x8dc   : > { %4617 = vpow2.f32 %v4117_v15  ;;  %v2706_v2 = vadd.f32 %v4116_v63, %v2695_v0 }
 0x8de   : > { %v4118_v27 = vmul.f32 -1.442695, %v2706_v2 }
 0x8e0   : > { %4619 = vpow2.f32 %v4118_v27 }
 0x8e9   : > { %v4618_v48 = vpop.eup %4617 }
 0x8ea   : > { %v2713_v9 = vadd.f32 1.0, %v4618_v48 }
 0x8ec   : > { %4621 = vrcp.f32 %v2713_v9 }
 0x8ed   : > { %v4620_v35 = vpop.eup %4619 }
 0x8ee   : > { %v2714_v22 = vadd.f32 1.0, %v4620_v35 }
 0x8f0   : > { %4623 = vrcp.f32 %v2714_v22 }
 0x8f9   : > { %v4622_v16 = vpop.eup %4621 }
 0x8fa   : > { %v2719_v18 = vmul.f32 %v4622_v16, %v2705_v58 }
 0x8fd   : > { %v4624_v11 = vpop.eup %4623 }
 0x8fe   : > { %v2720_v45 = vmul.f32 %v4624_v11, %v2706_v2 }
 0x900   : > { %v2725_v53 = vpack.c.bf16 %v2720_v45, %v2719_v18 }
 0x902   : > { %4422 = vmatmul.mubr.msk.bf16.vlgmr.msra.gmra.mxu0 %vm1100_vm5, %v2725_v53 }
 0x9c2   : > { %v2772_v25 = vpop.f32.mrf.mxu0 }
 0x9c3   : > { %v2773_v41 = vadd.f32 %v4119_v52, %v2772_v25 }
 0x9c4   : > { %v4423_v10 = vpop.f32.mrf.mxu0 }
 0x9c5   : > { %v2811_v26 = vmul.f32 %v2773_v41, %v5789_v61  ;;  %v2813_v19 = vmul.f32 %v2773_v41, %v5795_v34  ;;  %v2815_v49 = vmul.f32 %v2773_v41, %v5810_v40  ;;  %2781 = vrot.lane.b32.xlu0 %v2773_v41, %s4694_s28  ;;  %v2797_v51 = vmul.f32 %v2792_v60, %v2773_v41 }
 0x9c6   : > { %v2775_v38 = vpop.f32.mrf.mxu0 }
 0x9c7   : > { %v2817_v57 = vadd.f32 %v2811_v26, %v5763_v59  ;;  %v2819_v17 = vadd.f32 %v2813_v19, %v5775_v31  ;;  %v2821_v42 = vadd.f32 %v2815_v49, %v5782_v28  ;;  %v2776_v54 = vadd.f32 %v4119_v52, %v2775_v38  ;;  %v2794_v59 = vpop.permute.xlu1 %2793 }
 0x9c8   : > { %v4424_v4 = vpop.f32.mrf.mxu0 }
 0x9c9   : > { %2823 = vst.msk [vmem:[#allocation3] sm:$0xff] %vm1100_vm5, %v2817_v57  ;;  %2825 = vst.msk [vmem:[#allocation3 + $0x10] sm:$0xff] %vm1100_vm5, %v2819_v17  ;;  %v2812_v61 = vmul.f32 %v2776_v54, %v5793_v12  ;;  %v2814_v34 = vmul.f32 %v2776_v54, %v5803_v29  ;;  %v2816_v40 = vmul.f32 %v2776_v54, %v5821_v39  ;;  %2801 = vrot.lane.b32.xlu0 %v2797_v51, %s4692_s5 }
 0x9ca   : > { %2827 = vst.msk [vmem:[#allocation3 + $0x20] sm:$0xff] %vm1100_vm5, %v2821_v42  ;;  %2783 = vrot.lane.b32.xlu1 %v2776_v54, %s4694_s28  ;;  %v2798_v33 = vmul.f32 %v2794_v59, %v2776_v54 }
 0x9cb   : > { %v2818_v31 = vadd.f32 %v2812_v61, %v5761_v36  ;;  %v2820_v28 = vadd.f32 %v2814_v34, %v5773_v44  ;;  %v2822_v23 = vadd.f32 %v2816_v40, %v5784_v55 }
 0x9cd   : > { %2824 = vst.msk [vmem:[#allocation3 + $0x8] sm:$0xff] %vm1100_vm5, %v2818_v31  ;;  %2826 = vst.msk [vmem:[#allocation3 + $0x18] sm:$0xff] %vm1100_vm5, %v2820_v28 }
 0x9ce   : > { %2828 = vst.msk [vmem:[#allocation3 + $0x28] sm:$0xff] %vm1100_vm5, %v2822_v23  ;;  %2803 = vrot.lane.b32.xlu1 %v2798_v33, %s4692_s5  ;;  %s6376_s5 = sld [smem:[#allocation22_spill]] (!%p4121_p5) }
 0xa37   : > { %v2782_v12 = vpop.permute.xlu0 %2781 }
 0xa38   : > { %v2787_v29 = vadd.f32 %v2782_v12, %v5844_v21 }
 0xa3b   : > { %v2802_v39 = vpop.permute.xlu0 %2801 }
 0xa3c   : > { %v2784_v62 = vpop.permute.xlu1 %2783  ;;  %v2807_v8 = vadd.f32 %v2802_v39, %v2787_v29 }
 0xa3d   : > { %v2788_v36 = vadd.f32 %v2784_v62, %v5848_v30 }
 0xa3e   : > { %2809 = vst.msk [vmem:[#allocation2] sm:$0xff] %vm1100_vm5, %v2807_v8 }
 0xa3f   : > { %2832 = sbr.rel (%p4121_p5) target bundleno = 5557 (0x15b5), region = 140 }
 0xa40   : > { %v2804_v44 = vpop.permute.xlu1 %2803 }
 0xa41   : > { %v2808_v55 = vadd.f32 %v2804_v44, %v2788_v36 }
 0xa43   : > { %2810 = vst.msk [vmem:[#allocation2 + $0x8] sm:$0xff] %vm1100_vm5, %v2808_v55 }
 0xa44   : > { %v2843_v32 = vld [vmem:[%s6312_s19 + $0x10] sm:$0xff]  ;;  %v2844_v21 = vld [vmem:[%s6312_s19 + $0x18] sm:$0xff]  ;;  %v2841_v47 = vld [vmem:[%s6312_s19] sm:$0xff]  ;;  %v4695_v30 = vmov 0.0   ;;  %vm4696_vm0 = vmmov 0   ;;  %vm3938_vm15 = vcmask 1024  }
 0xa45   : > { %4425 = vmatprep.subr.bf16.mxu0 %v4695_v30  ;;  %v2849_v24 = vpack.c.bf16 %v2844_v21, %v2843_v32  ;;  %v2842_v5 = vld [vmem:[%s6312_s19 + $0x8] sm:$0xff]  ;;  %4429 = vmatprep.mubr.msk.bf16.mxu0 %vm4696_vm0, %v4695_v30  ;;  %v2835_v56 = vld [vmem:[#allocation3] sm:$0xff]  ;;  %v2836_v6 = vld [vmem:[#allocation3 + $0x8] sm:$0xff] }
 0xa46   : > { %4441 = vmatprep.subr.bf16.mxu1 %v4695_v30  ;;  %4445 = vmatprep.mubr.msk.bf16.mxu1 %vm4696_vm0, %v4695_v30  ;;  %v2848_v43 = vpack.c.bf16 %v2842_v5, %v2841_v47  ;;  %v2845_v3 = vpack.c.bf16 %v2836_v6, %v2835_v56  ;;  %v2837_v46 = vld [vmem:[#allocation3 + $0x10] sm:$0xff]  ;;  %v2838_v1 = vld [vmem:[#allocation3 + $0x18] sm:$0xff]  ;;  %v2839_v14 = vld [vmem:[#allocation3 + $0x20] sm:$0xff] }
 0xa47   : > { %4426 = vmatpush3.bf16.msra.mxu0 %v2849_v24  ;;  %v2846_v7 = vpack.c.bf16 %v2838_v1, %v2837_v46  ;;  %v2840_v63 = vld [vmem:[#allocation3 + $0x28] sm:$0xff]  ;;  %v2948_v13 = vld [vmem:[%s6313_s20 + $0x30] sm:$0xff]  ;;  %v2946_v20 = vld [vmem:[%s6313_s20 + $0x20] sm:$0xff] }
 0xa48   : > { %4427 = vmatprep.subr.bf16.mxu0 %v4695_v30  ;;  %v2847_v50 = vpack.c.bf16 %v2840_v63, %v2839_v14  ;;  %v2949_v58 = vld [vmem:[%s6313_s20 + $0x38] sm:$0xff]  ;;  %v2947_v0 = vld [vmem:[%s6313_s20 + $0x28] sm:$0xff]  ;;  %v2944_v59 = vld [vmem:[%s6313_s20 + $0x10] sm:$0xff] }
 0xa49   : > { %v2955_v15 = vpack.c.bf16 %v2949_v58, %v2948_v13  ;;  %v2954_v37 = vpack.c.bf16 %v2947_v0, %v2946_v20  ;;  %v2945_v31 = vld [vmem:[%s6313_s20 + $0x18] sm:$0xff]  ;;  %v2942_v8 = vld [vmem:[%s6313_s20] sm:$0xff]  ;;  %v2943_v36 = vld [vmem:[%s6313_s20 + $0x8] sm:$0xff] }
 0xa4a   : > { %v2952_v39 = vpack.c.bf16 %v2945_v31, %v2944_v59  ;;  %v2951_v44 = vpack.c.bf16 %v2943_v36, %v2942_v8  ;;  %v2833_v55 = vld [vmem:[#allocation2] sm:$0xff]  ;;  %v2834_v32 = vld [vmem:[#allocation2 + $0x8] sm:$0xff]  ;;  %v3069_v47 = vld [vmem:[%s6315_s22 + $0x10] sm:$0xff] }
 0xa4b   : > { %4428 = vmatpush3.bf16.msra.mxu0 %v2848_v43  ;;  %4442 = vmatpush3.bf16.msra.mxu1 %v2955_v15  ;;  %v2950_v21 = vpack.c.bf16 %v2834_v32, %v2833_v55  ;;  %v3070_v24 = vld [vmem:[%s6315_s22 + $0x18] sm:$0xff]  ;;  %v3067_v43 = vld [vmem:[%s6315_s22] sm:$0xff]  ;;  %v3068_v56 = vld [vmem:[%s6315_s22 + $0x8] sm:$0xff] }
 0xa4c   : > { %4465 = vmatprep.subr.bf16.mxu0 %v4695_v30  ;;  %4443 = vmatprep.subr.bf16.mxu1 %v4695_v30  ;;  %v3073_v5 = vpack.c.bf16 %v3070_v24, %v3069_v47  ;;  %v3072_v6 = vpack.c.bf16 %v3068_v56, %v3067_v43  ;;  %v4127_v63 = vld [vmem:[%s6374_s27] ss:$0 sm:$0xff]  ;;  %v4146_v8 = vld [vmem:[%s6313_s20 + $0x78] sm:$0xff]  ;;  %v4144_v55 = vld [vmem:[%s6313_s20 + $0x68] sm:$0xff] }
 0xa4d   : > { %v4143_v36 = vld [vmem:[%s6313_s20 + $0x60] sm:$0xff] }
 0xa4e   : > { %4430 = vmatmul.mubr.msk.bf16.vlgmr.msra.gmra.mxu0 %vm1100_vm5, %v2845_v3  ;;  %v3255_v32 = vpack.c.bf16 %v4144_v55, %v4143_v36 }
 0xa4f   : > { %4433 = vmatprep.mubr.msk.bf16.mxu0 %vm4696_vm0, %v4695_v30  ;;  %4444 = vmatpush3.bf16.msra.mxu1 %v2954_v37 }
 0xa50   : > { %4449 = vmatprep.subr.bf16.mxu1 %v4695_v30 }
 0xa56   : > { %4434 = vmatmul.mubr.msk.bf16.gmra.mxu0 %vm1100_vm5, %v2846_v7 }
 0xa57   : > { %4437 = vmatprep.mubr.msk.bf16.mxu0 %vm4696_vm0, %v4695_v30 }
 0xa5e   : > { %4438 = vmatmul.mubr.msk.bf16.gmra.mxu0 %vm1100_vm5, %v2847_v50 }
 0xa5f   : > { %4469 = vmatprep.mubr.msk.bf16.mxu0 %vm4696_vm0, %v4695_v30 }
 0xb0e   : > { %v5946_v2 = vpop.f32.mrf.mxu0 }
 0xb0f   : > { %v2916_v45 = vmul.f32 %v5946_v2, %v5946_v2 }
 0xb10   : > { %v4431_v27 = vpop.f32.mrf.mxu0 }
 0xb12   : > { %v5948_v48 = vpop.f32.mrf.mxu0 }
 0xb13   : > { %v2917_v60 = vmul.f32 %v5948_v48, %v5948_v48 }
 0xb14   : > { %v4432_v9 = vpop.f32.mrf.mxu0 }
 0xb16   : > { %v5950_v35 = vpop.f32.mrf.mxu0 }
 0xb17   : > { %v2918_v11 = vmul.f32 %v5950_v35, %v5950_v35 }
 0xb18   : > { %v4435_v22 = vpop.f32.mrf.mxu0 }
 0xb19   : > { %v2920_v52 = vadd.f32 %v2918_v11, %v2916_v45 }
 0xb1a   : > { %v5952_v16 = vpop.f32.mrf.mxu0 }
 0xb1b   : > { %v2919_v25 = vmul.f32 %v5952_v16, %v5952_v16 }
 0xb1c   : > { %v4436_v18 = vpop.f32.mrf.mxu0 }
 0xb1d   : > { %v2921_v49 = vadd.f32 %v2919_v25, %v2917_v60 }
 0xb1e   : > { %v5958_v53 = vpop.f32.mrf.mxu0 }
 0xb1f   : > { %v2922_v41 = vmul.f32 %v5958_v53, %v5958_v53 }
 0xb20   : > { %v4439_v10 = vpop.f32.mrf.mxu0 }
 0xb21   : > { %v2924_v26 = vadd.f32 %v2922_v41, %v2920_v52 }
 0xb22   : > { %v5966_v19 = vpop.f32.mrf.mxu0 }
 0xb23   : > { %v2926_v38 = vadd.f32 1e-08, %v2924_v26  ;;  %v2923_v51 = vmul.f32 %v5966_v19, %v5966_v19  ;;  %v4134_v26 = vld [vmem:[%s6312_s19 + $0x30] sm:$0xff] }
 0xb24   : > { %v4440_v57 = vpop.f32.mrf.mxu0 }
 0xb25   : > { %4633 = vrsqrt.f32 %v2926_v38  ;;  %v2925_v17 = vadd.f32 %v2923_v51, %v2921_v49  ;;  %vm2930_vm1 = vcmp.eq.f32.partialorder %v2926_v38, inf  ;;  %v2933_v28 = vand.u32 2147483648, %v2926_v38  ;;  %v4135_v49 = vld [vmem:[%s6312_s19 + $0x38] sm:$0xff]  ;;  %v4133_v57 = vld [vmem:[%s6312_s19 + $0x28] sm:$0xff] }
 0xb26   : > { %vm2932_vm3 = vcmp.eq.f32.partialorder %v2926_v38, 0.0  ;;  %v3140_v51 = vpack.c.bf16 %v4135_v49, %v4134_v26 }
 0xb27   : > { %v2927_v42 = vadd.f32 1e-08, %v2925_v17 }
 0xb28   : > { %4466 = vmatpush3.bf16.msra.mxu0 %v3140_v51 }
 0xb29   : > { %4635 = vrsqrt.f32 %v2927_v42  ;;  %vm2937_vm2 = vcmp.eq.f32.partialorder %v2927_v42, inf  ;;  %v2940_v23 = vand.u32 2147483648, %v2927_v42  ;;  %vm2939_vm4 = vcmp.eq.f32.partialorder %v2927_v42, 0.0  ;;  %4467 = vmatprep.subr.bf16.mxu0 %v4695_v30 }
 0xb32   : > { %v4634_v54 = vpop.eup %4633 }
 0xb33   : > { %v2929_v4 = vmul.f32 %v4634_v54, %v2926_v38 }
 0xb35   : > { %v2931_v34 = vsel %vm2930_vm1, %v2926_v38, %v2929_v4  ;;  %v4132_v38 = vld [vmem:[%s6312_s19 + $0x20] sm:$0xff] }
 0xb36   : > { %v4636_v61 = vpop.eup %4635  ;;  %v2934_v12 = vsel %vm2932_vm3, %v2933_v28, %v2931_v34  ;;  %v3139_v17 = vpack.c.bf16 %v4133_v57, %v4132_v38 }
 0xb37   : > { %v2936_v40 = vmul.f32 %v4636_v61, %v2927_v42 }
 0xb38   : > { %4468 = vmatpush3.bf16.msra.mxu0 %v3139_v17 }
 0xb39   : > { %v2938_v33 = vsel %vm2937_vm2, %v2927_v42, %v2936_v40  ;;  %4505 = vmatprep.subr.bf16.mxu0 %v4695_v30  ;;  %v4130_v42 = vld [vmem:[%s6375_s24] ss:$0 sm:$0xff] }
 0xb3a   : > { %v2941_v29 = vsel %vm2939_vm4, %v2940_v23, %v2938_v33 }
 0xb3b   : > { %v2953_v62 = vpack.c.bf16 %v2941_v29, %v2934_v12 }
 0xb3d   : > { %4446 = vmatmul.mubr.msk.bf16.vlgmr.msra.gmra.mxu1 %vm1100_vm5, %v2953_v62 }
 0xb3e   : > { %4450 = vmatpush3.bf16.msra.mxu1 %v2952_v39  ;;  %4453 = vmatprep.mubr.msk.bf16.mxu1 %vm4696_vm0, %v4695_v30 }
 0xb3f   : > { %4451 = vmatprep.subr.bf16.mxu1 %v4695_v30 }
 0xb42   : > { %4452 = vmatpush3.bf16.msra.mxu1 %v2951_v44 }
 0xb43   : > { %4457 = vmatprep.subr.bf16.mxu1 %v4695_v30 }
 0xb45   : > { %4454 = vmatmul.mubr.msk.bf16.vlgmr.msra.gmra.mxu1 %vm1100_vm5, %v2950_v21 }
 0xb46   : > { %4461 = vmatprep.mubr.msk.bf16.mxu1 %vm4696_vm0, %v4695_v30  ;;  %4458 = vmatpush3.bf16.msra.mxu1 %v3073_v5 }
 0xb47   : > { %4459 = vmatprep.subr.bf16.mxu1 %v4695_v30 }
 0xb4a   : > { %4460 = vmatpush3.bf16.msra.mxu1 %v3072_v6 }
 0xb4b   : > { %4481 = vmatprep.subr.bf16.mxu1 %v4695_v30 }
 0xbfd   : > { %v2993_v3 = vpop.f32.mrf.mxu1 }
 0xbff   : > { %v4447_v46 = vpop.f32.mrf.mxu1 }
 0xc01   : > { %v2996_v1 = vpop.f32.mrf.mxu1 }
 0xc03   : > { %v4448_v7 = vpop.f32.mrf.mxu1 }
 0xc05   : > { %v3037_v14 = vpop.f32.mrf.mxu1 }
 0xc06   : > { %v3038_v50 = vadd.f32 %v3037_v14, %v2993_v3 }
 0xc07   : > { %v4455_v13 = vpop.f32.mrf.mxu1 }
 0xc08   : > { %v3051_v58 = vadd.f32 %v4127_v63, %v3038_v50 }
 0xc09   : > { %v3040_v20 = vpop.f32.mrf.mxu1 }
 0xc0a   : > { %v4128_v15 = vmul.f32 -1.442695, %v3051_v58  ;;  %v3041_v0 = vadd.f32 %v3040_v20, %v2996_v1 }
 0xc0b   : > { %v4456_v37 = vpop.f32.mrf.mxu1 }
 0xc0c   : > { %4637 = vpow2.f32 %v4128_v15  ;;  %v3052_v27 = vadd.f32 %v4127_v63, %v3041_v0 }
 0xc0e   : > { %v4129_v9 = vmul.f32 -1.442695, %v3052_v27 }
 0xc10   : > { %4639 = vpow2.f32 %v4129_v9 }
 0xc19   : > { %v4638_v22 = vpop.eup %4637 }
 0xc1a   : > { %v3059_v11 = vadd.f32 1.0, %v4638_v22 }
 0xc1c   : > { %4641 = vrcp.f32 %v3059_v11 }
 0xc1d   : > { %v4640_v18 = vpop.eup %4639 }
 0xc1e   : > { %v3060_v45 = vadd.f32 1.0, %v4640_v18 }
 0xc20   : > { %4643 = vrcp.f32 %v3060_v45 }
 0xc29   : > { %v4642_v52 = vpop.eup %4641 }
 0xc2a   : > { %v3065_v41 = vmul.f32 %v4642_v52, %v3051_v58 }
 0xc2d   : > { %v4644_v25 = vpop.eup %4643 }
 0xc2e   : > { %v3066_v10 = vmul.f32 %v4644_v25, %v3052_v27 }
 0xc30   : > { %v3071_v60 = vpack.c.bf16 %v3066_v10, %v3065_v41  ;;  %v4141_v10 = vld [vmem:[%s6313_s20 + $0x50] sm:$0xff] }
 0xc32   : > { %4462 = vmatmul.mubr.msk.bf16.vlgmr.msra.gmra.mxu1 %vm1100_vm5, %v3071_v60  ;;  %v4142_v60 = vld [vmem:[%s6313_s20 + $0x58] sm:$0xff] }
 0xc33   : > { %4485 = vmatprep.mubr.msk.bf16.mxu1 %vm4696_vm0, %v4695_v30  ;;  %v3253_v17 = vpack.c.bf16 %v4142_v60, %v4141_v10 }
 0xcf2   : > { %v3118_v54 = vpop.f32.mrf.mxu1 }
 0xcf3   : > { %v6027_v4 = vadd.f32 %v4130_v42, %v3118_v54  ;;  %v4139_v54 = vld [vmem:[%s6313_s20 + $0x40] sm:$0xff] }
 0xcf4   : > { %v4463_v61 = vpop.f32.mrf.mxu1 }
 0xcf5   : > { %v3129_v31 = vmul.f32 %v6027_v4, %v5958_v53  ;;  %v3125_v23 = vmul.f32 %v6027_v4, %v5946_v2  ;;  %v3127_v53 = vmul.f32 %v6027_v4, %v5950_v35  ;;  %v4145_v35 = vld [vmem:[%s6313_s20 + $0x70] sm:$0xff]  ;;  %v4140_v61 = vld [vmem:[%s6313_s20 + $0x48] sm:$0xff] }
 0xcf6   : > { %v3121_v34 = vpop.f32.mrf.mxu1  ;;  %v3256_v44 = vpack.c.bf16 %v4146_v8, %v4145_v35 }
 0xcf7   : > { %v6029_v40 = vadd.f32 %v4130_v42, %v3121_v34  ;;  %v3252_v34 = vpack.c.bf16 %v4140_v61, %v4139_v54  ;;  %v4172_v54 = vld [vmem:[%s6313_s20 + $0xa8] sm:$0xff] }
 0xcf8   : > { %v4464_v59 = vpop.f32.mrf.mxu1  ;;  %4482 = vmatpush3.bf16.msra.mxu1 %v3256_v44 }
 0xcf9   : > { %v3130_v28 = vmul.f32 %v6029_v40, %v5966_v19  ;;  %v3126_v33 = vmul.f32 %v6029_v40, %v5948_v48  ;;  %v3251_v12 = vpack.c.bf16 %v6029_v40, %v6027_v4  ;;  %v3128_v62 = vmul.f32 %v6029_v40, %v5952_v16  ;;  %4483 = vmatprep.subr.bf16.mxu1 %v4695_v30  ;;  %v4155_v59 = vld [vmem:[%s6315_s22 + $0x30] sm:$0xff]  ;;  %v4153_v4 = vld [vmem:[%s6315_s22 + $0x20] sm:$0xff]  ;;  %v4154_v40 = vld [vmem:[%s6315_s22 + $0x28] sm:$0xff] }
 0xcfb   : > { %v3138_v29 = vpack.c.bf16 %v3130_v28, %v3129_v31  ;;  %v3136_v39 = vpack.c.bf16 %v3126_v33, %v3125_v23  ;;  %v3137_v2 = vpack.c.bf16 %v3128_v62, %v3127_v53  ;;  %v4156_v31 = vld [vmem:[%s6315_s22 + $0x38] sm:$0xff]  ;;  %v3375_v23 = vpack.c.bf16 %v4154_v40, %v4153_v4  ;;  %v4150_v53 = vld [vmem:[%s6374_s27 + $0x1] ss:$0 sm:$0xff] }
 0xcfc   : > { %4484 = vmatpush3.bf16.msra.mxu1 %v3255_v32  ;;  %v3376_v28 = vpack.c.bf16 %v4156_v31, %v4155_v59 }
 0xcfd   : > { %3148 = vrot.lane.b32.xlu1 %v3138_v29, %s4697_s10  ;;  %3144 = vrot.lane.b32.xlu0 %v3136_v39, %s4697_s10 }
 0xcfe   : > { %4489 = vmatprep.subr.bf16.mxu1 %v4695_v30 }
 0xd01   : > { %3146 = vrot.lane.b32.xlu0 %v3137_v2, %s4697_s10 }
 0xd6f   : > { %v3145_v48 = vpop.permute.xlu0 %3144  ;;  %v3149_v16 = vpop.permute.xlu1 %3148 }
 0xd70   : > { %4470 = vmatmul.mubr.msk.bf16.vlgmr.msra.gmra.mxu0 %vm1100_vm5, %v3145_v48 }
 0xd71   : > { %4473 = vmatprep.mubr.msk.bf16.mxu0 %vm4696_vm0, %v4695_v30 }
 0xd73   : > { %v3147_v19 = vpop.permute.xlu0 %3146 }
 0xd78   : > { %4474 = vmatmul.mubr.msk.bf16.gmra.mxu0 %vm1100_vm5, %v3147_v19 }
 0xd79   : > { %4477 = vmatprep.mubr.msk.bf16.mxu0 %vm4696_vm0, %v4695_v30 }
 0xd80   : > { %4478 = vmatmul.mubr.msk.bf16.gmra.mxu0 %vm1100_vm5, %v3149_v16 }
 0xd81   : > { %4509 = vmatprep.mubr.msk.bf16.mxu0 %vm4696_vm0, %v4695_v30 }
 0xe30   : > { %v6071_v21 = vpop.f32.mrf.mxu0 }
 0xe31   : > { %v3216_v1 = vmul.f32 %v6071_v21, %v6071_v21 }
 0xe32   : > { %v4471_v47 = vpop.f32.mrf.mxu0 }
 0xe34   : > { %v6073_v24 = vpop.f32.mrf.mxu0 }
 0xe35   : > { %v3217_v58 = vmul.f32 %v6073_v24, %v6073_v24 }
 0xe36   : > { %v4472_v5 = vpop.f32.mrf.mxu0 }
 0xe38   : > { %v6075_v43 = vpop.f32.mrf.mxu0 }
 0xe39   : > { %v3218_v3 = vmul.f32 %v6075_v43, %v6075_v43 }
 0xe3a   : > { %v4475_v56 = vpop.f32.mrf.mxu0 }
 0xe3b   : > { %v3220_v14 = vadd.f32 %v3218_v3, %v3216_v1 }
 0xe3c   : > { %v6077_v6 = vpop.f32.mrf.mxu0 }
 0xe3d   : > { %v3219_v63 = vmul.f32 %v6077_v6, %v6077_v6 }
 0xe3e   : > { %v4476_v46 = vpop.f32.mrf.mxu0 }
 0xe3f   : > { %v3221_v0 = vadd.f32 %v3219_v63, %v3217_v58  ;;  %v4160_v58 = vld [vmem:[%s6312_s19 + $0x40] sm:$0xff] }
 0xe40   : > { %v6083_v7 = vpop.f32.mrf.mxu0 }
 0xe41   : > { %v3222_v50 = vmul.f32 %v6083_v7, %v6083_v7 }
 0xe42   : > { %v4479_v13 = vpop.f32.mrf.mxu0 }
 0xe43   : > { %v3224_v20 = vadd.f32 %v3222_v50, %v3220_v14  ;;  %v4162_v50 = vld [vmem:[%s6312_s19 + $0x50] sm:$0xff]  ;;  %v4163_v13 = vld [vmem:[%s6312_s19 + $0x58] sm:$0xff] }
 0xe44   : > { %v6091_v15 = vpop.f32.mrf.mxu0 }
 0xe45   : > { %v3226_v37 = vadd.f32 1e-08, %v3224_v20  ;;  %v3223_v27 = vmul.f32 %v6091_v15, %v6091_v15  ;;  %v3444_v20 = vpack.c.bf16 %v4163_v13, %v4162_v50 }
 0xe46   : > { %v4480_v9 = vpop.f32.mrf.mxu0 }
 0xe47   : > { %4645 = vrsqrt.f32 %v3226_v37  ;;  %v3225_v22 = vadd.f32 %v3223_v27, %v3221_v0  ;;  %vm3230_vm6 = vcmp.eq.f32.partialorder %v3226_v37, inf  ;;  %v3233_v26 = vand.u32 2147483648, %v3226_v37  ;;  %v4161_v0 = vld [vmem:[%s6312_s19 + $0x48] sm:$0xff]  ;;  %4506 = vmatpush3.bf16.msra.mxu0 %v3444_v20  ;;  %v4158_v27 = vld [vmem:[%s6375_s24 + $0x1] ss:$0 sm:$0xff] }
 0xe48   : > { %vm3232_vm8 = vcmp.eq.f32.partialorder %v3226_v37, 0.0  ;;  %4507 = vmatprep.subr.bf16.mxu0 %v4695_v30 }
 0xe49   : > { %v3227_v11 = vadd.f32 1e-08, %v3225_v22 }
 0xe4b   : > { %4647 = vrsqrt.f32 %v3227_v11  ;;  %vm3237_vm7 = vcmp.eq.f32.partialorder %v3227_v11, inf  ;;  %v3240_v49 = vand.u32 2147483648, %v3227_v11  ;;  %vm3239_vm10 = vcmp.eq.f32.partialorder %v3227_v11, 0.0 }
 0xe54   : > { %v4646_v18 = vpop.eup %4645 }
 0xe55   : > { %v3229_v45 = vmul.f32 %v4646_v18, %v3226_v37 }
 0xe57   : > { %v3231_v25 = vsel %vm3230_vm6, %v3226_v37, %v3229_v45  ;;  %v3443_v37 = vpack.c.bf16 %v4161_v0, %v4160_v58 }
 0xe58   : > { %v4648_v52 = vpop.eup %4647  ;;  %v3234_v51 = vsel %vm3232_vm8, %v3233_v26, %v3231_v25 }
 0xe59   : > { %v3236_v41 = vmul.f32 %v4648_v52, %v3227_v11  ;;  %4508 = vmatpush3.bf16.msra.mxu0 %v3443_v37 }
 0xe5a   : > { %4560 = vmatprep.subr.bf16.mxu0 %v4695_v30 }
 0xe5b   : > { %v3238_v38 = vsel %vm3237_vm7, %v3227_v11, %v3236_v41 }
 0xe5c   : > { %v3241_v57 = vsel %vm3239_vm10, %v3240_v49, %v3238_v38 }
 0xe5d   : > { %v3254_v42 = vpack.c.bf16 %v3241_v57, %v3234_v51  ;;  %v4174_v57 = vld [vmem:[%s6313_s20 + $0xb8] sm:$0xff] }
 0xe5f   : > { %4486 = vmatmul.mubr.msk.bf16.vlgmr.msra.gmra.mxu1 %vm1100_vm5, %v3254_v42 }
 0xe60   : > { %4490 = vmatpush3.bf16.msra.mxu1 %v3253_v17  ;;  %4493 = vmatprep.mubr.msk.bf16.mxu1 %vm4696_vm0, %v4695_v30  ;;  %v4171_v17 = vld [vmem:[%s6313_s20 + $0xa0] sm:$0xff] }
 0xe61   : > { %4491 = vmatprep.subr.bf16.mxu1 %v4695_v30  ;;  %v3559_v61 = vpack.c.bf16 %v4172_v54, %v4171_v17 }
 0xe64   : > { %4492 = vmatpush3.bf16.msra.mxu1 %v3252_v34 }
 0xe65   : > { %4497 = vmatprep.subr.bf16.mxu1 %v4695_v30 }
 0xe67   : > { %4494 = vmatmul.mubr.msk.bf16.vlgmr.msra.gmra.mxu1 %vm1100_vm5, %v3251_v12 }
 0xe68   : > { %4501 = vmatprep.mubr.msk.bf16.mxu1 %vm4696_vm0, %v4695_v30  ;;  %4498 = vmatpush3.bf16.msra.mxu1 %v3376_v28 }
 0xe69   : > { %4499 = vmatprep.subr.bf16.mxu1 %v4695_v30 }
 0xe6c   : > { %4500 = vmatpush3.bf16.msra.mxu1 %v3375_v23 }
 0xe6d   : > { %4521 = vmatprep.subr.bf16.mxu1 %v4695_v30 }
 0xf1f   : > { %v3294_v33 = vpop.f32.mrf.mxu1 }
 0xf21   : > { %v4487_v12 = vpop.f32.mrf.mxu1 }
 0xf23   : > { %v3297_v29 = vpop.f32.mrf.mxu1 }
 0xf25   : > { %v4488_v39 = vpop.f32.mrf.mxu1 }
 0xf27   : > { %v3338_v62 = vpop.f32.mrf.mxu1 }
 0xf28   : > { %v3339_v2 = vadd.f32 %v3338_v62, %v3294_v33 }
 0xf29   : > { %v4495_v48 = vpop.f32.mrf.mxu1 }
 0xf2a   : > { %v3353_v19 = vadd.f32 %v4150_v53, %v3339_v2 }
 0xf2b   : > { %v3341_v16 = vpop.f32.mrf.mxu1 }
 0xf2c   : > { %v4151_v35 = vmul.f32 -1.442695, %v3353_v19  ;;  %v3342_v8 = vadd.f32 %v3341_v16, %v3297_v29 }
 0xf2d   : > { %v4496_v36 = vpop.f32.mrf.mxu1 }
 0xf2e   : > { %4649 = vpow2.f32 %v4151_v35  ;;  %v3354_v44 = vadd.f32 %v4150_v53, %v3342_v8 }
 0xf30   : > { %v4152_v55 = vmul.f32 -1.442695, %v3354_v44 }
 0xf32   : > { %4651 = vpow2.f32 %v4152_v55 }
 0xf3b   : > { %v4650_v32 = vpop.eup %4649 }
 0xf3c   : > { %v3361_v47 = vadd.f32 1.0, %v4650_v32 }
 0xf3e   : > { %4653 = vrcp.f32 %v3361_v47 }
 0xf3f   : > { %v4652_v5 = vpop.eup %4651 }
 0xf40   : > { %v3362_v56 = vadd.f32 1.0, %v4652_v5 }
 0xf42   : > { %4655 = vrcp.f32 %v3362_v56 }
 0xf4b   : > { %v4654_v3 = vpop.eup %4653 }
 0xf4c   : > { %v3367_v1 = vmul.f32 %v4654_v3, %v3353_v19 }
 0xf4f   : > { %v4656_v46 = vpop.eup %4655 }
 0xf50   : > { %v3368_v14 = vmul.f32 %v4656_v46, %v3354_v44 }
 0xf52   : > { %v3374_v63 = vpack.c.bf16 %v3368_v14, %v3367_v1  ;;  %v4169_v14 = vld [vmem:[%s6313_s20 + $0x90] sm:$0xff] }
 0xf54   : > { %4502 = vmatmul.mubr.msk.bf16.vlgmr.msra.gmra.mxu1 %vm1100_vm5, %v3374_v63  ;;  %v4170_v63 = vld [vmem:[%s6313_s20 + $0x98] sm:$0xff] }
 0xf55   : > { %4525 = vmatprep.mubr.msk.bf16.mxu1 %vm4696_vm0, %v4695_v30  ;;  %v3557_v37 = vpack.c.bf16 %v4170_v63, %v4169_v14 }
0x1014   : > { %v3422_v9 = vpop.f32.mrf.mxu1 }
0x1015   : > { %v6155_v22 = vadd.f32 %v4158_v27, %v3422_v9  ;;  %v4167_v9 = vld [vmem:[%s6313_s20 + $0x80] sm:$0xff] }
0x1016   : > { %v4503_v11 = vpop.f32.mrf.mxu1 }
0x1017   : > { %v3431_v25 = vmul.f32 %v6155_v22, %v6075_v43  ;;  %v3429_v10 = vmul.f32 %v6155_v22, %v6071_v21  ;;  %v3433_v43 = vmul.f32 %v6155_v22, %v6083_v7  ;;  %v4173_v7 = vld [vmem:[%s6313_s20 + $0xb0] sm:$0xff]  ;;  %v4168_v11 = vld [vmem:[%s6313_s20 + $0x88] sm:$0xff] }
0x1018   : > { %v3425_v18 = vpop.f32.mrf.mxu1  ;;  %v3560_v42 = vpack.c.bf16 %v4174_v57, %v4173_v7 }
0x1019   : > { %v6157_v45 = vadd.f32 %v4158_v27, %v3425_v18  ;;  %v3556_v18 = vpack.c.bf16 %v4168_v11, %v4167_v9 }
0x101a   : > { %v4504_v52 = vpop.f32.mrf.mxu1  ;;  %4522 = vmatpush3.bf16.msra.mxu1 %v3560_v42 }
0x101b   : > { %v3432_v41 = vmul.f32 %v6157_v45, %v6077_v6  ;;  %v3430_v60 = vmul.f32 %v6157_v45, %v6073_v24  ;;  %v3555_v26 = vpack.c.bf16 %v6157_v45, %v6155_v22  ;;  %v3434_v51 = vmul.f32 %v6157_v45, %v6091_v15  ;;  %4523 = vmatprep.subr.bf16.mxu1 %v4695_v30  ;;  %v4183_v52 = vld [vmem:[%s6315_s22 + $0x50] sm:$0xff]  ;;  %v4181_v22 = vld [vmem:[%s6315_s22 + $0x40] sm:$0xff]  ;;  %v4182_v45 = vld [vmem:[%s6315_s22 + $0x48] sm:$0xff] }
0x101d   : > { %v3441_v49 = vpack.c.bf16 %v3432_v41, %v3431_v25  ;;  %v3440_v38 = vpack.c.bf16 %v3430_v60, %v3429_v10  ;;  %v3442_v6 = vpack.c.bf16 %v3434_v51, %v3433_v43  ;;  %v4184_v25 = vld [vmem:[%s6315_s22 + $0x58] sm:$0xff]  ;;  %v3679_v10 = vpack.c.bf16 %v4182_v45, %v4181_v22  ;;  %v4178_v43 = vld [vmem:[%s6374_s27 + $0x2] ss:$0 sm:$0xff]  ;;  %v3805_v45 = vld [vmem:[%s6379_s6] sm:$0x3] }
0x101e   : > { %4524 = vmatpush3.bf16.msra.mxu1 %v3559_v61  ;;  %v3680_v41 = vpack.c.bf16 %v4184_v25, %v4183_v52 }
0x101f   : > { %3450 = vrot.lane.b32.xlu0 %v3441_v49, %s4697_s10  ;;  %3448 = vrot.lane.b32.xlu1 %v3440_v38, %s4697_s10 }
0x1020   : > { %4529 = vmatprep.subr.bf16.mxu1 %v4695_v30 }
0x1023   : > { %3452 = vrot.lane.b32.xlu1 %v3442_v6, %s4697_s10 }
0x1091   : > { %v3449_v21 = vpop.permute.xlu1 %3448  ;;  %v3451_v24 = vpop.permute.xlu0 %3450 }
0x1092   : > { %4510 = vmatmul.mubr.msk.bf16.vlgmr.msra.gmra.mxu0 %vm1100_vm5, %v3449_v21 }
0x1093   : > { %4513 = vmatprep.mubr.msk.bf16.mxu0 %vm4696_vm0, %v4695_v30 }
0x1095   : > { %v3453_v15 = vpop.permute.xlu1 %3452 }
0x109a   : > { %4514 = vmatmul.mubr.msk.bf16.gmra.mxu0 %vm1100_vm5, %v3451_v24 }
0x109b   : > { %4517 = vmatprep.mubr.msk.bf16.mxu0 %vm4696_vm0, %v4695_v30 }
0x10a2   : > { %4518 = vmatmul.mubr.msk.bf16.gmra.mxu0 %vm1100_vm5, %v3453_v15 }
0x10a3   : > { %4564 = vmatprep.mubr.msk.bf16.mxu0 %vm4696_vm0, %v4695_v30 }
0x1152   : > { %v3497_v34 = vpop.f32.mrf.mxu0 }
0x1153   : > { %v3520_v29 = vmul.f32 %v3497_v34, %v3497_v34 }
0x1154   : > { %v4511_v59 = vpop.f32.mrf.mxu0 }
0x1156   : > { %v3500_v31 = vpop.f32.mrf.mxu0 }
0x1157   : > { %v3521_v19 = vmul.f32 %v3500_v31, %v3500_v31 }
0x1158   : > { %v4512_v28 = vpop.f32.mrf.mxu0 }
0x115a   : > { %v3505_v4 = vpop.f32.mrf.mxu0 }
0x115b   : > { %v3522_v33 = vmul.f32 %v3505_v4, %v3505_v4 }
0x115c   : > { %v4515_v40 = vpop.f32.mrf.mxu0 }
0x115d   : > { %v3524_v62 = vadd.f32 %v3522_v33, %v3520_v29  ;;  %v3736_v29 = vld [vmem:[%s6376_s5 + $0x18] sm:$0xff] }
0x115e   : > { %v3508_v23 = vpop.f32.mrf.mxu0 }
0x115f   : > { %v3523_v53 = vmul.f32 %v3508_v23, %v3508_v23 }
0x1160   : > { %v4516_v12 = vpop.f32.mrf.mxu0 }
0x1161   : > { %v3525_v8 = vadd.f32 %v3523_v53, %v3521_v19  ;;  %v3735_v12 = vld [vmem:[%s6376_s5 + $0x10] sm:$0xff]  ;;  %v3734_v53 = vld [vmem:[%s6376_s5 + $0x8] sm:$0xff]  ;;  %v4186_v19 = vld [vmem:[%s6375_s24 + $0x2] ss:$0 sm:$0xff] }
0x1162   : > { %v3513_v39 = vpop.f32.mrf.mxu0 }
0x1163   : > { %v3526_v2 = vmul.f32 %v3513_v39, %v3513_v39  ;;  %v3739_v39 = vpack.c.bf16 %v3736_v29, %v3735_v12 }
0x1164   : > { %v4519_v48 = vpop.f32.mrf.mxu0 }
0x1165   : > { %v3528_v16 = vadd.f32 %v3526_v2, %v3524_v62  ;;  %v3733_v62 = vld [vmem:[%s6376_s5] sm:$0xff] }
0x1166   : > { %v3516_v35 = vpop.f32.mrf.mxu0  ;;  %v3738_v2 = vpack.c.bf16 %v3734_v53, %v3733_v62 }
0x1167   : > { %v3530_v36 = vadd.f32 1e-08, %v3528_v16  ;;  %v3527_v44 = vmul.f32 %v3516_v35, %v3516_v35 }
0x1168   : > { %v4520_v55 = vpop.f32.mrf.mxu0 }
0x1169   : > { %4657 = vrsqrt.f32 %v3530_v36  ;;  %v3529_v32 = vadd.f32 %v3527_v44, %v3525_v8  ;;  %vm3534_vm11 = vcmp.eq.f32.partialorder %v3530_v36, inf  ;;  %v3537_v50 = vand.u32 2147483648, %v3530_v36 }
0x116a   : > { %vm3536_vm13 = vcmp.eq.f32.partialorder %v3530_v36, 0.0 }
0x116b   : > { %v3531_v47 = vadd.f32 1e-08, %v3529_v32  ;;  %v3881_v32 = vld [vmem:[%s6377_s25 + $0x10] sm:$0xff] }
0x116d   : > { %4659 = vrsqrt.f32 %v3531_v47  ;;  %vm3541_vm12 = vcmp.eq.f32.partialorder %v3531_v47, inf  ;;  %v3544_v13 = vand.u32 2147483648, %v3531_v47  ;;  %vm3543_vm14 = vcmp.eq.f32.partialorder %v3531_v47, 0.0 }
0x1176   : > { %v4658_v5 = vpop.eup %4657 }
0x1177   : > { %v3533_v56 = vmul.f32 %v4658_v5, %v3530_v36  ;;  %v3879_v5 = vld [vmem:[%s6377_s25] sm:$0xff] }
0x1179   : > { %v3535_v46 = vsel %vm3534_vm11, %v3530_v36, %v3533_v56 }
0x117a   : > { %v4660_v3 = vpop.eup %4659  ;;  %v3538_v20 = vsel %vm3536_vm13, %v3537_v50, %v3535_v46 }
0x117b   : > { %v3540_v1 = vmul.f32 %v4660_v3, %v3531_v47  ;;  %v3880_v3 = vld [vmem:[%s6377_s25 + $0x8] sm:$0xff] }
0x117c   : > { %v3884_v46 = vpack.c.bf16 %v3880_v3, %v3879_v5 }
0x117d   : > { %v3542_v58 = vsel %vm3541_vm12, %v3531_v47, %v3540_v1  ;;  %v3882_v47 = vld [vmem:[%s6377_s25 + $0x18] sm:$0xff]  ;;  %v4188_v1 = vld [vmem:[%s6378_s30] ss:$0 sm:$0xff] }
0x117e   : > { %v3545_v0 = vsel %vm3543_vm14, %v3544_v13, %v3542_v58  ;;  %v3885_v56 = vpack.c.bf16 %v3882_v47, %v3881_v32 }
0x117f   : > { %v3558_v27 = vpack.c.bf16 %v3545_v0, %v3538_v20 }
0x1180   : > { %4561 = vmatpush3.bf16.msra.mxu0 %v3885_v56 }
0x1181   : > { %4526 = vmatmul.mubr.msk.bf16.vlgmr.msra.gmra.mxu1 %vm1100_vm5, %v3558_v27  ;;  %4562 = vmatprep.subr.bf16.mxu0 %v4695_v30 }
0x1182   : > { %4530 = vmatpush3.bf16.msra.mxu1 %v3557_v37  ;;  %4533 = vmatprep.mubr.msk.bf16.mxu1 %vm4696_vm0, %v4695_v30 }
0x1183   : > { %4531 = vmatprep.subr.bf16.mxu1 %v4695_v30 }
0x1184   : > { %4563 = vmatpush3.bf16.msra.mxu0 %v3884_v46 }
0x1186   : > { %4532 = vmatpush3.bf16.msra.mxu1 %v3556_v18 }
0x1187   : > { %4537 = vmatprep.subr.bf16.mxu1 %v4695_v30 }
0x1189   : > { %4534 = vmatmul.mubr.msk.bf16.vlgmr.msra.gmra.mxu1 %vm1100_vm5, %v3555_v26 }
0x118a   : > { %4541 = vmatprep.mubr.msk.bf16.mxu1 %vm4696_vm0, %v4695_v30  ;;  %4538 = vmatpush3.bf16.msra.mxu1 %v3680_v41 }
0x118b   : > { %4539 = vmatprep.subr.bf16.mxu1 %v4695_v30 }
0x118e   : > { %4540 = vmatpush3.bf16.msra.mxu1 %v3679_v10 }
0x118f   : > { %4545 = vmatprep.subr.bf16.mxu1 %v4695_v30 }
0x1241   : > { %v3598_v60 = vpop.f32.mrf.mxu1 }
0x1243   : > { %v4527_v26 = vpop.f32.mrf.mxu1 }
0x1245   : > { %v3601_v49 = vpop.f32.mrf.mxu1 }
0x1247   : > { %v4528_v38 = vpop.f32.mrf.mxu1 }
0x1248   : > { %v4193_v38 = vld [vmem:[#allocation4] ss:$0 sm:$0xff] }
0x1249   : > { %v3642_v51 = vpop.f32.mrf.mxu1 }
0x124a   : > { %v3643_v6 = vadd.f32 %v3642_v51, %v3598_v60 }
0x124b   : > { %v4535_v21 = vpop.f32.mrf.mxu1 }
0x124c   : > { %v3657_v24 = vadd.f32 %v4178_v43, %v3643_v6 }
0x124d   : > { %v3645_v15 = vpop.f32.mrf.mxu1 }
0x124e   : > { %v4179_v7 = vmul.f32 -1.442695, %v3657_v24  ;;  %v3646_v57 = vadd.f32 %v3645_v15, %v3601_v49  ;;  %v3886_v49 = vld [vmem:[%s6380_s0] sm:$0x3] }
0x124f   : > { %v4536_v17 = vpop.f32.mrf.mxu1  ;;  %v3894_v51 = vmul.f32 %v4193_v38, %v3886_v49 }
0x1250   : > { %4661 = vpow2.f32 %v4179_v7  ;;  %v3658_v42 = vadd.f32 %v4178_v43, %v3646_v57 }
0x1252   : > { %v4180_v54 = vmul.f32 -1.442695, %v3658_v42 }
0x1254   : > { %4663 = vpow2.f32 %v4180_v54 }
0x125d   : > { %v4662_v61 = vpop.eup %4661 }
0x125e   : > { %v3665_v34 = vadd.f32 1.0, %v4662_v61 }
0x1260   : > { %4665 = vrcp.f32 %v3665_v34 }
0x1261   : > { %v4664_v59 = vpop.eup %4663 }
0x1262   : > { %v3666_v31 = vadd.f32 1.0, %v4664_v59 }
0x1264   : > { %4667 = vrcp.f32 %v3666_v31 }
0x126d   : > { %v4666_v28 = vpop.eup %4665 }
0x126e   : > { %v3671_v40 = vmul.f32 %v4666_v28, %v3657_v24 }
0x1271   : > { %v4668_v4 = vpop.eup %4667 }
0x1272   : > { %v3672_v23 = vmul.f32 %v4668_v4, %v3658_v42 }
0x1274   : > { %v3678_v33 = vpack.c.bf16 %v3672_v23, %v3671_v40 }
0x1276   : > { %4542 = vmatmul.mubr.msk.bf16.vlgmr.msra.gmra.mxu1 %vm1100_vm5, %v3678_v33 }
0x1277   : > { %4549 = vmatprep.mubr.msk.bf16.mxu1 %vm4696_vm0, %v4695_v30  ;;  %4546 = vmatpush3.bf16.msra.mxu1 %v3739_v39 }
0x1278   : > { %4547 = vmatprep.subr.bf16.mxu1 %v4695_v30 }
0x127b   : > { %4548 = vmatpush3.bf16.msra.mxu1 %v3738_v2 }
0x127c   : > { %4553 = vmatprep.subr.mxu1 %v4695_v30 }
0x1336   : > { %v3726_v48 = vpop.f32.mrf.mxu1 }
0x1337   : > { %v3727_v8 = vadd.f32 %v4186_v19, %v3726_v48 }
0x1338   : > { %v4543_v16 = vpop.f32.mrf.mxu1 }
0x133a   : > { %v3729_v35 = vpop.f32.mrf.mxu1 }
0x133b   : > { %v3730_v36 = vadd.f32 %v4186_v19, %v3729_v35 }
0x133c   : > { %v4544_v44 = vpop.f32.mrf.mxu1 }
0x133d   : > { %v3737_v55 = vpack.c.bf16 %v3730_v36, %v3727_v8 }
0x133f   : > { %4550 = vmatmul.mubr.msk.bf16.vlgmr.msra.gmra.mxu1 %vm1100_vm5, %v3737_v55 }
0x1340   : > { %4557 = vmatprep.mubr.msk.f32.mxu1 %vm4696_vm0, %v4695_v30 }
0x13ff   : > { %v3784_v14 = vpop.f32.mrf.mxu1 }
0x1400   : > { %v3785_v63 = vadd.f32 %v4188_v1, %v3784_v14 }
0x1401   : > { %v4551_v50 = vpop.f32.mrf.mxu1 }
0x1402   : > { %v4190_v13 = vmul.f32 -1.442695, %v3785_v63 }
0x1403   : > { %v3787_v58 = vpop.f32.mrf.mxu1 }
0x1404   : > { %4669 = vpow2.f32 %v4190_v13  ;;  %v3788_v20 = vadd.f32 %v4188_v1, %v3787_v58 }
0x1405   : > { %v4552_v0 = vpop.f32.mrf.mxu1 }
0x1406   : > { %v4191_v37 = vmul.f32 -1.442695, %v3788_v20 }
0x1408   : > { %4671 = vpow2.f32 %v4191_v37 }
0x1411   : > { %v4670_v27 = vpop.eup %4669 }
0x1412   : > { %v3797_v9 = vadd.f32 1.0, %v4670_v27 }
0x1414   : > { %4673 = vrcp.f32 %v3797_v9 }
0x1415   : > { %v4672_v11 = vpop.eup %4671 }
0x1416   : > { %v3798_v18 = vadd.f32 1.0, %v4672_v11 }
0x1418   : > { %4675 = vrcp.f32 %v3798_v18 }
0x1421   : > { %v4674_v52 = vpop.eup %4673 }
0x1422   : > { %v3803_v22 = vmul.f32 %v4674_v52, %v3785_v63 }
0x1425   : > { %v4676_v25 = vpop.eup %4675 }
0x1426   : > { %v3804_v41 = vmul.f32 %v4676_v25, %v3788_v20 }
0x1428   : > { %4554 = vmatpush3.msra.mxu1 %v3804_v41 }
0x1429   : > { %4555 = vmatprep.subr.mxu1 %v4695_v30 }
0x142a   : > { %4556 = vmatpush3.msra.mxu1 %v3803_v22 }
0x142b   : > { %4558 = vmatmul.mubr.msk.f32.vlgmr.msra.gmra.mxu1 %vm1393_vm9, %v3805_v45 }
0x14eb   : > { %v3875_v10 = vpop.f32.mrf.mxu1 }
0x14ec   : > { %v3883_v60 = vpack.c.bf16 %v3875_v10, %v3875_v10 }
0x14ed   : > { %v4559_v26 = vpop.f32.mrf.mxu1 }
0x14ee   : > { %4565 = vmatmul.mubr.msk.bf16.vlgmr.msra.gmra.mxu0 %vm1100_vm5, %v3883_v60 }
0x15ae   : > { %v3932_v43 = vpop.f32.mrf.mxu0 }
0x15af   : > { %v3933_v6 = vadd.f32 %v3932_v43, %v3894_v51 }
0x15b0   : > { %v4566_v21 = vpop.f32.mrf.mxu0 }
0x15b1   : > { %3939 = vst.msk [vmem:[%s6381_s7] sm:$0x3] %vm3938_vm15, %v3933_v6 }
0x15b2   : > { %v3935_v30 = vpop.f32.mrf.mxu0 }
0x15b4   : > { %v4567_v24 = vpop.f32.mrf.mxu0 }
0x15b5 PF: > { %s6382_s10 = sld [smem:[#allocation5_spill]] }
0x15bb   : > { %s40_s9 = sadd.s32 1, %s6382_s10  }
0x15bc   : > { %p37_p6 = scmp.ge.s32.totalorder %s40_s9, 5  }
0x15be   :  { %39 = sbr.rel (!%p37_p6) target bundleno = 20 (0x14), region = 203 }

</bundles_post_ra>
